<compile_context>
chip_gen: v5e
topology: v5e:2x2
jax: 0.10.0
libtpu: 0.0.40
codegen_flags: <defaults>
</compile_context>

<pallas_src>
import numpy as np
import jax
import jax.numpy as jnp
from jax import lax
from jax.experimental import pallas as pl
from jax.experimental.pallas import tpu as pltpu


def get_encoder_size(layer_configurations):
    # TODO(synk): confirm the encoder/decoder split rule against the real get_encoder_size;
    # here the encoder runs down to the bottleneck (smallest channel count).
    cfg = list(layer_configurations)
    return cfg.index(min(cfg)) + 1


# --------------------- in-kernel 0/1 selection-matrix builders ---------------------
# Built from 2-D iota + integer compares (VPU only, no HBM constants, no integer div).
# They are applied on the RIGHT of (C, L) activations, so the length axis stays on the
# 128-lane axis throughout and no lane/sublane value-slicing is ever needed.

def _iota2(rows, cols):
    r = lax.broadcasted_iota(jnp.int32, (rows, cols), 0)
    c = lax.broadcasted_iota(jnp.int32, (rows, cols), 1)
    return r, c


def _sel_shift(rows, cols, shift):
    """sel[r,c] = 1 iff r == c + shift.  (X @ sel)[:, c] = X[:, c+shift], 0 if out of range.
    Encoder Conv1d taps use shift=k; ConvTranspose1d taps use shift=k-(K-1), which also
    realizes the implicit zero padding (out-of-range rows -> all-zero column)."""
    r, c = _iota2(rows, cols)
    return jnp.where(r == c + shift, 1.0, 0.0).astype(jnp.float32)


def _sel_pool(rows, cols, m, j):
    """sel[r,c] = 1 iff r == m*c + j.  (X @ sel)[:, c] = X[:, m*c + j]  (MaxPool window pick)."""
    r, c = _iota2(rows, cols)
    return jnp.where(r == m * c + j, 1.0, 0.0).astype(jnp.float32)


def _sel_upsample(rows, cols, f):
    """sel[r,c] = 1 iff r == c // f   (PyTorch 'nearest' with integer scale_factor)."""
    r, c = _iota2(rows, cols)
    cond = jnp.logical_and(c >= r * f, c < (r + 1) * f)
    return jnp.where(cond, 1.0, 0.0).astype(jnp.float32)


def _sel_resize_shift(rows, size, lc, shift):
    """sel[r,c] = 1 iff r == (c*lc)//size + shift.
    Nearest Upsample(size=...) folded together with a conv-tap shift (division-free)."""
    r, c = _iota2(rows, size)
    t = c * lc
    rs = r - shift
    cond = jnp.logical_and(rs * size <= t, t < (rs + 1) * size)
    return jnp.where(cond, 1.0, 0.0).astype(jnp.float32)


# ------------------------------ fused Pallas kernel --------------------------------

def _make_fused_kernel(metas, B):
    """Whole-network kernel over a block of B samples. metas: static per-layer config."""

    def kernel(*refs):
        x_ref, o_ref = refs[0], refs[-1]
        wb = refs[1:-1]

        # ---- selection matrices: built ONCE per grid step, reused by all B samples ----
        sels = []
        for meta in metas:
            K, Lin, pad = meta["K"], meta["Lin"], meta["pad"]
            Lc = Lin + 2 * pad - K + 1
            if meta["post"] == "resize":
                # final Upsample(size=window) folded into the tap-shift matrices
                taps = [_sel_resize_shift(Lin, meta["size"], Lc, k - pad) for k in range(K)]
            else:
                taps = [_sel_shift(Lin, Lc, k - pad) for k in range(K)]
            extra = None
            if meta["post"] == "pool":
                m = meta["m"]
                extra = [_sel_pool(Lc, Lc // m, m, j) for j in range(m)]
            elif meta["post"] == "up":
                extra = _sel_upsample(Lc, Lc * meta["f"], meta["f"])
            sels.append((taps, extra))

        # ---- per-sample whole-network forward, unrolled over the B-sample block ----
        for s in range(B):
            h = x_ref[s].astype(jnp.float32)                    # (C, L): length on lanes
            for li, meta in enumerate(metas):
                w_ref = wb[2 * li]                              # (K, Cout, Cin), left-multiply
                b_ref = wb[2 * li + 1]                          # (Cout, 1), lane-broadcast bias
                taps, extra = sels[li]

                acc = None
                for k in range(meta["K"]):                      # conv as K (shift, weight) matmuls
                    t = jnp.dot(h, taps[k], preferred_element_type=jnp.float32)
                    t = jnp.dot(w_ref[k], t, preferred_element_type=jnp.float32)
                    acc = (t + b_ref[...]) if k == 0 else acc + t
                if meta["relu"]:
                    acc = jnp.maximum(acc, 0.0)

                post = meta["post"]
                if post == "pool":                              # MaxPool1d(m), floor length
                    h = None
                    for E in extra:                             # m window-pick matmuls + VPU max
                        cand = jnp.dot(acc, E, preferred_element_type=jnp.float32)
                        h = cand if h is None else jnp.maximum(h, cand)
                elif post == "up":                              # Upsample(scale_factor=f), nearest
                    h = jnp.dot(acc, extra, preferred_element_type=jnp.float32)
                else:                                           # resize already folded into taps
                    h = acc

            o_ref[s] = h.astype(o_ref.dtype)                    # NCL row: `window` lanes wide

    return kernel


# ------------------------ parameter packing (done once) ----------------------------

def prepare_layers(params, *, window, maxpool=2, up_f=2):
    """Pack PyTorch-layout params once into tap-major LEFT-multiply layout + static metadata."""
    layers = []
    for (W, b) in params["enc"]:                          # Conv1d weight (Co, Ci, K)
        layers.append(dict(
            w=jnp.transpose(jnp.asarray(W, jnp.float32), (2, 0, 1)),        # (K, Co, Ci)
            b=jnp.asarray(b, jnp.float32).reshape(-1, 1),
            pad=0, relu=True, post="pool", m=int(maxpool)))
    for (W, b) in params["dec"]:                          # ConvTranspose1d weight (Ci, Co, K)
        K = int(W.shape[2])
        layers.append(dict(
            w=jnp.transpose(jnp.asarray(W, jnp.float32), (2, 1, 0))[::-1],  # (K, Co, Ci), taps flipped
            b=jnp.asarray(b, jnp.float32).reshape(-1, 1),
            pad=K - 1, relu=True, post="up", f=int(up_f)))
    W, b = params["final"]
    K = int(W.shape[2])
    layers.append(dict(
        w=jnp.transpose(jnp.asarray(W, jnp.float32), (2, 1, 0))[::-1],
        b=jnp.asarray(b, jnp.float32).reshape(-1, 1),
        pad=K - 1, relu=False, post="resize", size=int(window)))
    return layers


# --------------------------------- forward wrapper ---------------------------------

def cnn1d_forward_pallas(x_ncl, layers, *, block_batch=16):
    x = jnp.asarray(x_ncl, jnp.float32)                   # NCL: length already on lanes
    N, C0, L0 = x.shape

    # Static per-layer metadata (length trace) for the kernel closure.
    metas, L = [], L0
    for lyr in layers:
        K, pad = int(lyr["w"].shape[0]), int(lyr["pad"])
        meta = dict(K=K, Lin=int(L), pad=pad, relu=bool(lyr["relu"]), post=lyr["post"])
        Lc = L + 2 * pad - K + 1
        if lyr["post"] == "pool":
            meta["m"] = int(lyr["m"]); L = Lc // meta["m"]
        elif lyr["post"] == "up":
            meta["f"] = int(lyr["f"]); L = Lc * meta["f"]
        elif lyr["post"] == "resize":
            meta["size"] = int(lyr["size"]); L = meta["size"]
        else:
            L = Lc
        metas.append(meta)
    Lout, Cout = int(L), int(layers[-1]["w"].shape[1])

    # Samples per grid step: amortize per-step overhead, but keep >= 2 grid steps when
    # possible so v7x's two TensorCores both get work (neutral on v5e/v6e).
    B = max(1, min(int(block_batch), pl.cdiv(N, 2)))
    G = pl.cdiv(N, B)
    Npad = G * B
    if Npad != N:
        x = jnp.concatenate([x, jnp.zeros((Npad - N, C0, L0), x.dtype)], axis=0)

    in_specs = [pl.BlockSpec((B, C0, L0), lambda i: (i, 0, 0))]
    args = [x]
    for lyr in layers:
        w, b = lyr["w"], lyr["b"]
        in_specs.append(pl.BlockSpec(w.shape, lambda i: (0, 0, 0)))   # VMEM-resident weights
        in_specs.append(pl.BlockSpec(b.shape, lambda i: (0, 0)))
        args += [w, b]

    out = pl.pallas_call(
        _make_fused_kernel(metas, B),
        grid=(G,),
        in_specs=in_specs,
        out_specs=pl.BlockSpec((B, Cout, Lout), lambda i: (i, 0, 0)),
        out_shape=jax.ShapeDtypeStruct((Npad, Cout, Lout), jnp.float32),
        compiler_params=pltpu.CompilerParams(
            dimension_semantics=("parallel",)),           # batch blocks across TCs on v7x
    )(*args)
    return out[:N]                                        # already NCL, no wrapper transpose


# --------------------------------- init (PyTorch-like) ------------------------------

def init_params(key, input_dim, layer_cfg, ek, dk):
    n_enc = get_encoder_size(layer_cfg)
    params = {"enc": [], "dec": [], "final": None}
    keys = jax.random.split(key, 2 * (len(layer_cfg) + 1))
    ki, in_c = 0, input_dim
    for i in range(n_enc):                                   # Conv1d weights (Co, Ci, K)
        out_c = layer_cfg[i]
        bound = 1.0 / np.sqrt(in_c * ek)
        W = jax.random.uniform(keys[ki], (out_c, in_c, ek), jnp.float32, -bound, bound); ki += 1
        b = jax.random.uniform(keys[ki], (out_c,), jnp.float32, -bound, bound); ki += 1
        params["enc"].append((W, b)); in_c = out_c
    for i in range(n_enc, len(layer_cfg)):                   # ConvTranspose1d (Ci, Co, K)
        out_c = layer_cfg[i]
        bound = 1.0 / np.sqrt(out_c * dk)
        W = jax.random.uniform(keys[ki], (in_c, out_c, dk), jnp.float32, -bound, bound); ki += 1
        b = jax.random.uniform(keys[ki], (out_c,), jnp.float32, -bound, bound); ki += 1
        params["dec"].append((W, b)); in_c = out_c
    bound = 1.0 / np.sqrt(input_dim * dk)
    W = jax.random.uniform(keys[ki], (in_c, input_dim, dk), jnp.float32, -bound, bound); ki += 1
    b = jax.random.uniform(keys[ki], (input_dim,), jnp.float32, -bound, bound)
    params["final"] = (W, b)
    return params


# ------------------------------ numpy reference ----------------------------------

def cnn1d_forward_ref(x_ncl, params, *, window, maxpool=2, up_f=2):
    x = np.asarray(x_ncl, np.float64)

    def conv1d(x, W, b):                      # x (N,Ci,L), W (Co,Ci,K)
        Co, Ci, K = W.shape
        Lo = x.shape[2] - K + 1
        out = np.zeros((x.shape[0], Co, Lo))
        for k in range(K):
            out += np.einsum("ncl,oc->nol", x[:, :, k:k + Lo], W[:, :, k])
        return out + np.asarray(b)[None, :, None]

    def conv_t(x, W, b):                      # W (Ci, Co, K)
        K = W.shape[2]
        xp = np.pad(x, ((0, 0), (0, 0), (K - 1, K - 1)))
        Wc = np.transpose(np.asarray(W), (1, 0, 2))[:, :, ::-1]
        return conv1d(xp, Wc, b)

    def maxpool1d(x, m):
        Lp = x.shape[2] // m
        return x[:, :, :Lp * m].reshape(x.shape[0], x.shape[1], Lp, m).max(-1)

    def upsample(x, Lout):
        idx = (np.arange(Lout) * x.shape[2]) // Lout
        return x[:, :, idx]

    for (W, b) in params["enc"]:
        x = maxpool1d(np.maximum(conv1d(x, np.asarray(W), b), 0.0), maxpool)
    for (W, b) in params["dec"]:
        x = upsample(np.maximum(conv_t(x, W, b), 0.0),
                     (x.shape[2] + W.shape[2] - 1) * up_f)
    W, b = params["final"]
    return upsample(conv_t(x, W, b), window)


# ---------------------------------- main ------------------------------------------

if __name__ == "__main__":
    input_dim, window = 4, 32
    layer_cfg = [16, 8, 16]
    enc_k, dec_k = 3, 3
    batch = 8                                             # -> B=4 samples/step, 2 grid steps

    key = jax.random.PRNGKey(0)
    kx, kp = jax.random.split(key)
    x = jax.random.normal(kx, (batch, input_dim, window), jnp.float32)   # NCL (PyTorch NCW)
    params = init_params(kp, input_dim, layer_cfg, enc_k, dec_k)
    layers = prepare_layers(params, window=window, maxpool=2, up_f=2)    # packed once

    out = cnn1d_forward_pallas(x, layers, block_batch=16)
    out = jax.block_until_ready(out)
    assert out.shape == (batch, input_dim, window), out.shape

    ref = cnn1d_forward_ref(np.asarray(x), params, window=window, maxpool=2, up_f=2)
    np.testing.assert_allclose(np.asarray(out), ref, rtol=5e-4, atol=5e-5)

    print("KERNEL_OK")
</pallas_src>

<mosaic_0001>
module attributes {stable_mosaic.version = 11 : i64} {
  func.func @kernel(%arg0: i32, %arg1: memref<4x4x32xf32, #tpu.memory_space<vmem>>, %arg2: memref<3x16x4xf32, #tpu.memory_space<vmem>>, %arg3: memref<16x1xf32, #tpu.memory_space<vmem>>, %arg4: memref<3x8x16xf32, #tpu.memory_space<vmem>>, %arg5: memref<8x1xf32, #tpu.memory_space<vmem>>, %arg6: memref<3x16x8xf32, #tpu.memory_space<vmem>>, %arg7: memref<16x1xf32, #tpu.memory_space<vmem>>, %arg8: memref<3x4x16xf32, #tpu.memory_space<vmem>>, %arg9: memref<4x1xf32, #tpu.memory_space<vmem>>, %arg10: memref<4x4x32xf32, #tpu.memory_space<vmem>>) attributes {dimension_semantics = [#tpu.dimension_semantics<parallel>], iteration_bounds = array<i64: 2>, scalar_prefetch = 0 : i64, scratch_operands = 0 : i64, tpu.core_type = #tpu.core_type<tc>, window_params = [{transform_indices = @transform_0, window_bounds = array<i64: 4, 4, 32>}, {pipeline_mode = #tpu.pipeline_mode<synchronous>, transform_indices = @transform_1, window_bounds = array<i64: 3, 16, 4>}, {pipeline_mode = #tpu.pipeline_mode<synchronous>, transform_indices = @transform_2, window_bounds = array<i64: 16, 1>}, {pipeline_mode = #tpu.pipeline_mode<synchronous>, transform_indices = @transform_3, window_bounds = array<i64: 3, 8, 16>}, {pipeline_mode = #tpu.pipeline_mode<synchronous>, transform_indices = @transform_4, window_bounds = array<i64: 8, 1>}, {pipeline_mode = #tpu.pipeline_mode<synchronous>, transform_indices = @transform_5, window_bounds = array<i64: 3, 16, 8>}, {pipeline_mode = #tpu.pipeline_mode<synchronous>, transform_indices = @transform_6, window_bounds = array<i64: 16, 1>}, {pipeline_mode = #tpu.pipeline_mode<synchronous>, transform_indices = @transform_7, window_bounds = array<i64: 3, 4, 16>}, {pipeline_mode = #tpu.pipeline_mode<synchronous>, transform_indices = @transform_8, window_bounds = array<i64: 4, 1>}, {transform_indices = @transform_9, window_bounds = array<i64: 4, 4, 32>}]} {
    %0 = tpu.iota {dimensions = array<i32: 0>} : vector<32x30xi32>
    %1 = tpu.iota {dimensions = array<i32: 1>} : vector<32x30xi32>
    %c0_i32 = arith.constant 0 : i32
    %2 = vector.broadcast %c0_i32 : i32 to vector<32x30xi32>
    %3 = arith.addi %1, %2 : vector<32x30xi32>
    %4 = arith.cmpi eq, %0, %3 : vector<32x30xi32>
    %cst = arith.constant 1.000000e+00 : f32
    %cst_0 = arith.constant 0.000000e+00 : f32
    %5 = vector.broadcast %cst : f32 to vector<32x30xf32>
    %6 = vector.broadcast %cst_0 : f32 to vector<32x30xf32>
    %7 = arith.select %4, %5, %6 : vector<32x30xi1>, vector<32x30xf32>
    %8 = tpu.iota {dimensions = array<i32: 0>} : vector<32x30xi32>
    %9 = tpu.iota {dimensions = array<i32: 1>} : vector<32x30xi32>
    %c1_i32 = arith.constant 1 : i32
    %10 = vector.broadcast %c1_i32 : i32 to vector<32x30xi32>
    %11 = arith.addi %9, %10 : vector<32x30xi32>
    %12 = arith.cmpi eq, %8, %11 : vector<32x30xi32>
    %cst_1 = arith.constant 1.000000e+00 : f32
    %cst_2 = arith.constant 0.000000e+00 : f32
    %13 = vector.broadcast %cst_1 : f32 to vector<32x30xf32>
    %14 = vector.broadcast %cst_2 : f32 to vector<32x30xf32>
    %15 = arith.select %12, %13, %14 : vector<32x30xi1>, vector<32x30xf32>
    %16 = tpu.iota {dimensions = array<i32: 0>} : vector<32x30xi32>
    %17 = tpu.iota {dimensions = array<i32: 1>} : vector<32x30xi32>
    %c2_i32 = arith.constant 2 : i32
    %18 = vector.broadcast %c2_i32 : i32 to vector<32x30xi32>
    %19 = arith.addi %17, %18 : vector<32x30xi32>
    %20 = arith.cmpi eq, %16, %19 : vector<32x30xi32>
    %cst_3 = arith.constant 1.000000e+00 : f32
    %cst_4 = arith.constant 0.000000e+00 : f32
    %21 = vector.broadcast %cst_3 : f32 to vector<32x30xf32>
    %22 = vector.broadcast %cst_4 : f32 to vector<32x30xf32>
    %23 = arith.select %20, %21, %22 : vector<32x30xi1>, vector<32x30xf32>
    %24 = tpu.iota {dimensions = array<i32: 0>} : vector<30x15xi32>
    %25 = tpu.iota {dimensions = array<i32: 1>} : vector<30x15xi32>
    %c2_i32_5 = arith.constant 2 : i32
    %26 = vector.broadcast %c2_i32_5 : i32 to vector<30x15xi32>
    %27 = arith.muli %26, %25 : vector<30x15xi32>
    %c0_i32_6 = arith.constant 0 : i32
    %28 = vector.broadcast %c0_i32_6 : i32 to vector<30x15xi32>
    %29 = arith.addi %27, %28 : vector<30x15xi32>
    %30 = arith.cmpi eq, %24, %29 : vector<30x15xi32>
    %cst_7 = arith.constant 1.000000e+00 : f32
    %cst_8 = arith.constant 0.000000e+00 : f32
    %31 = vector.broadcast %cst_7 : f32 to vector<30x15xf32>
    %32 = vector.broadcast %cst_8 : f32 to vector<30x15xf32>
    %33 = arith.select %30, %31, %32 : vector<30x15xi1>, vector<30x15xf32>
    %34 = tpu.iota {dimensions = array<i32: 0>} : vector<30x15xi32>
    %35 = tpu.iota {dimensions = array<i32: 1>} : vector<30x15xi32>
    %c2_i32_9 = arith.constant 2 : i32
    %36 = vector.broadcast %c2_i32_9 : i32 to vector<30x15xi32>
    %37 = arith.muli %36, %35 : vector<30x15xi32>
    %c1_i32_10 = arith.constant 1 : i32
    %38 = vector.broadcast %c1_i32_10 : i32 to vector<30x15xi32>
    %39 = arith.addi %37, %38 : vector<30x15xi32>
    %40 = arith.cmpi eq, %34, %39 : vector<30x15xi32>
    %cst_11 = arith.constant 1.000000e+00 : f32
    %cst_12 = arith.constant 0.000000e+00 : f32
    %41 = vector.broadcast %cst_11 : f32 to vector<30x15xf32>
    %42 = vector.broadcast %cst_12 : f32 to vector<30x15xf32>
    %43 = arith.select %40, %41, %42 : vector<30x15xi1>, vector<30x15xf32>
    %44 = tpu.iota {dimensions = array<i32: 0>} : vector<15x13xi32>
    %45 = tpu.iota {dimensions = array<i32: 1>} : vector<15x13xi32>
    %c0_i32_13 = arith.constant 0 : i32
    %46 = vector.broadcast %c0_i32_13 : i32 to vector<15x13xi32>
    %47 = arith.addi %45, %46 : vector<15x13xi32>
    %48 = arith.cmpi eq, %44, %47 : vector<15x13xi32>
    %cst_14 = arith.constant 1.000000e+00 : f32
    %cst_15 = arith.constant 0.000000e+00 : f32
    %49 = vector.broadcast %cst_14 : f32 to vector<15x13xf32>
    %50 = vector.broadcast %cst_15 : f32 to vector<15x13xf32>
    %51 = arith.select %48, %49, %50 : vector<15x13xi1>, vector<15x13xf32>
    %52 = tpu.iota {dimensions = array<i32: 0>} : vector<15x13xi32>
    %53 = tpu.iota {dimensions = array<i32: 1>} : vector<15x13xi32>
    %c1_i32_16 = arith.constant 1 : i32
    %54 = vector.broadcast %c1_i32_16 : i32 to vector<15x13xi32>
    %55 = arith.addi %53, %54 : vector<15x13xi32>
    %56 = arith.cmpi eq, %52, %55 : vector<15x13xi32>
    %cst_17 = arith.constant 1.000000e+00 : f32
    %cst_18 = arith.constant 0.000000e+00 : f32
    %57 = vector.broadcast %cst_17 : f32 to vector<15x13xf32>
    %58 = vector.broadcast %cst_18 : f32 to vector<15x13xf32>
    %59 = arith.select %56, %57, %58 : vector<15x13xi1>, vector<15x13xf32>
    %60 = tpu.iota {dimensions = array<i32: 0>} : vector<15x13xi32>
    %61 = tpu.iota {dimensions = array<i32: 1>} : vector<15x13xi32>
    %c2_i32_19 = arith.constant 2 : i32
    %62 = vector.broadcast %c2_i32_19 : i32 to vector<15x13xi32>
    %63 = arith.addi %61, %62 : vector<15x13xi32>
    %64 = arith.cmpi eq, %60, %63 : vector<15x13xi32>
    %cst_20 = arith.constant 1.000000e+00 : f32
    %cst_21 = arith.constant 0.000000e+00 : f32
    %65 = vector.broadcast %cst_20 : f32 to vector<15x13xf32>
    %66 = vector.broadcast %cst_21 : f32 to vector<15x13xf32>
    %67 = arith.select %64, %65, %66 : vector<15x13xi1>, vector<15x13xf32>
    %68 = tpu.iota {dimensions = array<i32: 0>} : vector<13x6xi32>
    %69 = tpu.iota {dimensions = array<i32: 1>} : vector<13x6xi32>
    %c2_i32_22 = arith.constant 2 : i32
    %70 = vector.broadcast %c2_i32_22 : i32 to vector<13x6xi32>
    %71 = arith.muli %70, %69 : vector<13x6xi32>
    %c0_i32_23 = arith.constant 0 : i32
    %72 = vector.broadcast %c0_i32_23 : i32 to vector<13x6xi32>
    %73 = arith.addi %71, %72 : vector<13x6xi32>
    %74 = arith.cmpi eq, %68, %73 : vector<13x6xi32>
    %cst_24 = arith.constant 1.000000e+00 : f32
    %cst_25 = arith.constant 0.000000e+00 : f32
    %75 = vector.broadcast %cst_24 : f32 to vector<13x6xf32>
    %76 = vector.broadcast %cst_25 : f32 to vector<13x6xf32>
    %77 = arith.select %74, %75, %76 : vector<13x6xi1>, vector<13x6xf32>
    %78 = tpu.iota {dimensions = array<i32: 0>} : vector<13x6xi32>
    %79 = tpu.iota {dimensions = array<i32: 1>} : vector<13x6xi32>
    %c2_i32_26 = arith.constant 2 : i32
    %80 = vector.broadcast %c2_i32_26 : i32 to vector<13x6xi32>
    %81 = arith.muli %80, %79 : vector<13x6xi32>
    %c1_i32_27 = arith.constant 1 : i32
    %82 = vector.broadcast %c1_i32_27 : i32 to vector<13x6xi32>
    %83 = arith.addi %81, %82 : vector<13x6xi32>
    %84 = arith.cmpi eq, %78, %83 : vector<13x6xi32>
    %cst_28 = arith.constant 1.000000e+00 : f32
    %cst_29 = arith.constant 0.000000e+00 : f32
    %85 = vector.broadcast %cst_28 : f32 to vector<13x6xf32>
    %86 = vector.broadcast %cst_29 : f32 to vector<13x6xf32>
    %87 = arith.select %84, %85, %86 : vector<13x6xi1>, vector<13x6xf32>
    %88 = tpu.iota {dimensions = array<i32: 0>} : vector<6x8xi32>
    %89 = tpu.iota {dimensions = array<i32: 1>} : vector<6x8xi32>
    %c-2_i32 = arith.constant -2 : i32
    %90 = vector.broadcast %c-2_i32 : i32 to vector<6x8xi32>
    %91 = arith.addi %89, %90 : vector<6x8xi32>
    %92 = arith.cmpi eq, %88, %91 : vector<6x8xi32>
    %cst_30 = arith.constant 1.000000e+00 : f32
    %cst_31 = arith.constant 0.000000e+00 : f32
    %93 = vector.broadcast %cst_30 : f32 to vector<6x8xf32>
    %94 = vector.broadcast %cst_31 : f32 to vector<6x8xf32>
    %95 = arith.select %92, %93, %94 : vector<6x8xi1>, vector<6x8xf32>
    %96 = tpu.iota {dimensions = array<i32: 0>} : vector<6x8xi32>
    %97 = tpu.iota {dimensions = array<i32: 1>} : vector<6x8xi32>
    %c-1_i32 = arith.constant -1 : i32
    %98 = vector.broadcast %c-1_i32 : i32 to vector<6x8xi32>
    %99 = arith.addi %97, %98 : vector<6x8xi32>
    %100 = arith.cmpi eq, %96, %99 : vector<6x8xi32>
    %cst_32 = arith.constant 1.000000e+00 : f32
    %cst_33 = arith.constant 0.000000e+00 : f32
    %101 = vector.broadcast %cst_32 : f32 to vector<6x8xf32>
    %102 = vector.broadcast %cst_33 : f32 to vector<6x8xf32>
    %103 = arith.select %100, %101, %102 : vector<6x8xi1>, vector<6x8xf32>
    %104 = tpu.iota {dimensions = array<i32: 0>} : vector<6x8xi32>
    %105 = tpu.iota {dimensions = array<i32: 1>} : vector<6x8xi32>
    %c0_i32_34 = arith.constant 0 : i32
    %106 = vector.broadcast %c0_i32_34 : i32 to vector<6x8xi32>
    %107 = arith.addi %105, %106 : vector<6x8xi32>
    %108 = arith.cmpi eq, %104, %107 : vector<6x8xi32>
    %cst_35 = arith.constant 1.000000e+00 : f32
    %cst_36 = arith.constant 0.000000e+00 : f32
    %109 = vector.broadcast %cst_35 : f32 to vector<6x8xf32>
    %110 = vector.broadcast %cst_36 : f32 to vector<6x8xf32>
    %111 = arith.select %108, %109, %110 : vector<6x8xi1>, vector<6x8xf32>
    %112 = tpu.iota {dimensions = array<i32: 0>} : vector<8x16xi32>
    %113 = tpu.iota {dimensions = array<i32: 1>} : vector<8x16xi32>
    %c2_i32_37 = arith.constant 2 : i32
    %114 = vector.broadcast %c2_i32_37 : i32 to vector<8x16xi32>
    %115 = arith.muli %112, %114 : vector<8x16xi32>
    %116 = arith.cmpi sge, %113, %115 : vector<8x16xi32>
    %c1_i32_38 = arith.constant 1 : i32
    %117 = vector.broadcast %c1_i32_38 : i32 to vector<8x16xi32>
    %118 = arith.addi %112, %117 : vector<8x16xi32>
    %c2_i32_39 = arith.constant 2 : i32
    %119 = vector.broadcast %c2_i32_39 : i32 to vector<8x16xi32>
    %120 = arith.muli %118, %119 : vector<8x16xi32>
    %121 = arith.cmpi slt, %113, %120 : vector<8x16xi32>
    %122 = arith.andi %116, %121 : vector<8x16xi1>
    %cst_40 = arith.constant 1.000000e+00 : f32
    %cst_41 = arith.constant 0.000000e+00 : f32
    %123 = vector.broadcast %cst_40 : f32 to vector<8x16xf32>
    %124 = vector.broadcast %cst_41 : f32 to vector<8x16xf32>
    %125 = arith.select %122, %123, %124 : vector<8x16xi1>, vector<8x16xf32>
    %126 = tpu.iota {dimensions = array<i32: 0>} : vector<16x32xi32>
    %127 = tpu.iota {dimensions = array<i32: 1>} : vector<16x32xi32>
    %c18_i32 = arith.constant 18 : i32
    %128 = vector.broadcast %c18_i32 : i32 to vector<16x32xi32>
    %129 = arith.muli %127, %128 : vector<16x32xi32>
    %c-2_i32_42 = arith.constant -2 : i32
    %130 = vector.broadcast %c-2_i32_42 : i32 to vector<16x32xi32>
    %131 = arith.subi %126, %130 : vector<16x32xi32>
    %c32_i32 = arith.constant 32 : i32
    %132 = vector.broadcast %c32_i32 : i32 to vector<16x32xi32>
    %133 = arith.muli %131, %132 : vector<16x32xi32>
    %134 = arith.cmpi sle, %133, %129 : vector<16x32xi32>
    %c1_i32_43 = arith.constant 1 : i32
    %135 = vector.broadcast %c1_i32_43 : i32 to vector<16x32xi32>
    %136 = arith.addi %131, %135 : vector<16x32xi32>
    %c32_i32_44 = arith.constant 32 : i32
    %137 = vector.broadcast %c32_i32_44 : i32 to vector<16x32xi32>
    %138 = arith.muli %136, %137 : vector<16x32xi32>
    %139 = arith.cmpi slt, %129, %138 : vector<16x32xi32>
    %140 = arith.andi %134, %139 : vector<16x32xi1>
    %cst_45 = arith.constant 1.000000e+00 : f32
    %cst_46 = arith.constant 0.000000e+00 : f32
    %141 = vector.broadcast %cst_45 : f32 to vector<16x32xf32>
    %142 = vector.broadcast %cst_46 : f32 to vector<16x32xf32>
    %143 = arith.select %140, %141, %142 : vector<16x32xi1>, vector<16x32xf32>
    %144 = tpu.iota {dimensions = array<i32: 0>} : vector<16x32xi32>
    %145 = tpu.iota {dimensions = array<i32: 1>} : vector<16x32xi32>
    %c18_i32_47 = arith.constant 18 : i32
    %146 = vector.broadcast %c18_i32_47 : i32 to vector<16x32xi32>
    %147 = arith.muli %145, %146 : vector<16x32xi32>
    %c-1_i32_48 = arith.constant -1 : i32
    %148 = vector.broadcast %c-1_i32_48 : i32 to vector<16x32xi32>
    %149 = arith.subi %144, %148 : vector<16x32xi32>
    %c32_i32_49 = arith.constant 32 : i32
    %150 = vector.broadcast %c32_i32_49 : i32 to vector<16x32xi32>
    %151 = arith.muli %149, %150 : vector<16x32xi32>
    %152 = arith.cmpi sle, %151, %147 : vector<16x32xi32>
    %c1_i32_50 = arith.constant 1 : i32
    %153 = vector.broadcast %c1_i32_50 : i32 to vector<16x32xi32>
    %154 = arith.addi %149, %153 : vector<16x32xi32>
    %c32_i32_51 = arith.constant 32 : i32
    %155 = vector.broadcast %c32_i32_51 : i32 to vector<16x32xi32>
    %156 = arith.muli %154, %155 : vector<16x32xi32>
    %157 = arith.cmpi slt, %147, %156 : vector<16x32xi32>
    %158 = arith.andi %152, %157 : vector<16x32xi1>
    %cst_52 = arith.constant 1.000000e+00 : f32
    %cst_53 = arith.constant 0.000000e+00 : f32
    %159 = vector.broadcast %cst_52 : f32 to vector<16x32xf32>
    %160 = vector.broadcast %cst_53 : f32 to vector<16x32xf32>
    %161 = arith.select %158, %159, %160 : vector<16x32xi1>, vector<16x32xf32>
    %162 = tpu.iota {dimensions = array<i32: 0>} : vector<16x32xi32>
    %163 = tpu.iota {dimensions = array<i32: 1>} : vector<16x32xi32>
    %c18_i32_54 = arith.constant 18 : i32
    %164 = vector.broadcast %c18_i32_54 : i32 to vector<16x32xi32>
    %165 = arith.muli %163, %164 : vector<16x32xi32>
    %c0_i32_55 = arith.constant 0 : i32
    %166 = vector.broadcast %c0_i32_55 : i32 to vector<16x32xi32>
    %167 = arith.subi %162, %166 : vector<16x32xi32>
    %c32_i32_56 = arith.constant 32 : i32
    %168 = vector.broadcast %c32_i32_56 : i32 to vector<16x32xi32>
    %169 = arith.muli %167, %168 : vector<16x32xi32>
    %170 = arith.cmpi sle, %169, %165 : vector<16x32xi32>
    %c1_i32_57 = arith.constant 1 : i32
    %171 = vector.broadcast %c1_i32_57 : i32 to vector<16x32xi32>
    %172 = arith.addi %167, %171 : vector<16x32xi32>
    %c32_i32_58 = arith.constant 32 : i32
    %173 = vector.broadcast %c32_i32_58 : i32 to vector<16x32xi32>
    %174 = arith.muli %172, %173 : vector<16x32xi32>
    %175 = arith.cmpi slt, %165, %174 : vector<16x32xi32>
    %176 = arith.andi %170, %175 : vector<16x32xi1>
    %cst_59 = arith.constant 1.000000e+00 : f32
    %cst_60 = arith.constant 0.000000e+00 : f32
    %177 = vector.broadcast %cst_59 : f32 to vector<16x32xf32>
    %178 = vector.broadcast %cst_60 : f32 to vector<16x32xf32>
    %179 = arith.select %176, %177, %178 : vector<16x32xi1>, vector<16x32xf32>
    %c0 = arith.constant 0 : index
    %c0_61 = arith.constant 0 : index
    %c0_62 = arith.constant 0 : index
    %180 = vector.load %arg1[%c0, %c0_61, %c0_62] : memref<4x4x32xf32, #tpu.memory_space<vmem>>, vector<1x4x32xf32>
    %181 = vector.shape_cast %180 : vector<1x4x32xf32> to vector<4x32xf32>
    %cst_63 = arith.constant dense<0.000000e+00> : vector<4x30xf32>
    %182 = tpu.matmul %181, %7, %cst_63 {dimension_numbers = #tpu.dot_dimension_numbers<[1], [0], [0], [1], [0, 0, 1, 1], [], []>} : vector<4x32xf32>, vector<32x30xf32>, vector<4x30xf32> -> vector<4x30xf32>
    %c0_64 = arith.constant 0 : index
    %c0_65 = arith.constant 0 : index
    %c0_66 = arith.constant 0 : index
    %183 = vector.load %arg2[%c0_64, %c0_65, %c0_66] : memref<3x16x4xf32, #tpu.memory_space<vmem>>, vector<1x16x4xf32>
    %184 = vector.shape_cast %183 : vector<1x16x4xf32> to vector<16x4xf32>
    %cst_67 = arith.constant dense<0.000000e+00> : vector<16x30xf32>
    %185 = tpu.matmul %184, %182, %cst_67 {dimension_numbers = #tpu.dot_dimension_numbers<[1], [0], [0], [1], [0, 0, 1, 1], [], []>} : vector<16x4xf32>, vector<4x30xf32>, vector<16x30xf32> -> vector<16x30xf32>
    %c0_68 = arith.constant 0 : index
    %c0_69 = arith.constant 0 : index
    %186 = vector.load %arg3[%c0_68, %c0_69] : memref<16x1xf32, #tpu.memory_space<vmem>>, vector<16x1xf32>
    %187 = vector.broadcast %186 : vector<16x1xf32> to vector<16x30xf32>
    %188 = arith.addf %185, %187 : vector<16x30xf32>
    %cst_70 = arith.constant dense<0.000000e+00> : vector<4x30xf32>
    %189 = tpu.matmul %181, %15, %cst_70 {dimension_numbers = #tpu.dot_dimension_numbers<[1], [0], [0], [1], [0, 0, 1, 1], [], []>} : vector<4x32xf32>, vector<32x30xf32>, vector<4x30xf32> -> vector<4x30xf32>
    %c1 = arith.constant 1 : index
    %c0_71 = arith.constant 0 : index
    %c0_72 = arith.constant 0 : index
    %190 = vector.load %arg2[%c1, %c0_71, %c0_72] : memref<3x16x4xf32, #tpu.memory_space<vmem>>, vector<1x16x4xf32>
    %191 = vector.shape_cast %190 : vector<1x16x4xf32> to vector<16x4xf32>
    %cst_73 = arith.constant dense<0.000000e+00> : vector<16x30xf32>
    %192 = tpu.matmul %191, %189, %cst_73 {dimension_numbers = #tpu.dot_dimension_numbers<[1], [0], [0], [1], [0, 0, 1, 1], [], []>} : vector<16x4xf32>, vector<4x30xf32>, vector<16x30xf32> -> vector<16x30xf32>
    %193 = arith.addf %188, %192 : vector<16x30xf32>
    %cst_74 = arith.constant dense<0.000000e+00> : vector<4x30xf32>
    %194 = tpu.matmul %181, %23, %cst_74 {dimension_numbers = #tpu.dot_dimension_numbers<[1], [0], [0], [1], [0, 0, 1, 1], [], []>} : vector<4x32xf32>, vector<32x30xf32>, vector<4x30xf32> -> vector<4x30xf32>
    %c2 = arith.constant 2 : index
    %c0_75 = arith.constant 0 : index
    %c0_76 = arith.constant 0 : index
    %195 = vector.load %arg2[%c2, %c0_75, %c0_76] : memref<3x16x4xf32, #tpu.memory_space<vmem>>, vector<1x16x4xf32>
    %196 = vector.shape_cast %195 : vector<1x16x4xf32> to vector<16x4xf32>
    %cst_77 = arith.constant dense<0.000000e+00> : vector<16x30xf32>
    %197 = tpu.matmul %196, %194, %cst_77 {dimension_numbers = #tpu.dot_dimension_numbers<[1], [0], [0], [1], [0, 0, 1, 1], [], []>} : vector<16x4xf32>, vector<4x30xf32>, vector<16x30xf32> -> vector<16x30xf32>
    %198 = arith.addf %193, %197 : vector<16x30xf32>
    %cst_78 = arith.constant 0.000000e+00 : f32
    %199 = vector.broadcast %cst_78 : f32 to vector<16x30xf32>
    %200 = arith.maximumf %198, %199 : vector<16x30xf32>
    %cst_79 = arith.constant dense<0.000000e+00> : vector<16x15xf32>
    %201 = tpu.matmul %200, %33, %cst_79 {dimension_numbers = #tpu.dot_dimension_numbers<[1], [0], [0], [1], [0, 0, 1, 1], [], []>} : vector<16x30xf32>, vector<30x15xf32>, vector<16x15xf32> -> vector<16x15xf32>
    %cst_80 = arith.constant dense<0.000000e+00> : vector<16x15xf32>
    %202 = tpu.matmul %200, %43, %cst_80 {dimension_numbers = #tpu.dot_dimension_numbers<[1], [0], [0], [1], [0, 0, 1, 1], [], []>} : vector<16x30xf32>, vector<30x15xf32>, vector<16x15xf32> -> vector<16x15xf32>
    %203 = arith.maximumf %201, %202 : vector<16x15xf32>
    %cst_81 = arith.constant dense<0.000000e+00> : vector<16x13xf32>
    %204 = tpu.matmul %203, %51, %cst_81 {dimension_numbers = #tpu.dot_dimension_numbers<[1], [0], [0], [1], [0, 0, 1, 1], [], []>} : vector<16x15xf32>, vector<15x13xf32>, vector<16x13xf32> -> vector<16x13xf32>
    %c0_82 = arith.constant 0 : index
    %c0_83 = arith.constant 0 : index
    %c0_84 = arith.constant 0 : index
    %205 = vector.load %arg4[%c0_82, %c0_83, %c0_84] : memref<3x8x16xf32, #tpu.memory_space<vmem>>, vector<1x8x16xf32>
    %206 = vector.shape_cast %205 : vector<1x8x16xf32> to vector<8x16xf32>
    %cst_85 = arith.constant dense<0.000000e+00> : vector<8x13xf32>
    %207 = tpu.matmul %206, %204, %cst_85 {dimension_numbers = #tpu.dot_dimension_numbers<[1], [0], [0], [1], [0, 0, 1, 1], [], []>} : vector<8x16xf32>, vector<16x13xf32>, vector<8x13xf32> -> vector<8x13xf32>
    %c0_86 = arith.constant 0 : index
    %c0_87 = arith.constant 0 : index
    %208 = vector.load %arg5[%c0_86, %c0_87] : memref<8x1xf32, #tpu.memory_space<vmem>>, vector<8x1xf32>
    %209 = vector.broadcast %208 : vector<8x1xf32> to vector<8x13xf32>
    %210 = arith.addf %207, %209 : vector<8x13xf32>
    %cst_88 = arith.constant dense<0.000000e+00> : vector<16x13xf32>
    %211 = tpu.matmul %203, %59, %cst_88 {dimension_numbers = #tpu.dot_dimension_numbers<[1], [0], [0], [1], [0, 0, 1, 1], [], []>} : vector<16x15xf32>, vector<15x13xf32>, vector<16x13xf32> -> vector<16x13xf32>
    %c1_89 = arith.constant 1 : index
    %c0_90 = arith.constant 0 : index
    %c0_91 = arith.constant 0 : index
    %212 = vector.load %arg4[%c1_89, %c0_90, %c0_91] : memref<3x8x16xf32, #tpu.memory_space<vmem>>, vector<1x8x16xf32>
    %213 = vector.shape_cast %212 : vector<1x8x16xf32> to vector<8x16xf32>
    %cst_92 = arith.constant dense<0.000000e+00> : vector<8x13xf32>
    %214 = tpu.matmul %213, %211, %cst_92 {dimension_numbers = #tpu.dot_dimension_numbers<[1], [0], [0], [1], [0, 0, 1, 1], [], []>} : vector<8x16xf32>, vector<16x13xf32>, vector<8x13xf32> -> vector<8x13xf32>
    %215 = arith.addf %210, %214 : vector<8x13xf32>
    %cst_93 = arith.constant dense<0.000000e+00> : vector<16x13xf32>
    %216 = tpu.matmul %203, %67, %cst_93 {dimension_numbers = #tpu.dot_dimension_numbers<[1], [0], [0], [1], [0, 0, 1, 1], [], []>} : vector<16x15xf32>, vector<15x13xf32>, vector<16x13xf32> -> vector<16x13xf32>
    %c2_94 = arith.constant 2 : index
    %c0_95 = arith.constant 0 : index
    %c0_96 = arith.constant 0 : index
    %217 = vector.load %arg4[%c2_94, %c0_95, %c0_96] : memref<3x8x16xf32, #tpu.memory_space<vmem>>, vector<1x8x16xf32>
    %218 = vector.shape_cast %217 : vector<1x8x16xf32> to vector<8x16xf32>
    %cst_97 = arith.constant dense<0.000000e+00> : vector<8x13xf32>
    %219 = tpu.matmul %218, %216, %cst_97 {dimension_numbers = #tpu.dot_dimension_numbers<[1], [0], [0], [1], [0, 0, 1, 1], [], []>} : vector<8x16xf32>, vector<16x13xf32>, vector<8x13xf32> -> vector<8x13xf32>
    %220 = arith.addf %215, %219 : vector<8x13xf32>
    %cst_98 = arith.constant 0.000000e+00 : f32
    %221 = vector.broadcast %cst_98 : f32 to vector<8x13xf32>
    %222 = arith.maximumf %220, %221 : vector<8x13xf32>
    %cst_99 = arith.constant dense<0.000000e+00> : vector<8x6xf32>
    %223 = tpu.matmul %222, %77, %cst_99 {dimension_numbers = #tpu.dot_dimension_numbers<[1], [0], [0], [1], [0, 0, 1, 1], [], []>} : vector<8x13xf32>, vector<13x6xf32>, vector<8x6xf32> -> vector<8x6xf32>
    %cst_100 = arith.constant dense<0.000000e+00> : vector<8x6xf32>
    %224 = tpu.matmul %222, %87, %cst_100 {dimension_numbers = #tpu.dot_dimension_numbers<[1], [0], [0], [1], [0, 0, 1, 1], [], []>} : vector<8x13xf32>, vector<13x6xf32>, vector<8x6xf32> -> vector<8x6xf32>
    %225 = arith.maximumf %223, %224 : vector<8x6xf32>
    %cst_101 = arith.constant dense<0.000000e+00> : vector<8x8xf32>
    %226 = tpu.matmul %225, %95, %cst_101 {dimension_numbers = #tpu.dot_dimension_numbers<[1], [0], [0], [1], [0, 0, 1, 1], [], []>} : vector<8x6xf32>, vector<6x8xf32>, vector<8x8xf32> -> vector<8x8xf32>
    %c0_102 = arith.constant 0 : index
    %c0_103 = arith.constant 0 : index
    %c0_104 = arith.constant 0 : index
    %227 = vector.load %arg6[%c0_102, %c0_103, %c0_104] : memref<3x16x8xf32, #tpu.memory_space<vmem>>, vector<1x16x8xf32>
    %228 = vector.shape_cast %227 : vector<1x16x8xf32> to vector<16x8xf32>
    %cst_105 = arith.constant dense<0.000000e+00> : vector<16x8xf32>
    %229 = tpu.matmul %228, %226, %cst_105 {dimension_numbers = #tpu.dot_dimension_numbers<[1], [0], [0], [1], [0, 0, 1, 1], [], []>} : vector<16x8xf32>, vector<8x8xf32>, vector<16x8xf32> -> vector<16x8xf32>
    %c0_106 = arith.constant 0 : index
    %c0_107 = arith.constant 0 : index
    %230 = vector.load %arg7[%c0_106, %c0_107] : memref<16x1xf32, #tpu.memory_space<vmem>>, vector<16x1xf32>
    %231 = vector.broadcast %230 : vector<16x1xf32> to vector<16x8xf32>
    %232 = arith.addf %229, %231 : vector<16x8xf32>
    %cst_108 = arith.constant dense<0.000000e+00> : vector<8x8xf32>
    %233 = tpu.matmul %225, %103, %cst_108 {dimension_numbers = #tpu.dot_dimension_numbers<[1], [0], [0], [1], [0, 0, 1, 1], [], []>} : vector<8x6xf32>, vector<6x8xf32>, vector<8x8xf32> -> vector<8x8xf32>
    %c1_109 = arith.constant 1 : index
    %c0_110 = arith.constant 0 : index
    %c0_111 = arith.constant 0 : index
    %234 = vector.load %arg6[%c1_109, %c0_110, %c0_111] : memref<3x16x8xf32, #tpu.memory_space<vmem>>, vector<1x16x8xf32>
    %235 = vector.shape_cast %234 : vector<1x16x8xf32> to vector<16x8xf32>
    %cst_112 = arith.constant dense<0.000000e+00> : vector<16x8xf32>
    %236 = tpu.matmul %235, %233, %cst_112 {dimension_numbers = #tpu.dot_dimension_numbers<[1], [0], [0], [1], [0, 0, 1, 1], [], []>} : vector<16x8xf32>, vector<8x8xf32>, vector<16x8xf32> -> vector<16x8xf32>
    %237 = arith.addf %232, %236 : vector<16x8xf32>
    %cst_113 = arith.constant dense<0.000000e+00> : vector<8x8xf32>
    %238 = tpu.matmul %225, %111, %cst_113 {dimension_numbers = #tpu.dot_dimension_numbers<[1], [0], [0], [1], [0, 0, 1, 1], [], []>} : vector<8x6xf32>, vector<6x8xf32>, vector<8x8xf32> -> vector<8x8xf32>
    %c2_114 = arith.constant 2 : index
    %c0_115 = arith.constant 0 : index
    %c0_116 = arith.constant 0 : index
    %239 = vector.load %arg6[%c2_114, %c0_115, %c0_116] : memref<3x16x8xf32, #tpu.memory_space<vmem>>, vector<1x16x8xf32>
    %240 = vector.shape_cast %239 : vector<1x16x8xf32> to vector<16x8xf32>
    %cst_117 = arith.constant dense<0.000000e+00> : vector<16x8xf32>
    %241 = tpu.matmul %240, %238, %cst_117 {dimension_numbers = #tpu.dot_dimension_numbers<[1], [0], [0], [1], [0, 0, 1, 1], [], []>} : vector<16x8xf32>, vector<8x8xf32>, vector<16x8xf32> -> vector<16x8xf32>
    %242 = arith.addf %237, %241 : vector<16x8xf32>
    %cst_118 = arith.constant 0.000000e+00 : f32
    %243 = vector.broadcast %cst_118 : f32 to vector<16x8xf32>
    %244 = arith.maximumf %242, %243 : vector<16x8xf32>
    %cst_119 = arith.constant dense<0.000000e+00> : vector<16x16xf32>
    %245 = tpu.matmul %244, %125, %cst_119 {dimension_numbers = #tpu.dot_dimension_numbers<[1], [0], [0], [1], [0, 0, 1, 1], [], []>} : vector<16x8xf32>, vector<8x16xf32>, vector<16x16xf32> -> vector<16x16xf32>
    %cst_120 = arith.constant dense<0.000000e+00> : vector<16x32xf32>
    %246 = tpu.matmul %245, %143, %cst_120 {dimension_numbers = #tpu.dot_dimension_numbers<[1], [0], [0], [1], [0, 0, 1, 1], [], []>} : vector<16x16xf32>, vector<16x32xf32>, vector<16x32xf32> -> vector<16x32xf32>
    %c0_121 = arith.constant 0 : index
    %c0_122 = arith.constant 0 : index
    %c0_123 = arith.constant 0 : index
    %247 = vector.load %arg8[%c0_121, %c0_122, %c0_123] : memref<3x4x16xf32, #tpu.memory_space<vmem>>, vector<1x4x16xf32>
    %248 = vector.shape_cast %247 : vector<1x4x16xf32> to vector<4x16xf32>
    %cst_124 = arith.constant dense<0.000000e+00> : vector<4x32xf32>
    %249 = tpu.matmul %248, %246, %cst_124 {dimension_numbers = #tpu.dot_dimension_numbers<[1], [0], [0], [1], [0, 0, 1, 1], [], []>} : vector<4x16xf32>, vector<16x32xf32>, vector<4x32xf32> -> vector<4x32xf32>
    %c0_125 = arith.constant 0 : index
    %c0_126 = arith.constant 0 : index
    %250 = vector.load %arg9[%c0_125, %c0_126] : memref<4x1xf32, #tpu.memory_space<vmem>>, vector<4x1xf32>
    %251 = vector.broadcast %250 : vector<4x1xf32> to vector<4x32xf32>
    %252 = arith.addf %249, %251 : vector<4x32xf32>
    %cst_127 = arith.constant dense<0.000000e+00> : vector<16x32xf32>
    %253 = tpu.matmul %245, %161, %cst_127 {dimension_numbers = #tpu.dot_dimension_numbers<[1], [0], [0], [1], [0, 0, 1, 1], [], []>} : vector<16x16xf32>, vector<16x32xf32>, vector<16x32xf32> -> vector<16x32xf32>
    %c1_128 = arith.constant 1 : index
    %c0_129 = arith.constant 0 : index
    %c0_130 = arith.constant 0 : index
    %254 = vector.load %arg8[%c1_128, %c0_129, %c0_130] : memref<3x4x16xf32, #tpu.memory_space<vmem>>, vector<1x4x16xf32>
    %255 = vector.shape_cast %254 : vector<1x4x16xf32> to vector<4x16xf32>
    %cst_131 = arith.constant dense<0.000000e+00> : vector<4x32xf32>
    %256 = tpu.matmul %255, %253, %cst_131 {dimension_numbers = #tpu.dot_dimension_numbers<[1], [0], [0], [1], [0, 0, 1, 1], [], []>} : vector<4x16xf32>, vector<16x32xf32>, vector<4x32xf32> -> vector<4x32xf32>
    %257 = arith.addf %252, %256 : vector<4x32xf32>
    %cst_132 = arith.constant dense<0.000000e+00> : vector<16x32xf32>
    %258 = tpu.matmul %245, %179, %cst_132 {dimension_numbers = #tpu.dot_dimension_numbers<[1], [0], [0], [1], [0, 0, 1, 1], [], []>} : vector<16x16xf32>, vector<16x32xf32>, vector<16x32xf32> -> vector<16x32xf32>
    %c2_133 = arith.constant 2 : index
    %c0_134 = arith.constant 0 : index
    %c0_135 = arith.constant 0 : index
    %259 = vector.load %arg8[%c2_133, %c0_134, %c0_135] : memref<3x4x16xf32, #tpu.memory_space<vmem>>, vector<1x4x16xf32>
    %260 = vector.shape_cast %259 : vector<1x4x16xf32> to vector<4x16xf32>
    %cst_136 = arith.constant dense<0.000000e+00> : vector<4x32xf32>
    %261 = tpu.matmul %260, %258, %cst_136 {dimension_numbers = #tpu.dot_dimension_numbers<[1], [0], [0], [1], [0, 0, 1, 1], [], []>} : vector<4x16xf32>, vector<16x32xf32>, vector<4x32xf32> -> vector<4x32xf32>
    %262 = arith.addf %257, %261 : vector<4x32xf32>
    %c0_137 = arith.constant 0 : index
    %c0_138 = arith.constant 0 : index
    %c0_139 = arith.constant 0 : index
    %263 = vector.load %arg10[%c0_137, %c0_138, %c0_139] : memref<4x4x32xf32, #tpu.memory_space<vmem>>, vector<1x4x32xf32>
    %264 = vector.shape_cast %263 : vector<1x4x32xf32> to vector<4x32xf32>
    %265 = vector.shape_cast %262 : vector<4x32xf32> to vector<1x4x32xf32>
    tpu.vector_store %arg10[%c0_137, %c0_138, %c0_139], %265 {strides = array<i32>} : memref<4x4x32xf32, #tpu.memory_space<vmem>>, vector<1x4x32xf32>,
    %c1_140 = arith.constant 1 : index
    %c0_141 = arith.constant 0 : index
    %c0_142 = arith.constant 0 : index
    %266 = vector.load %arg1[%c1_140, %c0_141, %c0_142] : memref<4x4x32xf32, #tpu.memory_space<vmem>>, vector<1x4x32xf32>
    %267 = vector.shape_cast %266 : vector<1x4x32xf32> to vector<4x32xf32>
    %cst_143 = arith.constant dense<0.000000e+00> : vector<4x30xf32>
    %268 = tpu.matmul %267, %7, %cst_143 {dimension_numbers = #tpu.dot_dimension_numbers<[1], [0], [0], [1], [0, 0, 1, 1], [], []>} : vector<4x32xf32>, vector<32x30xf32>, vector<4x30xf32> -> vector<4x30xf32>
    %c0_144 = arith.constant 0 : index
    %c0_145 = arith.constant 0 : index
    %c0_146 = arith.constant 0 : index
    %269 = vector.load %arg2[%c0_144, %c0_145, %c0_146] : memref<3x16x4xf32, #tpu.memory_space<vmem>>, vector<1x16x4xf32>
    %270 = vector.shape_cast %269 : vector<1x16x4xf32> to vector<16x4xf32>
    %cst_147 = arith.constant dense<0.000000e+00> : vector<16x30xf32>
    %271 = tpu.matmul %270, %268, %cst_147 {dimension_numbers = #tpu.dot_dimension_numbers<[1], [0], [0], [1], [0, 0, 1, 1], [], []>} : vector<16x4xf32>, vector<4x30xf32>, vector<16x30xf32> -> vector<16x30xf32>
    %c0_148 = arith.constant 0 : index
    %c0_149 = arith.constant 0 : index
    %272 = vector.load %arg3[%c0_148, %c0_149] : memref<16x1xf32, #tpu.memory_space<vmem>>, vector<16x1xf32>
    %273 = vector.broadcast %272 : vector<16x1xf32> to vector<16x30xf32>
    %274 = arith.addf %271, %273 : vector<16x30xf32>
    %cst_150 = arith.constant dense<0.000000e+00> : vector<4x30xf32>
    %275 = tpu.matmul %267, %15, %cst_150 {dimension_numbers = #tpu.dot_dimension_numbers<[1], [0], [0], [1], [0, 0, 1, 1], [], []>} : vector<4x32xf32>, vector<32x30xf32>, vector<4x30xf32> -> vector<4x30xf32>
    %c1_151 = arith.constant 1 : index
    %c0_152 = arith.constant 0 : index
    %c0_153 = arith.constant 0 : index
    %276 = vector.load %arg2[%c1_151, %c0_152, %c0_153] : memref<3x16x4xf32, #tpu.memory_space<vmem>>, vector<1x16x4xf32>
    %277 = vector.shape_cast %276 : vector<1x16x4xf32> to vector<16x4xf32>
    %cst_154 = arith.constant dense<0.000000e+00> : vector<16x30xf32>
    %278 = tpu.matmul %277, %275, %cst_154 {dimension_numbers = #tpu.dot_dimension_numbers<[1], [0], [0], [1], [0, 0, 1, 1], [], []>} : vector<16x4xf32>, vector<4x30xf32>, vector<16x30xf32> -> vector<16x30xf32>
    %279 = arith.addf %274, %278 : vector<16x30xf32>
    %cst_155 = arith.constant dense<0.000000e+00> : vector<4x30xf32>
    %280 = tpu.matmul %267, %23, %cst_155 {dimension_numbers = #tpu.dot_dimension_numbers<[1], [0], [0], [1], [0, 0, 1, 1], [], []>} : vector<4x32xf32>, vector<32x30xf32>, vector<4x30xf32> -> vector<4x30xf32>
    %c2_156 = arith.constant 2 : index
    %c0_157 = arith.constant 0 : index
    %c0_158 = arith.constant 0 : index
    %281 = vector.load %arg2[%c2_156, %c0_157, %c0_158] : memref<3x16x4xf32, #tpu.memory_space<vmem>>, vector<1x16x4xf32>
    %282 = vector.shape_cast %281 : vector<1x16x4xf32> to vector<16x4xf32>
    %cst_159 = arith.constant dense<0.000000e+00> : vector<16x30xf32>
    %283 = tpu.matmul %282, %280, %cst_159 {dimension_numbers = #tpu.dot_dimension_numbers<[1], [0], [0], [1], [0, 0, 1, 1], [], []>} : vector<16x4xf32>, vector<4x30xf32>, vector<16x30xf32> -> vector<16x30xf32>
    %284 = arith.addf %279, %283 : vector<16x30xf32>
    %cst_160 = arith.constant 0.000000e+00 : f32
    %285 = vector.broadcast %cst_160 : f32 to vector<16x30xf32>
    %286 = arith.maximumf %284, %285 : vector<16x30xf32>
    %cst_161 = arith.constant dense<0.000000e+00> : vector<16x15xf32>
    %287 = tpu.matmul %286, %33, %cst_161 {dimension_numbers = #tpu.dot_dimension_numbers<[1], [0], [0], [1], [0, 0, 1, 1], [], []>} : vector<16x30xf32>, vector<30x15xf32>, vector<16x15xf32> -> vector<16x15xf32>
    %cst_162 = arith.constant dense<0.000000e+00> : vector<16x15xf32>
    %288 = tpu.matmul %286, %43, %cst_162 {dimension_numbers = #tpu.dot_dimension_numbers<[1], [0], [0], [1], [0, 0, 1, 1], [], []>} : vector<16x30xf32>, vector<30x15xf32>, vector<16x15xf32> -> vector<16x15xf32>
    %289 = arith.maximumf %287, %288 : vector<16x15xf32>
    %cst_163 = arith.constant dense<0.000000e+00> : vector<16x13xf32>
    %290 = tpu.matmul %289, %51, %cst_163 {dimension_numbers = #tpu.dot_dimension_numbers<[1], [0], [0], [1], [0, 0, 1, 1], [], []>} : vector<16x15xf32>, vector<15x13xf32>, vector<16x13xf32> -> vector<16x13xf32>
    %c0_164 = arith.constant 0 : index
    %c0_165 = arith.constant 0 : index
    %c0_166 = arith.constant 0 : index
    %291 = vector.load %arg4[%c0_164, %c0_165, %c0_166] : memref<3x8x16xf32, #tpu.memory_space<vmem>>, vector<1x8x16xf32>
    %292 = vector.shape_cast %291 : vector<1x8x16xf32> to vector<8x16xf32>
    %cst_167 = arith.constant dense<0.000000e+00> : vector<8x13xf32>
    %293 = tpu.matmul %292, %290, %cst_167 {dimension_numbers = #tpu.dot_dimension_numbers<[1], [0], [0], [1], [0, 0, 1, 1], [], []>} : vector<8x16xf32>, vector<16x13xf32>, vector<8x13xf32> -> vector<8x13xf32>
    %c0_168 = arith.constant 0 : index
    %c0_169 = arith.constant 0 : index
    %294 = vector.load %arg5[%c0_168, %c0_169] : memref<8x1xf32, #tpu.memory_space<vmem>>, vector<8x1xf32>
    %295 = vector.broadcast %294 : vector<8x1xf32> to vector<8x13xf32>
    %296 = arith.addf %293, %295 : vector<8x13xf32>
    %cst_170 = arith.constant dense<0.000000e+00> : vector<16x13xf32>
    %297 = tpu.matmul %289, %59, %cst_170 {dimension_numbers = #tpu.dot_dimension_numbers<[1], [0], [0], [1], [0, 0, 1, 1], [], []>} : vector<16x15xf32>, vector<15x13xf32>, vector<16x13xf32> -> vector<16x13xf32>
    %c1_171 = arith.constant 1 : index
    %c0_172 = arith.constant 0 : index
    %c0_173 = arith.constant 0 : index
    %298 = vector.load %arg4[%c1_171, %c0_172, %c0_173] : memref<3x8x16xf32, #tpu.memory_space<vmem>>, vector<1x8x16xf32>
    %299 = vector.shape_cast %298 : vector<1x8x16xf32> to vector<8x16xf32>
    %cst_174 = arith.constant dense<0.000000e+00> : vector<8x13xf32>
    %300 = tpu.matmul %299, %297, %cst_174 {dimension_numbers = #tpu.dot_dimension_numbers<[1], [0], [0], [1], [0, 0, 1, 1], [], []>} : vector<8x16xf32>, vector<16x13xf32>, vector<8x13xf32> -> vector<8x13xf32>
    %301 = arith.addf %296, %300 : vector<8x13xf32>
    %cst_175 = arith.constant dense<0.000000e+00> : vector<16x13xf32>
    %302 = tpu.matmul %289, %67, %cst_175 {dimension_numbers = #tpu.dot_dimension_numbers<[1], [0], [0], [1], [0, 0, 1, 1], [], []>} : vector<16x15xf32>, vector<15x13xf32>, vector<16x13xf32> -> vector<16x13xf32>
    %c2_176 = arith.constant 2 : index
    %c0_177 = arith.constant 0 : index
    %c0_178 = arith.constant 0 : index
    %303 = vector.load %arg4[%c2_176, %c0_177, %c0_178] : memref<3x8x16xf32, #tpu.memory_space<vmem>>, vector<1x8x16xf32>
    %304 = vector.shape_cast %303 : vector<1x8x16xf32> to vector<8x16xf32>
    %cst_179 = arith.constant dense<0.000000e+00> : vector<8x13xf32>
    %305 = tpu.matmul %304, %302, %cst_179 {dimension_numbers = #tpu.dot_dimension_numbers<[1], [0], [0], [1], [0, 0, 1, 1], [], []>} : vector<8x16xf32>, vector<16x13xf32>, vector<8x13xf32> -> vector<8x13xf32>
    %306 = arith.addf %301, %305 : vector<8x13xf32>
    %cst_180 = arith.constant 0.000000e+00 : f32
    %307 = vector.broadcast %cst_180 : f32 to vector<8x13xf32>
    %308 = arith.maximumf %306, %307 : vector<8x13xf32>
    %cst_181 = arith.constant dense<0.000000e+00> : vector<8x6xf32>
    %309 = tpu.matmul %308, %77, %cst_181 {dimension_numbers = #tpu.dot_dimension_numbers<[1], [0], [0], [1], [0, 0, 1, 1], [], []>} : vector<8x13xf32>, vector<13x6xf32>, vector<8x6xf32> -> vector<8x6xf32>
    %cst_182 = arith.constant dense<0.000000e+00> : vector<8x6xf32>
    %310 = tpu.matmul %308, %87, %cst_182 {dimension_numbers = #tpu.dot_dimension_numbers<[1], [0], [0], [1], [0, 0, 1, 1], [], []>} : vector<8x13xf32>, vector<13x6xf32>, vector<8x6xf32> -> vector<8x6xf32>
    %311 = arith.maximumf %309, %310 : vector<8x6xf32>
    %cst_183 = arith.constant dense<0.000000e+00> : vector<8x8xf32>
    %312 = tpu.matmul %311, %95, %cst_183 {dimension_numbers = #tpu.dot_dimension_numbers<[1], [0], [0], [1], [0, 0, 1, 1], [], []>} : vector<8x6xf32>, vector<6x8xf32>, vector<8x8xf32> -> vector<8x8xf32>
    %c0_184 = arith.constant 0 : index
    %c0_185 = arith.constant 0 : index
    %c0_186 = arith.constant 0 : index
    %313 = vector.load %arg6[%c0_184, %c0_185, %c0_186] : memref<3x16x8xf32, #tpu.memory_space<vmem>>, vector<1x16x8xf32>
    %314 = vector.shape_cast %313 : vector<1x16x8xf32> to vector<16x8xf32>
    %cst_187 = arith.constant dense<0.000000e+00> : vector<16x8xf32>
    %315 = tpu.matmul %314, %312, %cst_187 {dimension_numbers = #tpu.dot_dimension_numbers<[1], [0], [0], [1], [0, 0, 1, 1], [], []>} : vector<16x8xf32>, vector<8x8xf32>, vector<16x8xf32> -> vector<16x8xf32>
    %c0_188 = arith.constant 0 : index
    %c0_189 = arith.constant 0 : index
    %316 = vector.load %arg7[%c0_188, %c0_189] : memref<16x1xf32, #tpu.memory_space<vmem>>, vector<16x1xf32>
    %317 = vector.broadcast %316 : vector<16x1xf32> to vector<16x8xf32>
    %318 = arith.addf %315, %317 : vector<16x8xf32>
    %cst_190 = arith.constant dense<0.000000e+00> : vector<8x8xf32>
    %319 = tpu.matmul %311, %103, %cst_190 {dimension_numbers = #tpu.dot_dimension_numbers<[1], [0], [0], [1], [0, 0, 1, 1], [], []>} : vector<8x6xf32>, vector<6x8xf32>, vector<8x8xf32> -> vector<8x8xf32>
    %c1_191 = arith.constant 1 : index
    %c0_192 = arith.constant 0 : index
    %c0_193 = arith.constant 0 : index
    %320 = vector.load %arg6[%c1_191, %c0_192, %c0_193] : memref<3x16x8xf32, #tpu.memory_space<vmem>>, vector<1x16x8xf32>
    %321 = vector.shape_cast %320 : vector<1x16x8xf32> to vector<16x8xf32>
    %cst_194 = arith.constant dense<0.000000e+00> : vector<16x8xf32>
    %322 = tpu.matmul %321, %319, %cst_194 {dimension_numbers = #tpu.dot_dimension_numbers<[1], [0], [0], [1], [0, 0, 1, 1], [], []>} : vector<16x8xf32>, vector<8x8xf32>, vector<16x8xf32> -> vector<16x8xf32>
    %323 = arith.addf %318, %322 : vector<16x8xf32>
    %cst_195 = arith.constant dense<0.000000e+00> : vector<8x8xf32>
    %324 = tpu.matmul %311, %111, %cst_195 {dimension_numbers = #tpu.dot_dimension_numbers<[1], [0], [0], [1], [0, 0, 1, 1], [], []>} : vector<8x6xf32>, vector<6x8xf32>, vector<8x8xf32> -> vector<8x8xf32>
    %c2_196 = arith.constant 2 : index
    %c0_197 = arith.constant 0 : index
    %c0_198 = arith.constant 0 : index
    %325 = vector.load %arg6[%c2_196, %c0_197, %c0_198] : memref<3x16x8xf32, #tpu.memory_space<vmem>>, vector<1x16x8xf32>
    %326 = vector.shape_cast %325 : vector<1x16x8xf32> to vector<16x8xf32>
    %cst_199 = arith.constant dense<0.000000e+00> : vector<16x8xf32>
    %327 = tpu.matmul %326, %324, %cst_199 {dimension_numbers = #tpu.dot_dimension_numbers<[1], [0], [0], [1], [0, 0, 1, 1], [], []>} : vector<16x8xf32>, vector<8x8xf32>, vector<16x8xf32> -> vector<16x8xf32>
    %328 = arith.addf %323, %327 : vector<16x8xf32>
    %cst_200 = arith.constant 0.000000e+00 : f32
    %329 = vector.broadcast %cst_200 : f32 to vector<16x8xf32>
    %330 = arith.maximumf %328, %329 : vector<16x8xf32>
    %cst_201 = arith.constant dense<0.000000e+00> : vector<16x16xf32>
    %331 = tpu.matmul %330, %125, %cst_201 {dimension_numbers = #tpu.dot_dimension_numbers<[1], [0], [0], [1], [0, 0, 1, 1], [], []>} : vector<16x8xf32>, vector<8x16xf32>, vector<16x16xf32> -> vector<16x16xf32>
    %cst_202 = arith.constant dense<0.000000e+00> : vector<16x32xf32>
    %332 = tpu.matmul %331, %143, %cst_202 {dimension_numbers = #tpu.dot_dimension_numbers<[1], [0], [0], [1], [0, 0, 1, 1], [], []>} : vector<16x16xf32>, vector<16x32xf32>, vector<16x32xf32> -> vector<16x32xf32>
    %c0_203 = arith.constant 0 : index
    %c0_204 = arith.constant 0 : index
    %c0_205 = arith.constant 0 : index
    %333 = vector.load %arg8[%c0_203, %c0_204, %c0_205] : memref<3x4x16xf32, #tpu.memory_space<vmem>>, vector<1x4x16xf32>
    %334 = vector.shape_cast %333 : vector<1x4x16xf32> to vector<4x16xf32>
    %cst_206 = arith.constant dense<0.000000e+00> : vector<4x32xf32>
    %335 = tpu.matmul %334, %332, %cst_206 {dimension_numbers = #tpu.dot_dimension_numbers<[1], [0], [0], [1], [0, 0, 1, 1], [], []>} : vector<4x16xf32>, vector<16x32xf32>, vector<4x32xf32> -> vector<4x32xf32>
    %c0_207 = arith.constant 0 : index
    %c0_208 = arith.constant 0 : index
    %336 = vector.load %arg9[%c0_207, %c0_208] : memref<4x1xf32, #tpu.memory_space<vmem>>, vector<4x1xf32>
    %337 = vector.broadcast %336 : vector<4x1xf32> to vector<4x32xf32>
    %338 = arith.addf %335, %337 : vector<4x32xf32>
    %cst_209 = arith.constant dense<0.000000e+00> : vector<16x32xf32>
    %339 = tpu.matmul %331, %161, %cst_209 {dimension_numbers = #tpu.dot_dimension_numbers<[1], [0], [0], [1], [0, 0, 1, 1], [], []>} : vector<16x16xf32>, vector<16x32xf32>, vector<16x32xf32> -> vector<16x32xf32>
    %c1_210 = arith.constant 1 : index
    %c0_211 = arith.constant 0 : index
    %c0_212 = arith.constant 0 : index
    %340 = vector.load %arg8[%c1_210, %c0_211, %c0_212] : memref<3x4x16xf32, #tpu.memory_space<vmem>>, vector<1x4x16xf32>
    %341 = vector.shape_cast %340 : vector<1x4x16xf32> to vector<4x16xf32>
    %cst_213 = arith.constant dense<0.000000e+00> : vector<4x32xf32>
    %342 = tpu.matmul %341, %339, %cst_213 {dimension_numbers = #tpu.dot_dimension_numbers<[1], [0], [0], [1], [0, 0, 1, 1], [], []>} : vector<4x16xf32>, vector<16x32xf32>, vector<4x32xf32> -> vector<4x32xf32>
    %343 = arith.addf %338, %342 : vector<4x32xf32>
    %cst_214 = arith.constant dense<0.000000e+00> : vector<16x32xf32>
    %344 = tpu.matmul %331, %179, %cst_214 {dimension_numbers = #tpu.dot_dimension_numbers<[1], [0], [0], [1], [0, 0, 1, 1], [], []>} : vector<16x16xf32>, vector<16x32xf32>, vector<16x32xf32> -> vector<16x32xf32>
    %c2_215 = arith.constant 2 : index
    %c0_216 = arith.constant 0 : index
    %c0_217 = arith.constant 0 : index
    %345 = vector.load %arg8[%c2_215, %c0_216, %c0_217] : memref<3x4x16xf32, #tpu.memory_space<vmem>>, vector<1x4x16xf32>
    %346 = vector.shape_cast %345 : vector<1x4x16xf32> to vector<4x16xf32>
    %cst_218 = arith.constant dense<0.000000e+00> : vector<4x32xf32>
    %347 = tpu.matmul %346, %344, %cst_218 {dimension_numbers = #tpu.dot_dimension_numbers<[1], [0], [0], [1], [0, 0, 1, 1], [], []>} : vector<4x16xf32>, vector<16x32xf32>, vector<4x32xf32> -> vector<4x32xf32>
    %348 = arith.addf %343, %347 : vector<4x32xf32>
    %c1_219 = arith.constant 1 : index
    %c0_220 = arith.constant 0 : index
    %c0_221 = arith.constant 0 : index
    %349 = vector.load %arg10[%c1_219, %c0_220, %c0_221] : memref<4x4x32xf32, #tpu.memory_space<vmem>>, vector<1x4x32xf32>
    %350 = vector.shape_cast %349 : vector<1x4x32xf32> to vector<4x32xf32>
    %351 = vector.shape_cast %348 : vector<4x32xf32> to vector<1x4x32xf32>
    tpu.vector_store %arg10[%c1_219, %c0_220, %c0_221], %351 {strides = array<i32>} : memref<4x4x32xf32, #tpu.memory_space<vmem>>, vector<1x4x32xf32>,
    %c2_222 = arith.constant 2 : index
    %c0_223 = arith.constant 0 : index
    %c0_224 = arith.constant 0 : index
    %352 = vector.load %arg1[%c2_222, %c0_223, %c0_224] : memref<4x4x32xf32, #tpu.memory_space<vmem>>, vector<1x4x32xf32>
    %353 = vector.shape_cast %352 : vector<1x4x32xf32> to vector<4x32xf32>
    %cst_225 = arith.constant dense<0.000000e+00> : vector<4x30xf32>
    %354 = tpu.matmul %353, %7, %cst_225 {dimension_numbers = #tpu.dot_dimension_numbers<[1], [0], [0], [1], [0, 0, 1, 1], [], []>} : vector<4x32xf32>, vector<32x30xf32>, vector<4x30xf32> -> vector<4x30xf32>
    %c0_226 = arith.constant 0 : index
    %c0_227 = arith.constant 0 : index
    %c0_228 = arith.constant 0 : index
    %355 = vector.load %arg2[%c0_226, %c0_227, %c0_228] : memref<3x16x4xf32, #tpu.memory_space<vmem>>, vector<1x16x4xf32>
    %356 = vector.shape_cast %355 : vector<1x16x4xf32> to vector<16x4xf32>
    %cst_229 = arith.constant dense<0.000000e+00> : vector<16x30xf32>
    %357 = tpu.matmul %356, %354, %cst_229 {dimension_numbers = #tpu.dot_dimension_numbers<[1], [0], [0], [1], [0, 0, 1, 1], [], []>} : vector<16x4xf32>, vector<4x30xf32>, vector<16x30xf32> -> vector<16x30xf32>
    %c0_230 = arith.constant 0 : index
    %c0_231 = arith.constant 0 : index
    %358 = vector.load %arg3[%c0_230, %c0_231] : memref<16x1xf32, #tpu.memory_space<vmem>>, vector<16x1xf32>
    %359 = vector.broadcast %358 : vector<16x1xf32> to vector<16x30xf32>
    %360 = arith.addf %357, %359 : vector<16x30xf32>
    %cst_232 = arith.constant dense<0.000000e+00> : vector<4x30xf32>
    %361 = tpu.matmul %353, %15, %cst_232 {dimension_numbers = #tpu.dot_dimension_numbers<[1], [0], [0], [1], [0, 0, 1, 1], [], []>} : vector<4x32xf32>, vector<32x30xf32>, vector<4x30xf32> -> vector<4x30xf32>
    %c1_233 = arith.constant 1 : index
    %c0_234 = arith.constant 0 : index
    %c0_235 = arith.constant 0 : index
    %362 = vector.load %arg2[%c1_233, %c0_234, %c0_235] : memref<3x16x4xf32, #tpu.memory_space<vmem>>, vector<1x16x4xf32>
    %363 = vector.shape_cast %362 : vector<1x16x4xf32> to vector<16x4xf32>
    %cst_236 = arith.constant dense<0.000000e+00> : vector<16x30xf32>
    %364 = tpu.matmul %363, %361, %cst_236 {dimension_numbers = #tpu.dot_dimension_numbers<[1], [0], [0], [1], [0, 0, 1, 1], [], []>} : vector<16x4xf32>, vector<4x30xf32>, vector<16x30xf32> -> vector<16x30xf32>
    %365 = arith.addf %360, %364 : vector<16x30xf32>
    %cst_237 = arith.constant dense<0.000000e+00> : vector<4x30xf32>
    %366 = tpu.matmul %353, %23, %cst_237 {dimension_numbers = #tpu.dot_dimension_numbers<[1], [0], [0], [1], [0, 0, 1, 1], [], []>} : vector<4x32xf32>, vector<32x30xf32>, vector<4x30xf32> -> vector<4x30xf32>
    %c2_238 = arith.constant 2 : index
    %c0_239 = arith.constant 0 : index
    %c0_240 = arith.constant 0 : index
    %367 = vector.load %arg2[%c2_238, %c0_239, %c0_240] : memref<3x16x4xf32, #tpu.memory_space<vmem>>, vector<1x16x4xf32>
    %368 = vector.shape_cast %367 : vector<1x16x4xf32> to vector<16x4xf32>
    %cst_241 = arith.constant dense<0.000000e+00> : vector<16x30xf32>
    %369 = tpu.matmul %368, %366, %cst_241 {dimension_numbers = #tpu.dot_dimension_numbers<[1], [0], [0], [1], [0, 0, 1, 1], [], []>} : vector<16x4xf32>, vector<4x30xf32>, vector<16x30xf32> -> vector<16x30xf32>
    %370 = arith.addf %365, %369 : vector<16x30xf32>
    %cst_242 = arith.constant 0.000000e+00 : f32
    %371 = vector.broadcast %cst_242 : f32 to vector<16x30xf32>
    %372 = arith.maximumf %370, %371 : vector<16x30xf32>
    %cst_243 = arith.constant dense<0.000000e+00> : vector<16x15xf32>
    %373 = tpu.matmul %372, %33, %cst_243 {dimension_numbers = #tpu.dot_dimension_numbers<[1], [0], [0], [1], [0, 0, 1, 1], [], []>} : vector<16x30xf32>, vector<30x15xf32>, vector<16x15xf32> -> vector<16x15xf32>
    %cst_244 = arith.constant dense<0.000000e+00> : vector<16x15xf32>
    %374 = tpu.matmul %372, %43, %cst_244 {dimension_numbers = #tpu.dot_dimension_numbers<[1], [0], [0], [1], [0, 0, 1, 1], [], []>} : vector<16x30xf32>, vector<30x15xf32>, vector<16x15xf32> -> vector<16x15xf32>
    %375 = arith.maximumf %373, %374 : vector<16x15xf32>
    %cst_245 = arith.constant dense<0.000000e+00> : vector<16x13xf32>
    %376 = tpu.matmul %375, %51, %cst_245 {dimension_numbers = #tpu.dot_dimension_numbers<[1], [0], [0], [1], [0, 0, 1, 1], [], []>} : vector<16x15xf32>, vector<15x13xf32>, vector<16x13xf32> -> vector<16x13xf32>
    %c0_246 = arith.constant 0 : index
    %c0_247 = arith.constant 0 : index
    %c0_248 = arith.constant 0 : index
    %377 = vector.load %arg4[%c0_246, %c0_247, %c0_248] : memref<3x8x16xf32, #tpu.memory_space<vmem>>, vector<1x8x16xf32>
    %378 = vector.shape_cast %377 : vector<1x8x16xf32> to vector<8x16xf32>
    %cst_249 = arith.constant dense<0.000000e+00> : vector<8x13xf32>
    %379 = tpu.matmul %378, %376, %cst_249 {dimension_numbers = #tpu.dot_dimension_numbers<[1], [0], [0], [1], [0, 0, 1, 1], [], []>} : vector<8x16xf32>, vector<16x13xf32>, vector<8x13xf32> -> vector<8x13xf32>
    %c0_250 = arith.constant 0 : index
    %c0_251 = arith.constant 0 : index
    %380 = vector.load %arg5[%c0_250, %c0_251] : memref<8x1xf32, #tpu.memory_space<vmem>>, vector<8x1xf32>
    %381 = vector.broadcast %380 : vector<8x1xf32> to vector<8x13xf32>
    %382 = arith.addf %379, %381 : vector<8x13xf32>
    %cst_252 = arith.constant dense<0.000000e+00> : vector<16x13xf32>
    %383 = tpu.matmul %375, %59, %cst_252 {dimension_numbers = #tpu.dot_dimension_numbers<[1], [0], [0], [1], [0, 0, 1, 1], [], []>} : vector<16x15xf32>, vector<15x13xf32>, vector<16x13xf32> -> vector<16x13xf32>
    %c1_253 = arith.constant 1 : index
    %c0_254 = arith.constant 0 : index
    %c0_255 = arith.constant 0 : index
    %384 = vector.load %arg4[%c1_253, %c0_254, %c0_255] : memref<3x8x16xf32, #tpu.memory_space<vmem>>, vector<1x8x16xf32>
    %385 = vector.shape_cast %384 : vector<1x8x16xf32> to vector<8x16xf32>
    %cst_256 = arith.constant dense<0.000000e+00> : vector<8x13xf32>
    %386 = tpu.matmul %385, %383, %cst_256 {dimension_numbers = #tpu.dot_dimension_numbers<[1], [0], [0], [1], [0, 0, 1, 1], [], []>} : vector<8x16xf32>, vector<16x13xf32>, vector<8x13xf32> -> vector<8x13xf32>
    %387 = arith.addf %382, %386 : vector<8x13xf32>
    %cst_257 = arith.constant dense<0.000000e+00> : vector<16x13xf32>
    %388 = tpu.matmul %375, %67, %cst_257 {dimension_numbers = #tpu.dot_dimension_numbers<[1], [0], [0], [1], [0, 0, 1, 1], [], []>} : vector<16x15xf32>, vector<15x13xf32>, vector<16x13xf32> -> vector<16x13xf32>
    %c2_258 = arith.constant 2 : index
    %c0_259 = arith.constant 0 : index
    %c0_260 = arith.constant 0 : index
    %389 = vector.load %arg4[%c2_258, %c0_259, %c0_260] : memref<3x8x16xf32, #tpu.memory_space<vmem>>, vector<1x8x16xf32>
    %390 = vector.shape_cast %389 : vector<1x8x16xf32> to vector<8x16xf32>
    %cst_261 = arith.constant dense<0.000000e+00> : vector<8x13xf32>
    %391 = tpu.matmul %390, %388, %cst_261 {dimension_numbers = #tpu.dot_dimension_numbers<[1], [0], [0], [1], [0, 0, 1, 1], [], []>} : vector<8x16xf32>, vector<16x13xf32>, vector<8x13xf32> -> vector<8x13xf32>
    %392 = arith.addf %387, %391 : vector<8x13xf32>
    %cst_262 = arith.constant 0.000000e+00 : f32
    %393 = vector.broadcast %cst_262 : f32 to vector<8x13xf32>
    %394 = arith.maximumf %392, %393 : vector<8x13xf32>
    %cst_263 = arith.constant dense<0.000000e+00> : vector<8x6xf32>
    %395 = tpu.matmul %394, %77, %cst_263 {dimension_numbers = #tpu.dot_dimension_numbers<[1], [0], [0], [1], [0, 0, 1, 1], [], []>} : vector<8x13xf32>, vector<13x6xf32>, vector<8x6xf32> -> vector<8x6xf32>
    %cst_264 = arith.constant dense<0.000000e+00> : vector<8x6xf32>
    %396 = tpu.matmul %394, %87, %cst_264 {dimension_numbers = #tpu.dot_dimension_numbers<[1], [0], [0], [1], [0, 0, 1, 1], [], []>} : vector<8x13xf32>, vector<13x6xf32>, vector<8x6xf32> -> vector<8x6xf32>
    %397 = arith.maximumf %395, %396 : vector<8x6xf32>
    %cst_265 = arith.constant dense<0.000000e+00> : vector<8x8xf32>
    %398 = tpu.matmul %397, %95, %cst_265 {dimension_numbers = #tpu.dot_dimension_numbers<[1], [0], [0], [1], [0, 0, 1, 1], [], []>} : vector<8x6xf32>, vector<6x8xf32>, vector<8x8xf32> -> vector<8x8xf32>
    %c0_266 = arith.constant 0 : index
    %c0_267 = arith.constant 0 : index
    %c0_268 = arith.constant 0 : index
    %399 = vector.load %arg6[%c0_266, %c0_267, %c0_268] : memref<3x16x8xf32, #tpu.memory_space<vmem>>, vector<1x16x8xf32>
    %400 = vector.shape_cast %399 : vector<1x16x8xf32> to vector<16x8xf32>
    %cst_269 = arith.constant dense<0.000000e+00> : vector<16x8xf32>
    %401 = tpu.matmul %400, %398, %cst_269 {dimension_numbers = #tpu.dot_dimension_numbers<[1], [0], [0], [1], [0, 0, 1, 1], [], []>} : vector<16x8xf32>, vector<8x8xf32>, vector<16x8xf32> -> vector<16x8xf32>
    %c0_270 = arith.constant 0 : index
    %c0_271 = arith.constant 0 : index
    %402 = vector.load %arg7[%c0_270, %c0_271] : memref<16x1xf32, #tpu.memory_space<vmem>>, vector<16x1xf32>
    %403 = vector.broadcast %402 : vector<16x1xf32> to vector<16x8xf32>
    %404 = arith.addf %401, %403 : vector<16x8xf32>
    %cst_272 = arith.constant dense<0.000000e+00> : vector<8x8xf32>
    %405 = tpu.matmul %397, %103, %cst_272 {dimension_numbers = #tpu.dot_dimension_numbers<[1], [0], [0], [1], [0, 0, 1, 1], [], []>} : vector<8x6xf32>, vector<6x8xf32>, vector<8x8xf32> -> vector<8x8xf32>
    %c1_273 = arith.constant 1 : index
    %c0_274 = arith.constant 0 : index
    %c0_275 = arith.constant 0 : index
    %406 = vector.load %arg6[%c1_273, %c0_274, %c0_275] : memref<3x16x8xf32, #tpu.memory_space<vmem>>, vector<1x16x8xf32>
    %407 = vector.shape_cast %406 : vector<1x16x8xf32> to vector<16x8xf32>
    %cst_276 = arith.constant dense<0.000000e+00> : vector<16x8xf32>
    %408 = tpu.matmul %407, %405, %cst_276 {dimension_numbers = #tpu.dot_dimension_numbers<[1], [0], [0], [1], [0, 0, 1, 1], [], []>} : vector<16x8xf32>, vector<8x8xf32>, vector<16x8xf32> -> vector<16x8xf32>
    %409 = arith.addf %404, %408 : vector<16x8xf32>
    %cst_277 = arith.constant dense<0.000000e+00> : vector<8x8xf32>
    %410 = tpu.matmul %397, %111, %cst_277 {dimension_numbers = #tpu.dot_dimension_numbers<[1], [0], [0], [1], [0, 0, 1, 1], [], []>} : vector<8x6xf32>, vector<6x8xf32>, vector<8x8xf32> -> vector<8x8xf32>
    %c2_278 = arith.constant 2 : index
    %c0_279 = arith.constant 0 : index
    %c0_280 = arith.constant 0 : index
    %411 = vector.load %arg6[%c2_278, %c0_279, %c0_280] : memref<3x16x8xf32, #tpu.memory_space<vmem>>, vector<1x16x8xf32>
    %412 = vector.shape_cast %411 : vector<1x16x8xf32> to vector<16x8xf32>
    %cst_281 = arith.constant dense<0.000000e+00> : vector<16x8xf32>
    %413 = tpu.matmul %412, %410, %cst_281 {dimension_numbers = #tpu.dot_dimension_numbers<[1], [0], [0], [1], [0, 0, 1, 1], [], []>} : vector<16x8xf32>, vector<8x8xf32>, vector<16x8xf32> -> vector<16x8xf32>
    %414 = arith.addf %409, %413 : vector<16x8xf32>
    %cst_282 = arith.constant 0.000000e+00 : f32
    %415 = vector.broadcast %cst_282 : f32 to vector<16x8xf32>
    %416 = arith.maximumf %414, %415 : vector<16x8xf32>
    %cst_283 = arith.constant dense<0.000000e+00> : vector<16x16xf32>
    %417 = tpu.matmul %416, %125, %cst_283 {dimension_numbers = #tpu.dot_dimension_numbers<[1], [0], [0], [1], [0, 0, 1, 1], [], []>} : vector<16x8xf32>, vector<8x16xf32>, vector<16x16xf32> -> vector<16x16xf32>
    %cst_284 = arith.constant dense<0.000000e+00> : vector<16x32xf32>
    %418 = tpu.matmul %417, %143, %cst_284 {dimension_numbers = #tpu.dot_dimension_numbers<[1], [0], [0], [1], [0, 0, 1, 1], [], []>} : vector<16x16xf32>, vector<16x32xf32>, vector<16x32xf32> -> vector<16x32xf32>
    %c0_285 = arith.constant 0 : index
    %c0_286 = arith.constant 0 : index
    %c0_287 = arith.constant 0 : index
    %419 = vector.load %arg8[%c0_285, %c0_286, %c0_287] : memref<3x4x16xf32, #tpu.memory_space<vmem>>, vector<1x4x16xf32>
    %420 = vector.shape_cast %419 : vector<1x4x16xf32> to vector<4x16xf32>
    %cst_288 = arith.constant dense<0.000000e+00> : vector<4x32xf32>
    %421 = tpu.matmul %420, %418, %cst_288 {dimension_numbers = #tpu.dot_dimension_numbers<[1], [0], [0], [1], [0, 0, 1, 1], [], []>} : vector<4x16xf32>, vector<16x32xf32>, vector<4x32xf32> -> vector<4x32xf32>
    %c0_289 = arith.constant 0 : index
    %c0_290 = arith.constant 0 : index
    %422 = vector.load %arg9[%c0_289, %c0_290] : memref<4x1xf32, #tpu.memory_space<vmem>>, vector<4x1xf32>
    %423 = vector.broadcast %422 : vector<4x1xf32> to vector<4x32xf32>
    %424 = arith.addf %421, %423 : vector<4x32xf32>
    %cst_291 = arith.constant dense<0.000000e+00> : vector<16x32xf32>
    %425 = tpu.matmul %417, %161, %cst_291 {dimension_numbers = #tpu.dot_dimension_numbers<[1], [0], [0], [1], [0, 0, 1, 1], [], []>} : vector<16x16xf32>, vector<16x32xf32>, vector<16x32xf32> -> vector<16x32xf32>
    %c1_292 = arith.constant 1 : index
    %c0_293 = arith.constant 0 : index
    %c0_294 = arith.constant 0 : index
    %426 = vector.load %arg8[%c1_292, %c0_293, %c0_294] : memref<3x4x16xf32, #tpu.memory_space<vmem>>, vector<1x4x16xf32>
    %427 = vector.shape_cast %426 : vector<1x4x16xf32> to vector<4x16xf32>
    %cst_295 = arith.constant dense<0.000000e+00> : vector<4x32xf32>
    %428 = tpu.matmul %427, %425, %cst_295 {dimension_numbers = #tpu.dot_dimension_numbers<[1], [0], [0], [1], [0, 0, 1, 1], [], []>} : vector<4x16xf32>, vector<16x32xf32>, vector<4x32xf32> -> vector<4x32xf32>
    %429 = arith.addf %424, %428 : vector<4x32xf32>
    %cst_296 = arith.constant dense<0.000000e+00> : vector<16x32xf32>
    %430 = tpu.matmul %417, %179, %cst_296 {dimension_numbers = #tpu.dot_dimension_numbers<[1], [0], [0], [1], [0, 0, 1, 1], [], []>} : vector<16x16xf32>, vector<16x32xf32>, vector<16x32xf32> -> vector<16x32xf32>
    %c2_297 = arith.constant 2 : index
    %c0_298 = arith.constant 0 : index
    %c0_299 = arith.constant 0 : index
    %431 = vector.load %arg8[%c2_297, %c0_298, %c0_299] : memref<3x4x16xf32, #tpu.memory_space<vmem>>, vector<1x4x16xf32>
    %432 = vector.shape_cast %431 : vector<1x4x16xf32> to vector<4x16xf32>
    %cst_300 = arith.constant dense<0.000000e+00> : vector<4x32xf32>
    %433 = tpu.matmul %432, %430, %cst_300 {dimension_numbers = #tpu.dot_dimension_numbers<[1], [0], [0], [1], [0, 0, 1, 1], [], []>} : vector<4x16xf32>, vector<16x32xf32>, vector<4x32xf32> -> vector<4x32xf32>
    %434 = arith.addf %429, %433 : vector<4x32xf32>
    %c2_301 = arith.constant 2 : index
    %c0_302 = arith.constant 0 : index
    %c0_303 = arith.constant 0 : index
    %435 = vector.load %arg10[%c2_301, %c0_302, %c0_303] : memref<4x4x32xf32, #tpu.memory_space<vmem>>, vector<1x4x32xf32>
    %436 = vector.shape_cast %435 : vector<1x4x32xf32> to vector<4x32xf32>
    %437 = vector.shape_cast %434 : vector<4x32xf32> to vector<1x4x32xf32>
    tpu.vector_store %arg10[%c2_301, %c0_302, %c0_303], %437 {strides = array<i32>} : memref<4x4x32xf32, #tpu.memory_space<vmem>>, vector<1x4x32xf32>,
    %c3 = arith.constant 3 : index
    %c0_304 = arith.constant 0 : index
    %c0_305 = arith.constant 0 : index
    %438 = vector.load %arg1[%c3, %c0_304, %c0_305] : memref<4x4x32xf32, #tpu.memory_space<vmem>>, vector<1x4x32xf32>
    %439 = vector.shape_cast %438 : vector<1x4x32xf32> to vector<4x32xf32>
    %cst_306 = arith.constant dense<0.000000e+00> : vector<4x30xf32>
    %440 = tpu.matmul %439, %7, %cst_306 {dimension_numbers = #tpu.dot_dimension_numbers<[1], [0], [0], [1], [0, 0, 1, 1], [], []>} : vector<4x32xf32>, vector<32x30xf32>, vector<4x30xf32> -> vector<4x30xf32>
    %c0_307 = arith.constant 0 : index
    %c0_308 = arith.constant 0 : index
    %c0_309 = arith.constant 0 : index
    %441 = vector.load %arg2[%c0_307, %c0_308, %c0_309] : memref<3x16x4xf32, #tpu.memory_space<vmem>>, vector<1x16x4xf32>
    %442 = vector.shape_cast %441 : vector<1x16x4xf32> to vector<16x4xf32>
    %cst_310 = arith.constant dense<0.000000e+00> : vector<16x30xf32>
    %443 = tpu.matmul %442, %440, %cst_310 {dimension_numbers = #tpu.dot_dimension_numbers<[1], [0], [0], [1], [0, 0, 1, 1], [], []>} : vector<16x4xf32>, vector<4x30xf32>, vector<16x30xf32> -> vector<16x30xf32>
    %c0_311 = arith.constant 0 : index
    %c0_312 = arith.constant 0 : index
    %444 = vector.load %arg3[%c0_311, %c0_312] : memref<16x1xf32, #tpu.memory_space<vmem>>, vector<16x1xf32>
    %445 = vector.broadcast %444 : vector<16x1xf32> to vector<16x30xf32>
    %446 = arith.addf %443, %445 : vector<16x30xf32>
    %cst_313 = arith.constant dense<0.000000e+00> : vector<4x30xf32>
    %447 = tpu.matmul %439, %15, %cst_313 {dimension_numbers = #tpu.dot_dimension_numbers<[1], [0], [0], [1], [0, 0, 1, 1], [], []>} : vector<4x32xf32>, vector<32x30xf32>, vector<4x30xf32> -> vector<4x30xf32>
    %c1_314 = arith.constant 1 : index
    %c0_315 = arith.constant 0 : index
    %c0_316 = arith.constant 0 : index
    %448 = vector.load %arg2[%c1_314, %c0_315, %c0_316] : memref<3x16x4xf32, #tpu.memory_space<vmem>>, vector<1x16x4xf32>
    %449 = vector.shape_cast %448 : vector<1x16x4xf32> to vector<16x4xf32>
    %cst_317 = arith.constant dense<0.000000e+00> : vector<16x30xf32>
    %450 = tpu.matmul %449, %447, %cst_317 {dimension_numbers = #tpu.dot_dimension_numbers<[1], [0], [0], [1], [0, 0, 1, 1], [], []>} : vector<16x4xf32>, vector<4x30xf32>, vector<16x30xf32> -> vector<16x30xf32>
    %451 = arith.addf %446, %450 : vector<16x30xf32>
    %cst_318 = arith.constant dense<0.000000e+00> : vector<4x30xf32>
    %452 = tpu.matmul %439, %23, %cst_318 {dimension_numbers = #tpu.dot_dimension_numbers<[1], [0], [0], [1], [0, 0, 1, 1], [], []>} : vector<4x32xf32>, vector<32x30xf32>, vector<4x30xf32> -> vector<4x30xf32>
    %c2_319 = arith.constant 2 : index
    %c0_320 = arith.constant 0 : index
    %c0_321 = arith.constant 0 : index
    %453 = vector.load %arg2[%c2_319, %c0_320, %c0_321] : memref<3x16x4xf32, #tpu.memory_space<vmem>>, vector<1x16x4xf32>
    %454 = vector.shape_cast %453 : vector<1x16x4xf32> to vector<16x4xf32>
    %cst_322 = arith.constant dense<0.000000e+00> : vector<16x30xf32>
    %455 = tpu.matmul %454, %452, %cst_322 {dimension_numbers = #tpu.dot_dimension_numbers<[1], [0], [0], [1], [0, 0, 1, 1], [], []>} : vector<16x4xf32>, vector<4x30xf32>, vector<16x30xf32> -> vector<16x30xf32>
    %456 = arith.addf %451, %455 : vector<16x30xf32>
    %cst_323 = arith.constant 0.000000e+00 : f32
    %457 = vector.broadcast %cst_323 : f32 to vector<16x30xf32>
    %458 = arith.maximumf %456, %457 : vector<16x30xf32>
    %cst_324 = arith.constant dense<0.000000e+00> : vector<16x15xf32>
    %459 = tpu.matmul %458, %33, %cst_324 {dimension_numbers = #tpu.dot_dimension_numbers<[1], [0], [0], [1], [0, 0, 1, 1], [], []>} : vector<16x30xf32>, vector<30x15xf32>, vector<16x15xf32> -> vector<16x15xf32>
    %cst_325 = arith.constant dense<0.000000e+00> : vector<16x15xf32>
    %460 = tpu.matmul %458, %43, %cst_325 {dimension_numbers = #tpu.dot_dimension_numbers<[1], [0], [0], [1], [0, 0, 1, 1], [], []>} : vector<16x30xf32>, vector<30x15xf32>, vector<16x15xf32> -> vector<16x15xf32>
    %461 = arith.maximumf %459, %460 : vector<16x15xf32>
    %cst_326 = arith.constant dense<0.000000e+00> : vector<16x13xf32>
    %462 = tpu.matmul %461, %51, %cst_326 {dimension_numbers = #tpu.dot_dimension_numbers<[1], [0], [0], [1], [0, 0, 1, 1], [], []>} : vector<16x15xf32>, vector<15x13xf32>, vector<16x13xf32> -> vector<16x13xf32>
    %c0_327 = arith.constant 0 : index
    %c0_328 = arith.constant 0 : index
    %c0_329 = arith.constant 0 : index
    %463 = vector.load %arg4[%c0_327, %c0_328, %c0_329] : memref<3x8x16xf32, #tpu.memory_space<vmem>>, vector<1x8x16xf32>
    %464 = vector.shape_cast %463 : vector<1x8x16xf32> to vector<8x16xf32>
    %cst_330 = arith.constant dense<0.000000e+00> : vector<8x13xf32>
    %465 = tpu.matmul %464, %462, %cst_330 {dimension_numbers = #tpu.dot_dimension_numbers<[1], [0], [0], [1], [0, 0, 1, 1], [], []>} : vector<8x16xf32>, vector<16x13xf32>, vector<8x13xf32> -> vector<8x13xf32>
    %c0_331 = arith.constant 0 : index
    %c0_332 = arith.constant 0 : index
    %466 = vector.load %arg5[%c0_331, %c0_332] : memref<8x1xf32, #tpu.memory_space<vmem>>, vector<8x1xf32>
    %467 = vector.broadcast %466 : vector<8x1xf32> to vector<8x13xf32>
    %468 = arith.addf %465, %467 : vector<8x13xf32>
    %cst_333 = arith.constant dense<0.000000e+00> : vector<16x13xf32>
    %469 = tpu.matmul %461, %59, %cst_333 {dimension_numbers = #tpu.dot_dimension_numbers<[1], [0], [0], [1], [0, 0, 1, 1], [], []>} : vector<16x15xf32>, vector<15x13xf32>, vector<16x13xf32> -> vector<16x13xf32>
    %c1_334 = arith.constant 1 : index
    %c0_335 = arith.constant 0 : index
    %c0_336 = arith.constant 0 : index
    %470 = vector.load %arg4[%c1_334, %c0_335, %c0_336] : memref<3x8x16xf32, #tpu.memory_space<vmem>>, vector<1x8x16xf32>
    %471 = vector.shape_cast %470 : vector<1x8x16xf32> to vector<8x16xf32>
    %cst_337 = arith.constant dense<0.000000e+00> : vector<8x13xf32>
    %472 = tpu.matmul %471, %469, %cst_337 {dimension_numbers = #tpu.dot_dimension_numbers<[1], [0], [0], [1], [0, 0, 1, 1], [], []>} : vector<8x16xf32>, vector<16x13xf32>, vector<8x13xf32> -> vector<8x13xf32>
    %473 = arith.addf %468, %472 : vector<8x13xf32>
    %cst_338 = arith.constant dense<0.000000e+00> : vector<16x13xf32>
    %474 = tpu.matmul %461, %67, %cst_338 {dimension_numbers = #tpu.dot_dimension_numbers<[1], [0], [0], [1], [0, 0, 1, 1], [], []>} : vector<16x15xf32>, vector<15x13xf32>, vector<16x13xf32> -> vector<16x13xf32>
    %c2_339 = arith.constant 2 : index
    %c0_340 = arith.constant 0 : index
    %c0_341 = arith.constant 0 : index
    %475 = vector.load %arg4[%c2_339, %c0_340, %c0_341] : memref<3x8x16xf32, #tpu.memory_space<vmem>>, vector<1x8x16xf32>
    %476 = vector.shape_cast %475 : vector<1x8x16xf32> to vector<8x16xf32>
    %cst_342 = arith.constant dense<0.000000e+00> : vector<8x13xf32>
    %477 = tpu.matmul %476, %474, %cst_342 {dimension_numbers = #tpu.dot_dimension_numbers<[1], [0], [0], [1], [0, 0, 1, 1], [], []>} : vector<8x16xf32>, vector<16x13xf32>, vector<8x13xf32> -> vector<8x13xf32>
    %478 = arith.addf %473, %477 : vector<8x13xf32>
    %cst_343 = arith.constant 0.000000e+00 : f32
    %479 = vector.broadcast %cst_343 : f32 to vector<8x13xf32>
    %480 = arith.maximumf %478, %479 : vector<8x13xf32>
    %cst_344 = arith.constant dense<0.000000e+00> : vector<8x6xf32>
    %481 = tpu.matmul %480, %77, %cst_344 {dimension_numbers = #tpu.dot_dimension_numbers<[1], [0], [0], [1], [0, 0, 1, 1], [], []>} : vector<8x13xf32>, vector<13x6xf32>, vector<8x6xf32> -> vector<8x6xf32>
    %cst_345 = arith.constant dense<0.000000e+00> : vector<8x6xf32>
    %482 = tpu.matmul %480, %87, %cst_345 {dimension_numbers = #tpu.dot_dimension_numbers<[1], [0], [0], [1], [0, 0, 1, 1], [], []>} : vector<8x13xf32>, vector<13x6xf32>, vector<8x6xf32> -> vector<8x6xf32>
    %483 = arith.maximumf %481, %482 : vector<8x6xf32>
    %cst_346 = arith.constant dense<0.000000e+00> : vector<8x8xf32>
    %484 = tpu.matmul %483, %95, %cst_346 {dimension_numbers = #tpu.dot_dimension_numbers<[1], [0], [0], [1], [0, 0, 1, 1], [], []>} : vector<8x6xf32>, vector<6x8xf32>, vector<8x8xf32> -> vector<8x8xf32>
    %c0_347 = arith.constant 0 : index
    %c0_348 = arith.constant 0 : index
    %c0_349 = arith.constant 0 : index
    %485 = vector.load %arg6[%c0_347, %c0_348, %c0_349] : memref<3x16x8xf32, #tpu.memory_space<vmem>>, vector<1x16x8xf32>
    %486 = vector.shape_cast %485 : vector<1x16x8xf32> to vector<16x8xf32>
    %cst_350 = arith.constant dense<0.000000e+00> : vector<16x8xf32>
    %487 = tpu.matmul %486, %484, %cst_350 {dimension_numbers = #tpu.dot_dimension_numbers<[1], [0], [0], [1], [0, 0, 1, 1], [], []>} : vector<16x8xf32>, vector<8x8xf32>, vector<16x8xf32> -> vector<16x8xf32>
    %c0_351 = arith.constant 0 : index
    %c0_352 = arith.constant 0 : index
    %488 = vector.load %arg7[%c0_351, %c0_352] : memref<16x1xf32, #tpu.memory_space<vmem>>, vector<16x1xf32>
    %489 = vector.broadcast %488 : vector<16x1xf32> to vector<16x8xf32>
    %490 = arith.addf %487, %489 : vector<16x8xf32>
    %cst_353 = arith.constant dense<0.000000e+00> : vector<8x8xf32>
    %491 = tpu.matmul %483, %103, %cst_353 {dimension_numbers = #tpu.dot_dimension_numbers<[1], [0], [0], [1], [0, 0, 1, 1], [], []>} : vector<8x6xf32>, vector<6x8xf32>, vector<8x8xf32> -> vector<8x8xf32>
    %c1_354 = arith.constant 1 : index
    %c0_355 = arith.constant 0 : index
    %c0_356 = arith.constant 0 : index
    %492 = vector.load %arg6[%c1_354, %c0_355, %c0_356] : memref<3x16x8xf32, #tpu.memory_space<vmem>>, vector<1x16x8xf32>
    %493 = vector.shape_cast %492 : vector<1x16x8xf32> to vector<16x8xf32>
    %cst_357 = arith.constant dense<0.000000e+00> : vector<16x8xf32>
    %494 = tpu.matmul %493, %491, %cst_357 {dimension_numbers = #tpu.dot_dimension_numbers<[1], [0], [0], [1], [0, 0, 1, 1], [], []>} : vector<16x8xf32>, vector<8x8xf32>, vector<16x8xf32> -> vector<16x8xf32>
    %495 = arith.addf %490, %494 : vector<16x8xf32>
    %cst_358 = arith.constant dense<0.000000e+00> : vector<8x8xf32>
    %496 = tpu.matmul %483, %111, %cst_358 {dimension_numbers = #tpu.dot_dimension_numbers<[1], [0], [0], [1], [0, 0, 1, 1], [], []>} : vector<8x6xf32>, vector<6x8xf32>, vector<8x8xf32> -> vector<8x8xf32>
    %c2_359 = arith.constant 2 : index
    %c0_360 = arith.constant 0 : index
    %c0_361 = arith.constant 0 : index
    %497 = vector.load %arg6[%c2_359, %c0_360, %c0_361] : memref<3x16x8xf32, #tpu.memory_space<vmem>>, vector<1x16x8xf32>
    %498 = vector.shape_cast %497 : vector<1x16x8xf32> to vector<16x8xf32>
    %cst_362 = arith.constant dense<0.000000e+00> : vector<16x8xf32>
    %499 = tpu.matmul %498, %496, %cst_362 {dimension_numbers = #tpu.dot_dimension_numbers<[1], [0], [0], [1], [0, 0, 1, 1], [], []>} : vector<16x8xf32>, vector<8x8xf32>, vector<16x8xf32> -> vector<16x8xf32>
    %500 = arith.addf %495, %499 : vector<16x8xf32>
    %cst_363 = arith.constant 0.000000e+00 : f32
    %501 = vector.broadcast %cst_363 : f32 to vector<16x8xf32>
    %502 = arith.maximumf %500, %501 : vector<16x8xf32>
    %cst_364 = arith.constant dense<0.000000e+00> : vector<16x16xf32>
    %503 = tpu.matmul %502, %125, %cst_364 {dimension_numbers = #tpu.dot_dimension_numbers<[1], [0], [0], [1], [0, 0, 1, 1], [], []>} : vector<16x8xf32>, vector<8x16xf32>, vector<16x16xf32> -> vector<16x16xf32>
    %cst_365 = arith.constant dense<0.000000e+00> : vector<16x32xf32>
    %504 = tpu.matmul %503, %143, %cst_365 {dimension_numbers = #tpu.dot_dimension_numbers<[1], [0], [0], [1], [0, 0, 1, 1], [], []>} : vector<16x16xf32>, vector<16x32xf32>, vector<16x32xf32> -> vector<16x32xf32>
    %c0_366 = arith.constant 0 : index
    %c0_367 = arith.constant 0 : index
    %c0_368 = arith.constant 0 : index
    %505 = vector.load %arg8[%c0_366, %c0_367, %c0_368] : memref<3x4x16xf32, #tpu.memory_space<vmem>>, vector<1x4x16xf32>
    %506 = vector.shape_cast %505 : vector<1x4x16xf32> to vector<4x16xf32>
    %cst_369 = arith.constant dense<0.000000e+00> : vector<4x32xf32>
    %507 = tpu.matmul %506, %504, %cst_369 {dimension_numbers = #tpu.dot_dimension_numbers<[1], [0], [0], [1], [0, 0, 1, 1], [], []>} : vector<4x16xf32>, vector<16x32xf32>, vector<4x32xf32> -> vector<4x32xf32>
    %c0_370 = arith.constant 0 : index
    %c0_371 = arith.constant 0 : index
    %508 = vector.load %arg9[%c0_370, %c0_371] : memref<4x1xf32, #tpu.memory_space<vmem>>, vector<4x1xf32>
    %509 = vector.broadcast %508 : vector<4x1xf32> to vector<4x32xf32>
    %510 = arith.addf %507, %509 : vector<4x32xf32>
    %cst_372 = arith.constant dense<0.000000e+00> : vector<16x32xf32>
    %511 = tpu.matmul %503, %161, %cst_372 {dimension_numbers = #tpu.dot_dimension_numbers<[1], [0], [0], [1], [0, 0, 1, 1], [], []>} : vector<16x16xf32>, vector<16x32xf32>, vector<16x32xf32> -> vector<16x32xf32>
    %c1_373 = arith.constant 1 : index
    %c0_374 = arith.constant 0 : index
    %c0_375 = arith.constant 0 : index
    %512 = vector.load %arg8[%c1_373, %c0_374, %c0_375] : memref<3x4x16xf32, #tpu.memory_space<vmem>>, vector<1x4x16xf32>
    %513 = vector.shape_cast %512 : vector<1x4x16xf32> to vector<4x16xf32>
    %cst_376 = arith.constant dense<0.000000e+00> : vector<4x32xf32>
    %514 = tpu.matmul %513, %511, %cst_376 {dimension_numbers = #tpu.dot_dimension_numbers<[1], [0], [0], [1], [0, 0, 1, 1], [], []>} : vector<4x16xf32>, vector<16x32xf32>, vector<4x32xf32> -> vector<4x32xf32>
    %515 = arith.addf %510, %514 : vector<4x32xf32>
    %cst_377 = arith.constant dense<0.000000e+00> : vector<16x32xf32>
    %516 = tpu.matmul %503, %179, %cst_377 {dimension_numbers = #tpu.dot_dimension_numbers<[1], [0], [0], [1], [0, 0, 1, 1], [], []>} : vector<16x16xf32>, vector<16x32xf32>, vector<16x32xf32> -> vector<16x32xf32>
    %c2_378 = arith.constant 2 : index
    %c0_379 = arith.constant 0 : index
    %c0_380 = arith.constant 0 : index
    %517 = vector.load %arg8[%c2_378, %c0_379, %c0_380] : memref<3x4x16xf32, #tpu.memory_space<vmem>>, vector<1x4x16xf32>
    %518 = vector.shape_cast %517 : vector<1x4x16xf32> to vector<4x16xf32>
    %cst_381 = arith.constant dense<0.000000e+00> : vector<4x32xf32>
    %519 = tpu.matmul %518, %516, %cst_381 {dimension_numbers = #tpu.dot_dimension_numbers<[1], [0], [0], [1], [0, 0, 1, 1], [], []>} : vector<4x16xf32>, vector<16x32xf32>, vector<4x32xf32> -> vector<4x32xf32>
    %520 = arith.addf %515, %519 : vector<4x32xf32>
    %c3_382 = arith.constant 3 : index
    %c0_383 = arith.constant 0 : index
    %c0_384 = arith.constant 0 : index
    %521 = vector.load %arg10[%c3_382, %c0_383, %c0_384] : memref<4x4x32xf32, #tpu.memory_space<vmem>>, vector<1x4x32xf32>
    %522 = vector.shape_cast %521 : vector<1x4x32xf32> to vector<4x32xf32>
    %523 = vector.shape_cast %520 : vector<4x32xf32> to vector<1x4x32xf32>
    tpu.vector_store %arg10[%c3_382, %c0_383, %c0_384], %523 {strides = array<i32>} : memref<4x4x32xf32, #tpu.memory_space<vmem>>, vector<1x4x32xf32>,
    return
  }
  func.func @transform_0(%arg0: i32) -> (i32, i32, i32) {
    %c0_i32 = arith.constant 0 : i32
    %c0_i32_0 = arith.constant 0 : i32
    %c0_i32_1 = arith.constant 0 : i32
    return %arg0, %c0_i32, %c0_i32_0 : i32, i32, i32
  }
  func.func @transform_1(%arg0: i32) -> (i32, i32, i32) {
    %c0_i32 = arith.constant 0 : i32
    %c0_i32_0 = arith.constant 0 : i32
    %c0_i32_1 = arith.constant 0 : i32
    %c0_i32_2 = arith.constant 0 : i32
    return %c0_i32, %c0_i32_0, %c0_i32_1 : i32, i32, i32
  }
  func.func @transform_2(%arg0: i32) -> (i32, i32) {
    %c0_i32 = arith.constant 0 : i32
    %c0_i32_0 = arith.constant 0 : i32
    %c0_i32_1 = arith.constant 0 : i32
    return %c0_i32, %c0_i32_0 : i32, i32
  }
  func.func @transform_3(%arg0: i32) -> (i32, i32, i32) {
    %c0_i32 = arith.constant 0 : i32
    %c0_i32_0 = arith.constant 0 : i32
    %c0_i32_1 = arith.constant 0 : i32
    %c0_i32_2 = arith.constant 0 : i32
    return %c0_i32, %c0_i32_0, %c0_i32_1 : i32, i32, i32
  }
  func.func @transform_4(%arg0: i32) -> (i32, i32) {
    %c0_i32 = arith.constant 0 : i32
    %c0_i32_0 = arith.constant 0 : i32
    %c0_i32_1 = arith.constant 0 : i32
    return %c0_i32, %c0_i32_0 : i32, i32
  }
  func.func @transform_5(%arg0: i32) -> (i32, i32, i32) {
    %c0_i32 = arith.constant 0 : i32
    %c0_i32_0 = arith.constant 0 : i32
    %c0_i32_1 = arith.constant 0 : i32
    %c0_i32_2 = arith.constant 0 : i32
    return %c0_i32, %c0_i32_0, %c0_i32_1 : i32, i32, i32
  }
  func.func @transform_6(%arg0: i32) -> (i32, i32) {
    %c0_i32 = arith.constant 0 : i32
    %c0_i32_0 = arith.constant 0 : i32
    %c0_i32_1 = arith.constant 0 : i32
    return %c0_i32, %c0_i32_0 : i32, i32
  }
  func.func @transform_7(%arg0: i32) -> (i32, i32, i32) {
    %c0_i32 = arith.constant 0 : i32
    %c0_i32_0 = arith.constant 0 : i32
    %c0_i32_1 = arith.constant 0 : i32
    %c0_i32_2 = arith.constant 0 : i32
    return %c0_i32, %c0_i32_0, %c0_i32_1 : i32, i32, i32
  }
  func.func @transform_8(%arg0: i32) -> (i32, i32) {
    %c0_i32 = arith.constant 0 : i32
    %c0_i32_0 = arith.constant 0 : i32
    %c0_i32_1 = arith.constant 0 : i32
    return %c0_i32, %c0_i32_0 : i32, i32
  }
  func.func @transform_9(%arg0: i32) -> (i32, i32, i32) {
    %c0_i32 = arith.constant 0 : i32
    %c0_i32_0 = arith.constant 0 : i32
    %c0_i32_1 = arith.constant 0 : i32
    return %arg0, %c0_i32, %c0_i32_0 : i32, i32, i32
  }
}

</mosaic_0001>

<bundles_post_ra>
// kernel: tpu_custom_call.1
= control target key start
LH: loop header
LB: loop body
LE: loop exit
PB: predicated region body
PF: predicated region fallthrough
CT: control target
= control target key end

     0   :  { %14 = vsyncpa [#allocation3], 0  ;;  %s5578_s0 = inlined_call_operand.vmem [shape: f32[8,4,32], index: 0, kind: input, shape index: {}]   ;;  %s5579_s1 = inlined_call_operand.vmem [shape: f32[3,16,4], index: 1, kind: input, shape index: {}]   ;;  %s5580_s2 = inlined_call_operand.vmem [shape: f32[16,1], index: 2, kind: input, shape index: {}]   ;;  %s5581_s3 = inlined_call_operand.vmem [shape: f32[3,8,16], index: 3, kind: input, shape index: {}]   ;;  %s5582_s4 = inlined_call_operand.vmem [shape: f32[8,1], index: 4, kind: input, shape index: {}]   ;;  %s5583_s5 = inlined_call_operand.vmem [shape: f32[3,16,8], index: 5, kind: input, shape index: {}]   ;;  %s5584_s6 = inlined_call_operand.vmem [shape: f32[16,1], index: 6, kind: input, shape index: {}]   ;;  %s5585_s7 = inlined_call_operand.vmem [shape: f32[3,4,16], index: 7, kind: input, shape index: {}]   ;;  %s5586_s8 = inlined_call_operand.vmem [shape: f32[4,1], index: 8, kind: input, shape index: {}]   ;;  %s5587_s9 = inlined_call_operand.hbm [shape: f32[8,4,32], index: 9, kind: output, shape index: {}]  }
   0x1   :  { %16 = vsyncpa [#allocation3 + $0x1], 0  ;;  %s4353_s30 = smov 0   ;;  %s4355_s10 = smov 0  }
   0x2   :  { %s4357_s11 = smov 0   ;;  %s4359_s12 = smov 0  }
   0x3 LB: > { %s4374_s13 = sadd.s32 4294967295, %s4296_s12   ;;  %s3767_s14 = sadd.s32 4294967294, %s4296_s12   ;;  %s4296_s12 = sphi %s4359_s12, %s5919_s12   ;;  %s4292_s11 = sphi %s4357_s11, %s5918_s11   ;;  %s4288_s10 = sphi %s4355_s10, %s5917_s10   ;;  %s4284_s30 = sphi %s4353_s30, %s5916_s30  }
   0x4   : > { %s4378_s15 = sadd.s32 1, %s4296_s12   ;;  %s223_s16 = sadd.s32 1, %s4292_s11 }
   0x5   : > { %s220_s17 = ssub.s32 %s4296_s12, %s4378_s15  ;;  %p233_p0 = scmp.ne.s32.totalorder %s4292_s11, %s4288_s10 }
   0x6   : > { %p221_p1 = scmp.eq.s32.totalorder %s220_s17, 0  ;;  %p234_p2 = scmp.eq.s32.totalorder %s4374_s13, 1 }
   0x7   : > { %p239_p3 = scmp.ne.s32.totalorder %s4288_s10, %s4284_s30  ;;  %p240_p4 = scmp.eq.s32.totalorder %s3767_s14, 1 }
   0x8   : > { %s4389_s18 = scalar_select %p221_p1, %s4292_s11, %s223_s16  }
   0x9   : > { %p4391_p5 = por %p234_p2, %p233_p0  ;;  %p4395_p6 = por %p240_p4, %p239_p3 }
   0xa   : > { %p3770_p7 = scmp.ge.s32.totalorder %s4296_s12, 1  ;;  %p291_p8 = scmp.lt.s32.totalorder %s4296_s12, 3 }
   0xc   : > { %p292_p9 = pnand %p3770_p7, %p291_p8 }
   0xe   : > { %295 = sbr.rel (%p292_p9) target bundleno = 6231 (0x1857), region = 56 }
  0x13   : > { %v334_v0 = vlaneseq  ;;  %s3772_s21 = sshll.u32 %s4374_s13, 2  ;;  %v5620_v6 = vmov 1.0   ;;  %v5650_v7 = vmov 0  ;;  %v5652_v8 = vmov 0  ;;  %v471_v12 = vld [vmem:[%s5580_s2] sm:$0xff]  ;;  %v472_v15 = vld [vmem:[%s5580_s2 + $0x8] sm:$0xff] }
  0x14   : > { %p328_p10 = scmp.lt.s32.totalorder %s3772_s21, 7  ;;  %vm5593_vm4 = vcmask 261120   ;;  %v4299_v11 = vmov 0   ;;  %v5654_v13 = vmov 0  ;;  %vm5588_vm9 = vcmask 1043456   ;;  %v4498_v17 = vld [vmem:[%s5579_s1 + $0x8] sm:$0xff] }
  0x15   : > { %v4402_v1 = vshrl.u32 %v334_v0, 7  ;;  %v4404_v2 = vand.u32 127, %v334_v0  ;;  %4231 = vset.pattern.permute.xlu0 %v4299_v11  ;;  %4232 = vset.pattern.permute.xlu1 %v4299_v11  ;;  %vm5590_vm10 = vcmask 31744   ;;  %v5658_v19 = vmov 0  ;;  %v1757_v21 = vld [vmem:[%s5584_s6 + $0x8] sm:$0xff]  ;;  %v2360_v22 = vld [vmem:[%s5582_s4] sm:$0xff] }
  0x16   : > { %s5921_s21 = smov (!%p328_p10, %s3772_s21), 7  ;;  %475 = vperm.xlu0 %4231, %v471_v12   ;;  %4233 = vset.pattern.permute.xlu2 %v4299_v11  ;;  %v4544_v24 = vld [vmem:[%s5579_s1 + $0x20] sm:$0xff]  ;;  %v4562_v27 = vld [vmem:[%s5579_s1 + $0x28] sm:$0xff]  ;;  %v4572_v30 = vld [vmem:[%s5579_s1 + $0x10] sm:$0xff]  ;;  %v4300_v35 = vmov 0.0   ;;  %v5664_v38 = vmov 0 }
  0x17   : > { %v4407_v3 = vadd.s32 24, %v4402_v1  ;;  %v4410_v4 = vadd.s32 16, %v4402_v1  ;;  %v4413_v5 = vadd.s32 8, %v4402_v1  ;;  %s3773_s22 = sshll.u32 %s5921_s21, 2  ;;  %vm4440_vm3 = vcmp.eq.s32.totalorder %v4402_v1, %v4404_v2  ;;  %955 = vperm.xlu2 %4233, %v1757_v21   ;;  %733 = vperm.xlu1 %4232, %v2360_v22   ;;  %v4549_v25 = vld [vmem:[%s5579_s1] sm:$0xff]  ;;  %v4580_v32 = vld [vmem:[%s5579_s1 + $0x18] sm:$0xff] }
  0x18   : > { %s4432_s25 = scalar_lea.vmem %s5578_s0, %s3773_s22  ;;  %v5653_v8 = vsel %vm4440_vm3, 4294967295, %v5652_v8  ;;  %v4453_v10 = vadd.s32 2, %v4404_v2  ;;  %v4493_v16 = vadd.s32 1, %v4404_v2  ;;  %v3354_v26 = vld [vmem:[%s5584_s6] sm:$0xff]  ;;  %v4585_v33 = vmul.u32 2, %v4404_v2  ;;  %s324_s24 = sand.u32 1, %s4288_s10  }
  0x19   : > { %vm5591_vm0 = vcmp.eq.s32.totalorder %v4407_v3, %v4404_v2  ;;  %vm5589_vm1 = vcmp.eq.s32.totalorder %v4410_v4, %v4404_v2  ;;  %vm4425_vm2 = vcmp.eq.s32.totalorder %v4413_v5, %v4404_v2  ;;  %v444_v9 = vld [vmem:[%s4432_s25] sm:$0xf]  ;;  %v5666_v39 = vmov 0  ;;  %s3771_s26 = sshll.u32 %s324_s24, 4  ;;  %s4185_s28 = sshll.u32 %s4374_s13, 4 }
  0x1a   : > { %3778 = vmatpush.msk.msra.mxu0 %vm5591_vm0, %v5620_v6  ;;  %v5651_v7 = vsel %vm4425_vm2, 4294967295, %v5650_v7  ;;  %vm5605_vm5 = vcmp.eq.s32.totalorder %v4407_v3, %v4453_v10  ;;  %vm5595_vm6 = vcmp.eq.s32.totalorder %v4410_v4, %v4453_v10  ;;  %vm4468_vm7 = vcmp.eq.s32.totalorder %v4413_v5, %v4453_v10  ;;  %v1964_v28 = vld [vmem:[%s5586_s8] sm:$0xf]  ;;  %s4978_s27 = scalar_lea.vmem [#allocation2], %s3771_s26  ;;  %s3701_s14 = scalar_lea.hbm %s5587_s9, %s4185_s28 }
  0x1b   : > { %v5655_v13 = vsel %vm4468_vm7, 4294967295, %v5654_v13  ;;  %vm4478_vm8 = vcmp.eq.s32.totalorder %v4402_v1, %v4453_v10  ;;  %vm5606_vm11 = vcmp.eq.s32.totalorder %v4407_v3, %v4493_v16  ;;  %vm5601_vm12 = vcmp.eq.s32.totalorder %v4410_v4, %v4493_v16  ;;  %v2763_v11 = vld [vmem:[%s5586_s8] sm:$0xf]  ;;  %s3702_s16 = sshll.u32 %s4978_s27, 4  ;;  %s3704_s17 = sshll.u32 %s3701_s14, 4  ;;  %s3703_s16 = int_to_ptr.vmem [resolvable:$true] %s3702_s16  ;;  %s3705_s17 = int_to_ptr.hbm [resolvable:$true] %s3704_s17 }
  0x1c   : > { %3779 = vmatpush.msk.msra.mxu0 %vm5589_vm1, %v5620_v6  ;;  %vm4514_vm13 = vcmp.eq.s32.totalorder %v4413_v5, %v4493_v16  ;;  %vm4524_vm14 = vcmp.eq.s32.totalorder %v4402_v1, %v4493_v16  ;;  %v4588_v34 = vadd.s32 1, %v4585_v33  ;;  %vm371_vm15 = vcmp.eq.s32.totalorder %v4407_v3, %v4585_v33  ;;  %s3690_s21 = scalar_lea.sflag [#allocation3], %s324_s24  ;;  %s4248_s13 = sshra.s32 %s3705_s17, 4  ;;  %s4249_s13 = int_to_ptr.hbm [resolvable:$true] %s4248_s13 }
  0x1d   : > { %v5659_v19 = vsel %vm4514_vm13, 4294967295, %v5658_v19  ;;  %v4595_v36 = vsel %vm371_vm15, 1.0, %v4300_v35  ;;  %vm5604_vm1 = vcmask 1045504   ;;  %v5671_v41 = vmov 0  ;;  %s4250_s22 = scalar_lea.hbm %s4249_s13, 16  ;;  %s4254_s28 = scalar_lea.hbm %s5587_s9, 32 }
  0x1e   : > { %3780 = vmatpush.msk.msra.mxu0 %vm4425_vm2, %v5620_v6  ;;  %480 = vperm.xlu0 %4231, %v472_v15   ;;  %5662 = vst [vmem:[#allocation5_spill] sm:$0xff] %v4588_v34  ;;  %vm5592_vm0 = vcmp.eq.s32.totalorder %v4410_v4, %v4588_v34  ;;  %vm4624_vm15 = vcmp.eq.s32.totalorder %v4413_v5, %v4588_v34  ;;  %v4659_v57 = vsel %vm4425_vm2, 1.0, %v4300_v35  ;;  %v4664_v58 = vsel %vm4514_vm13, 1.0, %v4300_v35  ;;  %p4251_p11 = scmp.ne.s32.totalorder %s4249_s13, %s4250_s22  ;;  %p4255_p0 = scmp.lt.s32.totalorder %s4249_s13, %s5587_s9 }
  0x1f   : > { %1323 = vperm.xlu2 %4233, %v471_v12   ;;  %950 = vperm.xlu1 %4232, %v3354_v26   ;;  %v5667_v39 = vsel %vm4624_vm15, 4294967295, %v5666_v39  ;;  %v4679_v59 = vsel %vm4468_vm7, 1.0, %v4300_v35  ;;  %p4256_p1 = scmp.lt.s32.totalorder %s4254_s28, %s4250_s22 }
  0x20   : > { %3781 = vmatpush.msk.msra.mxu0 %vm4440_vm3, %v5620_v6  ;;  %5668 = vst [vmem:[#allocation7_spill] sm:$0xff] %v5667_v39  ;;  %p4252_p12 = pnand %p4251_p11, %p4391_p5 }
  0x21   : > { %3782 = vmatmul.msk.f32.vlgmr.msra.gmra.mxu0 %vm5593_vm4, %v444_v9  ;;  %p4257_p2 = por %p4256_p1, %p4255_p0 }
  0x22   : > { %3796 = vmatpush.msk.msrb.mxu0 %vm5605_vm5, %v5620_v6  ;;  %p4253_p13 = pneg %p4252_p12 }
  0x24   : > { %3797 = vmatpush.msk.msrb.mxu0 %vm5595_vm6, %v5620_v6  ;;  %vm5597_vm6 = vcmask 1046528   ;;  %p4258_p3 = pnand %p4257_p2, %p4253_p13 }
  0x26   : > { %3798 = vmatpush.msk.msrb.mxu0 %vm4468_vm7, %v5620_v6  ;;  %1328 = vperm.xlu0 %4231, %v472_v15  }
  0x27   : > { %1760 = vperm.xlu2 %4233, %v3354_v26   ;;  %1564 = vperm.xlu1 %4232, %v2360_v22  }
  0x28   : > { %3799 = vmatpush.msk.msrb.mxu0 %vm4478_vm8, %v5620_v6 }
  0x29   : > { %3800 = vmatmul.msk.f32.vlgmr.msrb.gmra.mxu0 %vm5593_vm4, %v444_v9 }
  0x2a   : > { %3818 = vmatpush.msk.msra.mxu0 %vm5597_vm6, %v4659_v57 }
  0x2c   : > { %3819 = vmatpush.msk.msra.mxu0 %vm4440_vm3, %v5620_v6 }
  0x2e   : > { %1765 = vperm.xlu0 %4231, %v1757_v21   ;;  %3829 = vmatpush.msk.msrb.mxu0 %vm5597_vm6, %v4679_v59 }
  0x2f   : > { %2127 = vperm.xlu2 %4233, %v472_v15   ;;  %2122 = vperm.xlu1 %4232, %v471_v12  }
  0x30   : > { %3830 = vmatpush.msk.msrb.mxu0 %vm4478_vm8, %v5620_v6 }
  0x36   : > { %2363 = vperm.xlu0 %4231, %v2360_v22  }
  0x37   : > { %2564 = vperm.xlu2 %4233, %v1757_v21   ;;  %2559 = vperm.xlu1 %4232, %v3354_v26  }
  0x3e   : > { %2921 = vperm.xlu0 %4231, %v471_v12  }
  0x3f   : > { %3162 = vperm.xlu2 %4233, %v2360_v22   ;;  %2926 = vperm.xlu1 %4232, %v472_v15   ;;  %v4698_v22 = vld [vmem:[%s5581_s3] sm:$0xff] }
  0x46   : > { %3358 = vperm.xlu0 %4231, %v3354_v26  }
  0x47   : > { %3363 = vperm.xlu1 %4232, %v1757_v21  }
  0x4e   : > { %1967 = vperm.xlu0 %4231, %v1964_v28  }
  0x4f   : > { %2766 = vperm.xlu1 %4232, %v2763_v11  }
  0x88   : > { %v476_v42 = vpop.permute.xlu0 %475 }
  0x90   : > { %v481_v49 = vpop.permute.xlu0 %480 }
  0x9e   : > { %v466_v18 = vpop.f32.mrf.mxu0 }
  0x9f   : > { %3783 = vmatpush.msk.msra.mxu1 %vm5588_vm9, %v466_v18  ;;  %4186 = vmatpush.msk.msra.mxu2 %vm5588_vm9, %v466_v18 }
  0xa0   : > { %3785 = vmatmul.msk.f32.vlgmr.msra.gmra.mxu2 %vm5590_vm10, %v4498_v17  ;;  %3784 = vmatmul.msk.f32.vlgmr.msra.gmra.mxu1 %vm5590_vm10, %v4549_v25 }
  0xa1   : > { %3786 = vmatpush.msk.msrb.mxu2 %vm5606_vm11, %v5620_v6  ;;  %3806 = vmatpush.msk.msrb.mxu1 %vm5604_vm1, %v4595_v36 }
  0xa3   : > { %3787 = vmatpush.msk.msrb.mxu2 %vm5601_vm12, %v5620_v6 }
  0xa5   : > { %3788 = vmatpush.msk.msrb.mxu2 %vm4514_vm13, %v5620_v6 }
  0xa6   : > { %v591_v23 = vpop.f32.mrf.mxu0 }
  0xa7   : > { %3789 = vmatpush.msk.msrb.mxu2 %vm4524_vm14, %v5620_v6 }
  0xa8   : > { %3790 = vmatmul.msk.f32.vlgmr.msrb.gmra.mxu2 %vm5593_vm4, %v444_v9  ;;  %vm4642_vm4 = vcmp.eq.s32.totalorder %v4402_v1, %v4588_v34 }
  0xa9   : > { %3803 = vmatpush.msk.msra.mxu2 %vm5588_vm9, %v591_v23  ;;  %v5672_v41 = vsel %vm4642_vm4, 4294967295, %v5671_v41  ;;  %v4703_v23 = vld [vmem:[%s5581_s3 + $0x8] sm:$0xff] }
  0xb0   : > { %3804 = vmatmul.msk.f32.vlgmr.msra.gmra.mxu2 %vm5590_vm10, %v4544_v24 }
  0xb8   : > { %3805 = vmatmul.msk.f32.gmra.mxu2 %vm5590_vm10, %v4562_v27 }
 0x11d   : > { %v511_v43 = vpop.f32.mrf.mxu1 }
 0x11e   : > { %v512_v44 = vadd.f32 %v511_v43, %v476_v42  ;;  %v4724_v42 = vsel %vm4624_vm15, 1.0, %v4300_v35 }
 0x123   : > { %v514_v29 = vpop.f32.mrf.mxu2 }
 0x124   : > { %v515_v51 = vadd.f32 %v514_v29, %v481_v49  ;;  %v4712_v29 = vld [vmem:[%s5581_s3 + $0x10] sm:$0xff] }
 0x12b   : > { %v534_v31 = vpop.f32.mrf.mxu2 }
 0x12c   : > { %3793 = vmatpush.msk.msra.mxu3 %vm5588_vm9, %v534_v31  ;;  %vm380_vm9 = vcmp.eq.s32.totalorder %v4407_v3, %v4588_v34 }
 0x12d   : > { %3794 = vmatmul.msk.f32.vlgmr.msra.gmra.mxu3 %vm5590_vm10, %v4572_v30  ;;  %v4598_v37 = vsel %vm380_vm9, 1.0, %v4300_v35  ;;  %vm4618_vm9 = vcmp.eq.s32.totalorder %v4413_v5, %v4585_v33 }
 0x12e   : > { %5663 = vst [vmem:[#allocation6_spill] sm:$0xff] %v4598_v37  ;;  %3812 = vmatpush.msk.msrb.mxu3 %vm5604_vm1, %v4598_v37  ;;  %v5665_v38 = vsel %vm4618_vm9, 4294967295, %v5664_v38  ;;  %v4719_v31 = vsel %vm4618_vm9, 1.0, %v4300_v35 }
 0x130   : > { %3813 = vmatpush.msk.msrb.mxu3 %vm5592_vm0, %v5620_v6  ;;  %vm4636_vm0 = vcmp.eq.s32.totalorder %v4402_v1, %v4585_v33 }
 0x132   : > { %3814 = vmatpush.msk.msrb.mxu3 %vm4624_vm15, %v5620_v6 }
 0x133   : > { %v623_v45 = vpop.f32.mrf.mxu2 }
 0x134   : > { %3815 = vmatpush.msk.msrb.mxu3 %vm4642_vm4, %v5620_v6 }
 0x135   : > { %3795 = vmatmul.msk.f32.gmra.mxu3 %vm5590_vm10, %v4580_v32  ;;  %vm5594_vm10 = vcmp.eq.s32.totalorder %v4410_v4, %v4585_v33 }
 0x136   : > { %3807 = vmatpush.msk.msrb.mxu1 %vm5594_vm10, %v5620_v6  ;;  %vm5596_vm10 = vcmask 244736  }
 0x138   : > { %3808 = vmatpush.msk.msrb.mxu1 %vm4618_vm9, %v5620_v6 }
 0x13a   : > { %3809 = vmatpush.msk.msrb.mxu1 %vm4636_vm0, %v5620_v6 }
 0x13b   : > { %v626_v53 = vpop.f32.mrf.mxu2 }
 0x13c   : > { %3823 = vmatpush.msk.msra.mxu1 %vm5597_vm6, %v4664_v58  ;;  %vm5599_vm6 = vcmask 130048  }
 0x13e   : > { %3824 = vmatpush.msk.msra.mxu1 %vm4524_vm14, %v5620_v6 }
 0x1b0   : > { %v566_v46 = vpop.f32.mrf.mxu3 }
 0x1b1   : > { %v572_v47 = vadd.f32 %v566_v46, %v512_v44  ;;  %v734_v44 = vpop.permute.xlu1 %733 }
 0x1b3   : > { %v629_v48 = vadd.f32 %v623_v45, %v572_v47 }
 0x1b5   : > { %v631_v50 = vmax.f32 %v629_v48, 0.0 }
 0x1b7   : > { %3810 = vmatmul.msk.f32.vlgmr.msrb.gmra.mxu1 %vm5596_vm10, %v631_v50  ;;  %3816 = vmatmul.msk.f32.vlgmr.msrb.gmra.mxu3 %vm5596_vm10, %v631_v50 }
 0x1b8   : > { %v569_v52 = vpop.f32.mrf.mxu3 }
 0x1b9   : > { %v573_v54 = vadd.f32 %v569_v52, %v515_v51  ;;  %v385_v51 = vadd.s32 4294967294, %v4404_v2  ;;  %v388_v52 = vadd.s32 4294967295, %v4404_v2 }
 0x1bb   : > { %v630_v55 = vadd.f32 %v626_v53, %v573_v54  ;;  %vm389_vm12 = vcmp.eq.s32.totalorder %v4402_v1, %v388_v52 }
 0x1bc   : > { %v4746_v54 = vsel %vm389_vm12, 1.0, %v4300_v35  ;;  %vm5607_vm12 = vcmask 64512  }
 0x1bd   : > { %v632_v56 = vmax.f32 %v630_v55, 0.0  ;;  %v4755_v55 = vsel %vm4440_vm3, 1.0, %v4300_v35 }
 0x1bf   : > { %3811 = vmatmul.msk.f32.gmra.mxu1 %vm5596_vm10, %v632_v56  ;;  %3817 = vmatmul.msk.f32.gmra.mxu3 %vm5596_vm10, %v632_v56  ;;  %vm5598_vm10 = vcmask 121856  }
 0x234   : > { %v661_v60 = vpop.f32.mrf.mxu1 }
 0x23a   : > { %v687_v61 = vpop.f32.mrf.mxu3 }
 0x23b   : > { %v693_v62 = vmax.f32 %v661_v60, %v687_v61 }
 0x23c   : > { %v664_v63 = vpop.f32.mrf.mxu1 }
 0x23d   : > { %3820 = vmatmul.msk.f32.vlgmr.msra.gmra.mxu0 %vm5598_vm10, %v693_v62  ;;  %3825 = vmatmul.msk.f32.vlgmr.msra.gmra.mxu1 %vm5598_vm10, %v693_v62 }
 0x23e   : > { %3845 = vmatpush.msk.msra.mxu0 %vm5604_vm1, %v4746_v54 }
 0x242   : > { %v690_v0 = vpop.f32.mrf.mxu3 }
 0x243   : > { %v694_v9 = vmax.f32 %v664_v63, %v690_v0  ;;  %v4771_v63 = vld [vmem:[%s5583_s5] sm:$0xff]  ;;  %v4776_v0 = vld [vmem:[%s5583_s5 + $0x10] sm:$0xff] }
 0x245   : > { %3821 = vmatmul.msk.f32.gmra.mxu0 %vm5598_vm10, %v694_v9  ;;  %3826 = vmatmul.msk.f32.gmra.mxu1 %vm5598_vm10, %v694_v9 }
 0x24d   : > { %3831 = vmatmul.msk.f32.vlgmr.msrb.gmra.mxu0 %vm5598_vm10, %v693_v62  ;;  %v1163_v62 = vld [vmem:[%s5586_s8] sm:$0xf] }
 0x24e   : > { %1166 = vperm.xlu2 %4233, %v1163_v62   ;;  %v5677_v62 = vmov 0 }
 0x255   : > { %3832 = vmatmul.msk.f32.gmra.mxu0 %vm5598_vm10, %v694_v9  ;;  %vm5600_vm10 = vcmask 1044480  }
 0x2ba   : > { %v723_v12 = vpop.f32.mrf.mxu0  ;;  %v780_v15 = vpop.f32.mrf.mxu1 }
 0x2c2   : > { %v726_v18 = vpop.f32.mrf.mxu0  ;;  %v783_v21 = vpop.f32.mrf.mxu1 }
 0x2c3   : > { %754 = vmatpush.msrb.mxu2 %v726_v18  ;;  %805 = vmatpush.msra.mxu3 %v783_v21  ;;  %v4795_v21 = vld [vmem:[%s5583_s5 + $0x20] sm:$0xff] }
 0x2c4   : > { %5673 = vst [vmem:[#allocation8_spill] sm:$0xff] %v4795_v21 }
 0x2c5   : > { %755 = vmatpush.msrb.mxu2 %v723_v12  ;;  %806 = vmatpush.msra.mxu3 %v780_v15  ;;  %v4785_v12 = vld [vmem:[%s5583_s5 + $0x8] sm:$0xff]  ;;  %v4790_v15 = vld [vmem:[%s5583_s5 + $0x18] sm:$0xff] }
 0x2c6   : > { %3822 = vmatmul.msk.f32.vlgmr.msrb.gmra.mxu2 %vm5599_vm6, %v4698_v22  ;;  %3828 = vmatmul.msk.f32.vlgmr.msra.gmra.mxu3 %vm5599_vm6, %v4703_v23 }
 0x2c7   : > { %3835 = vmatpush.msk.msrb.mxu3 %vm5600_vm10, %v4719_v31 }
 0x2c9   : > { %3836 = vmatpush.msk.msrb.mxu3 %vm4636_vm0, %v5620_v6 }
 0x2ca   : > { %v832_v26 = vpop.f32.mrf.mxu0 }
 0x2d2   : > { %v835_v28 = vpop.f32.mrf.mxu0 }
 0x2d3   : > { %857 = vmatpush.msra.mxu2 %v835_v28  ;;  %v393_v28 = vadd.s32 1, %v4402_v1 }
 0x2d5   : > { %858 = vmatpush.msra.mxu2 %v832_v26  ;;  %v4806_v26 = vld [vmem:[%s5583_s5 + $0x28] sm:$0xff] }
 0x2d6   : > { %3834 = vmatmul.msk.f32.vlgmr.msra.gmra.mxu2 %vm5599_vm6, %v4712_v29  ;;  %vm5603_vm6 = vcmask 105472   ;;  %5674 = vst [vmem:[#allocation9_spill] sm:$0xff] %v4806_v26 }
 0x2d7   : > { %3838 = vmatpush.msk.msrb.mxu2 %vm5600_vm10, %v4724_v42  ;;  %vm386_vm10 = vcmp.eq.s32.totalorder %v4402_v1, %v385_v51 }
 0x2d8   : > { %v4743_v53 = vsel %vm386_vm10, 1.0, %v4300_v35  ;;  %vm5602_vm10 = vcmask 48128   ;;  %v3562_v35 = vld [vmem:[%s5586_s8] sm:$0xf] }
 0x2d9   : > { %3839 = vmatpush.msk.msrb.mxu2 %vm4642_vm4, %v5620_v6  ;;  %3841 = vmatpush.msk.msrb.mxu1 %vm5604_vm1, %v4743_v53 }
 0x2da   : > { %3565 = vperm.xlu2 %4233, %v3562_v35   ;;  %v5679_v35 = vmov 0 }
 0x2db   : > { %3851 = vmatpush.msk.msra.mxu1 %vm5604_vm1, %v4755_v55 }
 0x349   : > { %v757_v43 = vpop.f32.mrf.mxu2  ;;  %v808_v46 = vpop.f32.mrf.mxu3 }
 0x34a   : > { %v758_v45 = vadd.f32 %v757_v43, %v734_v44  ;;  %v391_v43 = vmul.u32 2, %v4402_v1  ;;  %v394_v44 = vmul.u32 2, %v393_v28 }
 0x34c   : > { %v811_v47 = vadd.f32 %v808_v46, %v758_v45  ;;  %v5675_v45 = vmov 0  ;;  %v398_v46 = vmul.u32 18, %v4404_v2 }
 0x359   : > { %v860_v48 = vpop.f32.mrf.mxu2 }
 0x35a   : > { %v863_v49 = vadd.f32 %v860_v48, %v811_v47  ;;  %v3775_v47 = vadd.s32 2, %v4413_v5  ;;  %v3777_v48 = vadd.s32 1, %v4413_v5 }
 0x35c   : > { %v864_v50 = vmax.f32 %v863_v49, 0.0  ;;  %v432_v49 = vmul.u32 32, %v4413_v5  ;;  %v406_v51 = vadd.s32 1, %v3775_v47  ;;  %v418_v52 = vmul.u32 32, %v3777_v48 }
 0x35d   : > { %v5681_v5 = vmov 0 }
 0x35e   : > { %3837 = vmatmul.msk.f32.vlgmr.msrb.gmra.mxu3 %vm5603_vm6, %v864_v50  ;;  %3840 = vmatmul.msk.f32.vlgmr.msrb.gmra.mxu2 %vm5603_vm6, %v864_v50  ;;  %vm395_vm6 = vcmp.lt.s32.totalorder %v4404_v2, %v394_v44  ;;  %v402_v50 = vmul.u32 32, %v3775_v47  ;;  %vm420_vm5 = vcmp.le.s32.totalorder %v418_v52, %v398_v46  ;;  %vm439_vm11 = vcmp.lt.s32.totalorder %v398_v46, %v418_v52 }
 0x3e1   : > { %v890_v56 = vpop.f32.mrf.mxu3  ;;  %v913_v60 = vpop.f32.mrf.mxu2 }
 0x3e2   : > { %v916_v61 = vmax.f32 %v890_v56, %v913_v60  ;;  %v422_v56 = vadd.s32 1, %v3777_v48  ;;  %v408_v60 = vmul.u32 32, %v406_v51 }
 0x3e4   : > { %3842 = vmatmul.msk.f32.vlgmr.msrb.gmra.mxu1 %vm5602_vm10, %v916_v61  ;;  %3846 = vmatmul.msk.f32.vlgmr.msra.gmra.mxu0 %vm5602_vm10, %v916_v61 }
 0x3ec   : > { %3852 = vmatmul.msk.f32.vlgmr.msra.gmra.mxu1 %vm5602_vm10, %v916_v61  ;;  %vm392_vm10 = vcmp.ge.s32.totalorder %v4404_v2, %v391_v43  ;;  %v424_v61 = vmul.u32 32, %v422_v56 }
 0x3ed   : > { %vm4814_vm1 = vmand %vm392_vm10, %vm395_vm6  ;;  %vm434_vm6 = vcmp.le.s32.totalorder %v432_v49, %v398_v46  ;;  %vm404_vm10 = vcmp.le.s32.totalorder %v402_v50, %v398_v46  ;;  %v956_v49 = vpop.permute.xlu2 %955 }
 0x3ee   : > { %v5676_v45 = vsel %vm4814_vm1, 4294967295, %v5675_v45  ;;  %3857 = vmatpush.msk.msrb.mxu1 %vm4814_vm1, %v5620_v6  ;;  %vm426_vm1 = vcmp.lt.s32.totalorder %v398_v46, %v424_v61  ;;  %vm4825_vm4 = vmand %vm434_vm6, %vm439_vm11 }
 0x3ef   : > { %v5678_v62 = vsel %vm4825_vm4, 4294967295, %v5677_v62  ;;  %vm4839_vm3 = vmand %vm420_vm5, %vm426_vm1  ;;  %vm5684_vm1 = vcmask 64512  }
 0x3f0   : > { %3871 = vmatpush.msk.msra.mxu1 %vm4825_vm4, %v5620_v6  ;;  %v5682_v5 = vsel %vm4839_vm3, 4294967295, %v5681_v5  ;;  %vm5685_vm5 = vmmov %vm5684_vm1 }
 0x3f1   : > { %5683 = vst [vmem:[#allocation10_spill] sm:$0xff] %v5682_v5 }
 0x461   : > { %v941_v9 = vpop.f32.mrf.mxu1  ;;  %v1008_v11 = vpop.f32.mrf.mxu0 }
 0x462   : > { %980 = vmatpush.msra.mxu3 %v941_v9  ;;  %1035 = vmatpush.msra.mxu2 %v1008_v11  ;;  %v951_v9 = vpop.permute.xlu1 %950 }
 0x463   : > { %3843 = vmatmul.msk.f32.vlgmr.msra.gmra.mxu3 %vm5607_vm12, %v4771_v63  ;;  %3849 = vmatmul.msk.f32.vlgmr.msra.gmra.mxu2 %vm5607_vm12, %v4776_v0 }
 0x469   : > { %v1065_v18 = vpop.f32.mrf.mxu1 }
 0x46a   : > { %1092 = vmatpush.msrb.mxu0 %v1065_v18 }
 0x46b   : > { %3844 = vmatmul.msk.f32.gmra.mxu3 %vm5607_vm12, %v4785_v12  ;;  %3850 = vmatmul.msk.f32.gmra.mxu2 %vm5607_vm12, %v4790_v15 }
 0x46c   : > { %3855 = vmatmul.msk.f32.vlgmr.msrb.gmra.mxu0 %vm5607_vm12, %v4795_v21 }
 0x46d   : > { %3865 = vmatpush.msk.msra.mxu0 %vm4839_vm3, %v5620_v6 }
 0x474   : > { %3856 = vmatmul.msk.f32.gmra.mxu0 %vm5607_vm12, %v4806_v26  ;;  %vm410_vm12 = vcmp.lt.s32.totalorder %v398_v46, %v408_v60 }
 0x475   : > { %vm4829_vm15 = vmand %vm404_vm10, %vm410_vm12 }
 0x476   : > { %v5680_v35 = vsel %vm4829_vm15, 4294967295, %v5679_v35  ;;  %3860 = vmatpush.msk.msrb.mxu3 %vm4829_vm15, %v5620_v6  ;;  %v3774_v6 = vadd.s32 2, %v4402_v1 }
 0x478   : > { %v405_v5 = vadd.s32 1, %v3774_v6 }
 0x4e6   : > { %v982_v11 = vpop.f32.mrf.mxu3  ;;  %v1037_v18 = vpop.f32.mrf.mxu2 }
 0x4e7   : > { %v983_v43 = vadd.f32 %v982_v11, %v951_v9  ;;  %v421_v9 = vadd.s32 1, %v393_v28  ;;  %v401_v11 = vmul.u32 32, %v3774_v6  ;;  %v5689_v6 = vmov 0 }
 0x4e9   : > { %v1043_v44 = vadd.f32 %v1037_v18, %v983_v43  ;;  %v1094_v47 = vpop.f32.mrf.mxu0  ;;  %v407_v18 = vmul.u32 32, %v405_v5  ;;  %v417_v43 = vmul.u32 32, %v393_v28  ;;  %vm403_vm11 = vcmp.le.s32.totalorder %v401_v11, %v398_v46  ;;  %v1324_v11 = vpop.permute.xlu2 %1323 }
 0x4eb   : > { %v1100_v48 = vadd.f32 %v1094_v47, %v1043_v44  ;;  %v423_v44 = vmul.u32 32, %v421_v9  ;;  %v431_v47 = vmul.u32 32, %v4402_v1  ;;  %vm409_vm12 = vcmp.lt.s32.totalorder %v398_v46, %v407_v18  ;;  %v3869_v9 = vld [vmem:[%s5585_s7 + $0x4] sm:$0xf]  ;;  %v4150_v1 = vld [vmem:[%s5583_s5 + $0x18] sm:$0xff] }
 0x4ec   : > { %vm419_vm6 = vcmp.le.s32.totalorder %v417_v43, %v398_v46 }
 0x4ed   : > { %v1102_v50 = vmax.f32 %v1100_v48, 0.0  ;;  %vm425_vm10 = vcmp.lt.s32.totalorder %v398_v46, %v423_v44  ;;  %v5686_v48 = vmov 0  ;;  %vm433_vm3 = vcmp.le.s32.totalorder %v431_v47, %v398_v46 }
 0x4ee   : > { %v985_v51 = vpop.f32.mrf.mxu3  ;;  %v1040_v52 = vpop.f32.mrf.mxu2  ;;  %vm4857_vm15 = vmand %vm419_vm6, %vm425_vm10  ;;  %vm5696_vm6 = vcmp.eq.s32.totalorder %v4410_v4, %v4453_v10  ;;  %vm5697_vm10 = vcmask 130048  }
 0x4ef   : > { %v986_v56 = vadd.f32 %v985_v51, %v956_v49  ;;  %3858 = vmatmul.msk.f32.vlgmr.msrb.gmra.mxu1 %vm5684_vm1, %v1102_v50  ;;  %vm4850_vm1 = vmand %vm403_vm11, %vm409_vm12  ;;  %v5690_v6 = vsel %vm4857_vm15, 4294967295, %v5689_v6  ;;  %vm5693_vm11 = vcmp.eq.s32.totalorder %v4407_v3, %v4493_v16  ;;  %vm5694_vm12 = vcmp.eq.s32.totalorder %v4407_v3, %v4453_v10 }
 0x4f0   : > { %v5687_v48 = vsel %vm4850_vm1, 4294967295, %v5686_v48 }
 0x4f1   : > { %v1044_v60 = vadd.f32 %v1040_v52, %v986_v56  ;;  %v1097_v61 = vpop.f32.mrf.mxu0  ;;  %v3875_v52 = vld [vmem:[%s5585_s7 + $0x8] sm:$0xf]  ;;  %v4952_v18 = vpop.permute.xlu2 %1760 }
 0x4f3   : > { %v1101_v26 = vadd.f32 %v1097_v61, %v1044_v60  ;;  %v1162_v60 = vld [vmem:[%s5585_s7] sm:$0xf] }
 0x4f5   : > { %v1103_v21 = vmax.f32 %v1101_v26, 0.0 }
 0x4f7   : > { %3859 = vmatmul.msk.f32.gmra.mxu1 %vm5685_vm5, %v1103_v21  ;;  %vm438_vm5 = vcmp.lt.s32.totalorder %v398_v46, %v417_v43  ;;  %v5688_v21 = vmov 1.0   ;;  %v3877_v46 = vld [vmem:[%s4432_s25 + $0x4] sm:$0xf] }
 0x4f8   : > { %3861 = vmatpush.msk.msrb.mxu3 %vm4850_vm1, %v5688_v21  ;;  %3866 = vmatpush.msk.msra.mxu0 %vm4857_vm15, %v5688_v21  ;;  %vm4864_vm4 = vmand %vm433_vm3, %vm438_vm5  ;;  %vm5695_vm3 = vcmp.eq.s32.totalorder %v4410_v4, %v4493_v16 }
 0x4f9   : > { %3872 = vmatpush.msk.msra.mxu1 %vm4864_vm4, %v5688_v21  ;;  %vm5698_vm5 = vmmov %vm5697_vm10  ;;  %v4954_v43 = vpop.permute.xlu2 %2127 }
 0x4fa   : > { %3886 = vmatpush.msk.msrb.mxu0 %vm5693_vm11, %v5688_v21  ;;  %vm5699_vm11 = vmmov %vm5698_vm5 }
 0x4fb   : > { %3896 = vmatpush.msk.msrb.mxu1 %vm5694_vm12, %v5688_v21  ;;  %vm5700_vm12 = vcmask 1045504  }
 0x4fc   : > { %3887 = vmatpush.msk.msrb.mxu0 %vm5695_vm3, %v5688_v21  ;;  %vm5701_vm3 = vcmp.eq.s32.totalorder %v4410_v4, %v4585_v33 }
 0x4fd   : > { %3897 = vmatpush.msk.msrb.mxu1 %vm5696_vm6, %v5688_v21  ;;  %vm5702_vm6 = vmmov %vm5698_vm5 }
 0x4fe   : > { %3888 = vmatpush.msk.msrb.mxu0 %vm4514_vm13, %v5688_v21 }
 0x4ff   : > { %3898 = vmatpush.msk.msrb.mxu1 %vm4468_vm7, %v5688_v21 }
 0x500   : > { %3889 = vmatpush.msk.msrb.mxu0 %vm4524_vm14, %v5688_v21 }
 0x501   : > { %3899 = vmatpush.msk.msrb.mxu1 %vm4478_vm8, %v5688_v21  ;;  %v4956_v44 = vpop.permute.xlu2 %2564 }
 0x56c   : > { %v1127_v26 = vpop.f32.mrf.mxu1 }
 0x56d   : > { %3862 = vmatmul.msk.f32.vlgmr.msrb.gmra.mxu3 %vm5697_vm10, %v1127_v26  ;;  %3867 = vmatmul.msk.f32.vlgmr.msra.gmra.mxu0 %vm5698_vm5, %v1127_v26  ;;  %vm5703_vm10 = vmmov %vm5698_vm5 }
 0x56e   : > { %3873 = vmatmul.msk.f32.vlgmr.msra.gmra.mxu1 %vm5699_vm11, %v1127_v26  ;;  %vm5704_vm11 = vcmask 261120  }
 0x56f   : > { %3906 = vmatpush.msk.msra.mxu1 %vm5700_vm12, %v4595_v36  ;;  %vm5705_vm12 = vmmov %vm5704_vm11 }
 0x571   : > { %3907 = vmatpush.msk.msra.mxu1 %vm5701_vm3, %v5688_v21  ;;  %vm5706_vm3 = vcmask 1046528  }
 0x573   : > { %3908 = vmatpush.msk.msra.mxu1 %vm4618_vm9, %v5688_v21 }
 0x574   : > { %v1130_v28 = vpop.f32.mrf.mxu1 }
 0x575   : > { %3863 = vmatmul.msk.f32.gmra.mxu3 %vm5702_vm6, %v1130_v28  ;;  %3868 = vmatmul.msk.f32.gmra.mxu0 %vm5703_vm10, %v1130_v28  ;;  %vm5707_vm6 = vmmov %vm5698_vm5 }
 0x576   : > { %3874 = vmatmul.msk.f32.gmra.mxu1 %vm5698_vm5, %v1130_v28  ;;  %vm5708_vm10 = vmmov %vm5698_vm5  ;;  %vm5709_vm5 = vcmp.eq.s32.totalorder %v4407_v3, %v4404_v2  ;;  %v4967_v28 = vpop.permute.xlu2 %3162 }
 0x577   : > { %3909 = vmatpush.msk.msra.mxu1 %vm4636_vm0, %v5688_v21  ;;  %5718 = vst [vmem:[#allocation11_spill] sm:$0xff] %v4967_v28 }
 0x57d   : > { %3890 = vmatmul.msk.f32.vlgmr.msrb.gmra.mxu0 %vm5704_vm11, %v3877_v46  ;;  %vm5710_vm11 = vcmp.eq.s32.totalorder %v4410_v4, %v4404_v2 }
 0x57e   : > { %3900 = vmatmul.msk.f32.vlgmr.msrb.gmra.mxu1 %vm5705_vm12, %v3877_v46  ;;  %vm5711_vm12 = vmmov %vm5707_vm6  ;;  %v5889_v14 = vld [vmem:[#allocation11_spill] sm:$0xff] }
 0x57f   : > { %3923 = vmatpush.msk.msrb.mxu1 %vm5706_vm3, %v4664_v58  ;;  %vm5712_vm3 = vnez %v5653_v8 }
 0x581   : > { %3924 = vmatpush.msk.msrb.mxu1 %vm4524_vm14, %v5688_v21 }
 0x5ea   : > { %v1209_v50 = vpop.f32.mrf.mxu0 }
 0x5eb   : > { %v1258_v5 = vpop.f32.mrf.mxu1 }
 0x5f0   : > { %v1156_v49 = vpop.f32.mrf.mxu3 }
 0x5f2   : > { %v1212_v61 = vpop.f32.mrf.mxu0 }
 0x5f3   : > { %v1261_v51 = vpop.f32.mrf.mxu1 }
 0x5f4   : > { %1283 = vmatpush.msra.mxu3 %v1261_v51 }
 0x5f6   : > { %1284 = vmatpush.msra.mxu3 %v1258_v5 }
 0x5f7   : > { %3876 = vmatmul.msk.f32.vlgmr.msra.gmra.mxu3 %vm5707_vm6, %v3875_v52  ;;  %vm5713_vm6 = vcmask 261120  }
 0x5f8   : > { %v1159_v56 = vpop.f32.mrf.mxu3 }
 0x5f9   : > { %1186 = vmatpush.msrb.mxu2 %v1159_v56 }
 0x5fa   : > { %v1380_v47 = vpop.f32.mrf.mxu0 }
 0x5fb   : > { %1187 = vmatpush.msrb.mxu2 %v1156_v49  ;;  %v1436_v26 = vpop.f32.mrf.mxu1 }
 0x5fc   : > { %3864 = vmatmul.msk.f32.vlgmr.msrb.gmra.mxu2 %vm5708_vm10, %v1162_v60  ;;  %vm5714_vm10 = vcmask 1043456  }
 0x5fd   : > { %1234 = vmatpush.msra.mxu2 %v1212_v61 }
 0x5ff   : > { %1235 = vmatpush.msra.mxu2 %v1209_v50 }
 0x601   : > { %3878 = vmatpush.msk.msrb.mxu2 %vm5709_vm5, %v5688_v21  ;;  %vm5715_vm5 = vcmask 31744  }
 0x603   : > { %3879 = vmatpush.msk.msrb.mxu2 %vm5710_vm11, %v5688_v21  ;;  %vm5716_vm11 = vcmask 1046528  }
 0x604   : > { %3870 = vmatmul.msk.f32.vlgmr.msra.gmra.mxu2 %vm5711_vm12, %v3869_v9  ;;  %vm5717_vm12 = vmmov %vm5714_vm10  ;;  %v1329_v9 = vpop.permute.xlu0 %1328 }
 0x605   : > { %3880 = vmatpush.msk.msrb.mxu2 %vm4425_vm2, %v5688_v21  ;;  %3903 = vmatpush.msk.msra.mxu0 %vm5717_vm12, %v1436_v26  ;;  %vm5732_vm2 = vcmask 121856  }
 0x606   : > { %vm5733_vm9 = vmmov %vm5732_vm2 }
 0x607   : > { %3881 = vmatpush.msk.msrb.mxu2 %vm5712_vm3, %v5688_v21 }
 0x609   : > { %3893 = vmatpush.msk.msra.mxu2 %vm5714_vm10, %v1380_v47  ;;  %vm5720_vm10 = vmmov %vm5715_vm5 }
 0x60a   : > { %3904 = vmatmul.msk.f32.vlgmr.msra.gmra.mxu0 %vm5720_vm10, %v4544_v24  ;;  %vm5722_vm10 = vcmask 1045504  }
 0x60c   : > { %3882 = vmatmul.msk.f32.vlgmr.msrb.gmra.mxu2 %vm5713_vm6, %v3877_v46  ;;  %vm5719_vm6 = vmmov %vm5715_vm5 }
 0x60d   : > { %3918 = vmatpush.msk.msrb.mxu2 %vm5716_vm11, %v4659_v57  ;;  %vm5631_vm11 = vcmask 257024  }
 0x60f   : > { %3919 = vmatpush.msk.msrb.mxu2 %vm5712_vm3, %v5688_v21  ;;  %vm5724_vm3 = vnez %v5667_v39 }
 0x612   : > { %3905 = vmatmul.msk.f32.gmra.mxu0 %vm5715_vm5, %v4562_v27 }
 0x614   : > { %3894 = vmatmul.msk.f32.vlgmr.msra.gmra.mxu2 %vm5715_vm5, %v4572_v30  ;;  %v1167_v30 = vpop.permute.xlu2 %1166 }
 0x61c   : > { %3895 = vmatmul.msk.f32.gmra.mxu2 %vm5719_vm6, %v4580_v32  ;;  %vm5721_vm6 = vmmov %vm5715_vm5  ;;  %vm5723_vm5 = vcmp.eq.s32.totalorder %v4410_v4, %v4588_v34 }
 0x67a   : > { %v1286_v50 = vpop.f32.mrf.mxu3 }
 0x67f   : > { %v1189_v46 = vpop.f32.mrf.mxu2 }
 0x680   : > { %v1190_v5 = vadd.f32 %v1189_v46, %v1167_v30 }
 0x687   : > { %v1237_v49 = vpop.f32.mrf.mxu2  ;;  %v1467_v32 = vpop.f32.mrf.mxu0 }
 0x688   : > { %v1240_v51 = vadd.f32 %v1237_v49, %v1190_v5 }
 0x68a   : > { %v1289_v52 = vadd.f32 %v1286_v50, %v1240_v51 }
 0x68c   : > { %1291 = vst.msk [vmem:[%s4978_s27] sm:$0xf] %vm5631_vm11, %v1289_v52  ;;  %vm5725_vm11 = vnez %v5672_v41  ;;  %v3352_v41 = vld [vmem:[%s5583_s5] sm:$0xff] }
 0x68f   : > { %v1314_v24 = vpop.f32.mrf.mxu2  ;;  %v1470_v5 = vpop.f32.mrf.mxu0 }
 0x690   : > { %3883 = vmatpush.msk.msrb.mxu3 %vm5717_vm12, %v1314_v24  ;;  %vm5726_vm12 = vmmov %vm5721_vm6 }
 0x691   : > { %3884 = vmatmul.msk.f32.vlgmr.msrb.gmra.mxu3 %vm5721_vm6, %v4549_v25  ;;  %vm5727_vm6 = vcmask 244736  }
 0x692   : > { %3912 = vmatpush.msk.msra.mxu3 %vm5722_vm10, %v4598_v37  ;;  %vm5728_vm10 = vmmov %vm5727_vm6 }
 0x694   : > { %3913 = vmatpush.msk.msra.mxu3 %vm5723_vm5, %v5688_v21  ;;  %vm5729_vm5 = vcmask 1045504  }
 0x696   : > { %3914 = vmatpush.msk.msra.mxu3 %vm5724_vm3, %v5688_v21  ;;  %vm5731_vm3 = vmmov %vm5727_vm6 }
 0x697   : > { %v1411_v25 = vpop.f32.mrf.mxu2 }
 0x698   : > { %3915 = vmatpush.msk.msra.mxu3 %vm5725_vm11, %v5688_v21 }
 0x699   : > { %3885 = vmatmul.msk.f32.gmra.mxu3 %vm5726_vm12, %v4498_v17  ;;  %vm5730_vm12 = vmmov %vm5727_vm6 }
 0x69f   : > { %v1414_v46 = vpop.f32.mrf.mxu2 }
 0x714   : > { %v1357_v27 = vpop.f32.mrf.mxu3 }
 0x715   : > { %v1358_v56 = vadd.f32 %v1357_v27, %v1324_v11 }
 0x717   : > { %v1417_v60 = vadd.f32 %v1411_v25, %v1358_v56 }
 0x719   : > { %v1473_v61 = vadd.f32 %v1467_v32, %v1417_v60 }
 0x71b   : > { %v1475_v47 = vmax.f32 %v1473_v61, 0.0 }
 0x71c   : > { %v1360_v26 = vpop.f32.mrf.mxu3 }
 0x71d   : > { %v1361_v30 = vadd.f32 %v1360_v26, %v1329_v9  ;;  %3910 = vmatmul.msk.f32.vlgmr.msra.gmra.mxu1 %vm5727_vm6, %v1475_v47  ;;  %3916 = vmatmul.msk.f32.vlgmr.msra.gmra.mxu3 %vm5728_vm10, %v1475_v47  ;;  %vm5734_vm6 = vmmov %vm5729_vm5 }
 0x71e   : > { %3941 = vmatpush.msk.msra.mxu1 %vm5729_vm5, %v4743_v53  ;;  %vm5735_vm10 = vmmov %vm5732_vm2 }
 0x71f   : > { %v1418_v17 = vadd.f32 %v1414_v46, %v1361_v30  ;;  %vm5736_vm5 = vmmov %vm5732_vm2  ;;  %v1565_v46 = vpop.permute.xlu1 %1564 }
 0x721   : > { %v1474_v49 = vadd.f32 %v1470_v5, %v1418_v17 }
 0x723   : > { %v1476_v50 = vmax.f32 %v1474_v49, 0.0 }
 0x725   : > { %3911 = vmatmul.msk.f32.gmra.mxu1 %vm5730_vm12, %v1476_v50  ;;  %3917 = vmatmul.msk.f32.gmra.mxu3 %vm5731_vm3, %v1476_v50  ;;  %vm5737_vm3 = vcmask 130048   ;;  %vm5740_vm12 = vcmask 1046528  }
 0x79a   : > { %v1500_v11 = vpop.f32.mrf.mxu1 }
 0x7a0   : > { %v1523_v51 = vpop.f32.mrf.mxu3 }
 0x7a1   : > { %v1529_v52 = vmax.f32 %v1500_v11, %v1523_v51 }
 0x7a2   : > { %v1503_v24 = vpop.f32.mrf.mxu1 }
 0x7a3   : > { %3920 = vmatmul.msk.f32.vlgmr.msrb.gmra.mxu2 %vm5732_vm2, %v1529_v52  ;;  %3925 = vmatmul.msk.f32.vlgmr.msrb.gmra.mxu1 %vm5733_vm9, %v1529_v52  ;;  %vm5738_vm2 = vcmask 1044480   ;;  %vm5739_vm9 = vmmov %vm5737_vm3 }
 0x7a4   : > { %3951 = vmatpush.msk.msrb.mxu1 %vm5734_vm6, %v4755_v55 }
 0x7a8   : > { %v1526_v25 = vpop.f32.mrf.mxu3 }
 0x7a9   : > { %v1530_v27 = vmax.f32 %v1503_v24, %v1526_v25 }
 0x7ab   : > { %3921 = vmatmul.msk.f32.gmra.mxu2 %vm5735_vm10, %v1530_v27  ;;  %3926 = vmatmul.msk.f32.gmra.mxu1 %vm5736_vm5, %v1530_v27  ;;  %vm5741_vm10 = vmmov %vm5736_vm5 }
 0x820   : > { %v1607_v32 = vpop.f32.mrf.mxu1 }
 0x826   : > { %v1554_v56 = vpop.f32.mrf.mxu2 }
 0x828   : > { %v1610_v60 = vpop.f32.mrf.mxu1 }
 0x829   : > { %1631 = vmatpush.msrb.mxu3 %v1610_v60  ;;  %v5756_v60 = vld [vmem:[#allocation10_spill] sm:$0xff] }
 0x82b   : > { %1632 = vmatpush.msrb.mxu3 %v1607_v32 }
 0x82c   : > { %3928 = vmatmul.msk.f32.vlgmr.msrb.gmra.mxu3 %vm5737_vm3, %v4703_v23 }
 0x82d   : > { %3935 = vmatpush.msk.msra.mxu3 %vm5738_vm2, %v4719_v31 }
 0x82e   : > { %v1557_v61 = vpop.f32.mrf.mxu2 }
 0x82f   : > { %1584 = vmatpush.msrb.mxu0 %v1557_v61  ;;  %3936 = vmatpush.msk.msra.mxu3 %vm4636_vm0, %v5688_v21  ;;  %v5760_v61 = vld [vmem:[#allocation9_spill] sm:$0xff] }
 0x831   : > { %1585 = vmatpush.msrb.mxu0 %v1554_v56  ;;  %v5754_v56 = vld [vmem:[#allocation8_spill] sm:$0xff] }
 0x832   : > { %3922 = vmatmul.msk.f32.vlgmr.msrb.gmra.mxu0 %vm5739_vm9, %v4698_v22  ;;  %vm5742_vm9 = vcmask 105472  }
 0x833   : > { %3929 = vmatpush.msk.msra.mxu0 %vm5740_vm12, %v4679_v59  ;;  %vm5743_vm12 = vmmov %vm5742_vm9 }
 0x835   : > { %3930 = vmatpush.msk.msra.mxu0 %vm4478_vm8, %v5688_v21 }
 0x837   : > { %3945 = vmatpush.msk.msrb.mxu0 %vm5734_vm6, %v4746_v54  ;;  %vm5744_vm6 = vcmask 48128  }
 0x83a   : > { %3931 = vmatmul.msk.f32.vlgmr.msra.gmra.mxu0 %vm5741_vm10, %v1529_v52  ;;  %vm5745_vm10 = vmmov %vm5744_vm6 }
 0x842   : > { %3932 = vmatmul.msk.f32.gmra.mxu0 %vm5736_vm5, %v1530_v27  ;;  %vm5746_vm5 = vnez %v5676_v45 }
 0x8af   : > { %v1587_v9 = vpop.f32.mrf.mxu0  ;;  %v1634_v5 = vpop.f32.mrf.mxu3 }
 0x8b0   : > { %v1588_v30 = vadd.f32 %v1587_v9, %v1565_v46 }
 0x8b2   : > { %v1637_v17 = vadd.f32 %v1634_v5, %v1588_v30 }
 0x8b7   : > { %v1655_v47 = vpop.f32.mrf.mxu0 }
 0x8bf   : > { %v1658_v26 = vpop.f32.mrf.mxu0 }
 0x8c0   : > { %1679 = vmatpush.msra.mxu2 %v1658_v26 }
 0x8c2   : > { %1680 = vmatpush.msra.mxu2 %v1655_v47 }
 0x8c3   : > { %3934 = vmatmul.msk.f32.vlgmr.msra.gmra.mxu2 %vm5737_vm3, %v4712_v29  ;;  %vm5747_vm3 = vmmov %vm5744_vm6 }
 0x8c4   : > { %3938 = vmatpush.msk.msrb.mxu2 %vm5738_vm2, %v4724_v42  ;;  %vm5748_vm2 = vnez %v5678_v62  ;;  %v3353_v62 = vld [vmem:[%s5583_s5 + $0x8] sm:$0xff] }
 0x8c6   : > { %3939 = vmatpush.msk.msrb.mxu2 %vm5725_vm11, %v5688_v21 }
 0x946   : > { %v1682_v49 = vpop.f32.mrf.mxu2 }
 0x947   : > { %v1685_v50 = vadd.f32 %v1682_v49, %v1637_v17  ;;  %v1766_v17 = vpop.permute.xlu0 %1765 }
 0x949   : > { %v1686_v11 = vmax.f32 %v1685_v50, 0.0 }
 0x94b   : > { %3937 = vmatmul.msk.f32.vlgmr.msra.gmra.mxu3 %vm5742_vm9, %v1686_v11  ;;  %3940 = vmatmul.msk.f32.vlgmr.msrb.gmra.mxu2 %vm5743_vm12, %v1686_v11  ;;  %vm5749_vm9 = vcmask 64512  }
 0x94c   : > { %vm5750_vm12 = vmmov %vm5749_vm9 }
 0x9ce   : > { %v1707_v51 = vpop.f32.mrf.mxu3  ;;  %v1727_v52 = vpop.f32.mrf.mxu2 }
 0x9cf   : > { %v1730_v24 = vmax.f32 %v1707_v51, %v1727_v52 }
 0x9d1   : > { %3942 = vmatmul.msk.f32.vlgmr.msra.gmra.mxu1 %vm5744_vm6, %v1730_v24  ;;  %3946 = vmatmul.msk.f32.vlgmr.msrb.gmra.mxu0 %vm5745_vm10, %v1730_v24  ;;  %vm5751_vm6 = vnez %v5680_v35  ;;  %vm5752_vm10 = vmmov %vm5749_vm9  ;;  %v4156_v35 = vld [vmem:[%s5583_s5 + $0x28] sm:$0xff] }
 0x9d2   : > { %3957 = vmatpush.msk.msra.mxu1 %vm5746_vm5, %v5688_v21 }
 0x9d9   : > { %3952 = vmatmul.msk.f32.vlgmr.msrb.gmra.mxu1 %vm5747_vm3, %v1730_v24  ;;  %vm5753_vm3 = vmmov %vm5749_vm9 }
 0x9da   : > { %3971 = vmatpush.msk.msrb.mxu1 %vm5748_vm2, %v5688_v21 }
 0x9dc   : > { %3972 = vmatpush.msk.msrb.mxu1 %vm4864_vm4, %v5688_v21 }
 0xa4e   : > { %v1751_v25 = vpop.f32.mrf.mxu1  ;;  %v1814_v27 = vpop.f32.mrf.mxu0 }
 0xa4f   : > { %1789 = vmatpush.msrb.mxu3 %v1751_v25  ;;  %1840 = vmatpush.msra.mxu2 %v1814_v27 }
 0xa50   : > { %3943 = vmatmul.msk.f32.vlgmr.msrb.gmra.mxu3 %vm5749_vm9, %v4771_v63  ;;  %3949 = vmatmul.msk.f32.vlgmr.msra.gmra.mxu2 %vm5750_vm12, %v4776_v0  ;;  %vm5755_vm9 = vmmov %vm5753_vm3  ;;  %vm5757_vm12 = vnez %v5756_v60 }
 0xa51   : > { %3960 = vmatpush.msk.msra.mxu3 %vm5751_vm6, %v5688_v21 }
 0xa53   : > { %3961 = vmatpush.msk.msra.mxu3 %vm4850_vm1, %v5688_v21  ;;  %vm5758_vm1 = vcmp.eq.s32.totalorder %v4407_v3, %v4493_v16 }
 0xa56   : > { %v1867_v32 = vpop.f32.mrf.mxu1 }
 0xa57   : > { %1893 = vmatpush.msra.mxu0 %v1867_v32 }
 0xa58   : > { %3944 = vmatmul.msk.f32.gmra.mxu3 %vm5752_vm10, %v4785_v12  ;;  %3950 = vmatmul.msk.f32.gmra.mxu2 %vm5753_vm3, %v4790_v15  ;;  %vm5759_vm10 = vcmp.eq.s32.totalorder %v4410_v4, %v4493_v16 }
 0xa59   : > { %3955 = vmatmul.msk.f32.vlgmr.msra.gmra.mxu0 %vm5755_vm9, %v5754_v56  ;;  %vm5762_vm9 = vcmp.eq.s32.totalorder %v4407_v3, %v4453_v10 }
 0xa5a   : > { %3965 = vmatpush.msk.msrb.mxu0 %vm5757_vm12, %v5688_v21 }
 0xa5c   : > { %3966 = vmatpush.msk.msrb.mxu0 %vm4857_vm15, %v5688_v21  ;;  %vm5770_vm15 = vnez %v5665_v38 }
 0xa5e   : > { %3987 = vmatpush.msk.msra.mxu0 %vm5758_vm1, %v5688_v21  ;;  %vm5761_vm1 = vmmov %vm5753_vm3 }
 0xa60   : > { %3988 = vmatpush.msk.msra.mxu0 %vm5759_vm10, %v5688_v21  ;;  %vm5763_vm10 = vcmp.eq.s32.totalorder %v4410_v4, %v4453_v10 }
 0xa61   : > { %3956 = vmatmul.msk.f32.gmra.mxu0 %vm5753_vm3, %v5760_v61  ;;  %vm5764_vm3 = vmmov %vm5761_vm1 }
 0xa62   : > { %3989 = vmatpush.msk.msra.mxu0 %vm4514_vm13, %v5688_v21 }
 0xa64   : > { %3990 = vmatpush.msk.msra.mxu0 %vm4524_vm14, %v5688_v21 }
 0xad3   : > { %v1791_v9 = vpop.f32.mrf.mxu3  ;;  %v1842_v47 = vpop.f32.mrf.mxu2 }
 0xad4   : > { %v1792_v26 = vadd.f32 %v1791_v9, %v4952_v18  ;;  %v3978_v9 = vld [vmem:[%s4432_s25 + $0x8] sm:$0xf] }
 0xad6   : > { %v1848_v46 = vadd.f32 %v1842_v47, %v1792_v26  ;;  %v1895_v30 = vpop.f32.mrf.mxu0 }
 0xad8   : > { %v1901_v5 = vadd.f32 %v1895_v30, %v1848_v46 }
 0xada   : > { %v1903_v49 = vmax.f32 %v1901_v5, 0.0  ;;  %v3975_v5 = vld [vmem:[%s5585_s7 + $0x8] sm:$0xf] }
 0xadb   : > { %v1794_v50 = vpop.f32.mrf.mxu3  ;;  %v1845_v11 = vpop.f32.mrf.mxu2 }
 0xadc   : > { %v1795_v51 = vadd.f32 %v1794_v50, %v1766_v17  ;;  %3958 = vmatmul.msk.f32.vlgmr.msra.gmra.mxu1 %vm5761_vm1, %v1903_v49  ;;  %vm5765_vm1 = vcmask 130048   ;;  %v1963_v49 = vld [vmem:[%s5585_s7] sm:$0xf] }
 0xadd   : > { %3997 = vmatpush.msk.msra.mxu1 %vm5762_vm9, %v5688_v21  ;;  %vm5766_vm9 = vmmov %vm5765_vm1 }
 0xade   : > { %v1849_v52 = vadd.f32 %v1845_v11, %v1795_v51  ;;  %v1898_v24 = vpop.f32.mrf.mxu0  ;;  %vm5767_vm13 = vmmov %vm5765_vm1  ;;  %v3969_v11 = vld [vmem:[%s5585_s7 + $0x4] sm:$0xf]  ;;  %v5158_v51 = vpop.permute.xlu0 %2363 }
 0xadf   : > { %3998 = vmatpush.msk.msra.mxu1 %vm5763_vm10, %v5688_v21  ;;  %vm5768_vm10 = vcmask 1045504  }
 0xae0   : > { %v1902_v18 = vadd.f32 %v1898_v24, %v1849_v52 }
 0xae1   : > { %3999 = vmatpush.msk.msra.mxu1 %vm4468_vm7, %v5688_v21  ;;  %vm5769_vm7 = vcmp.eq.s32.totalorder %v4410_v4, %v4585_v33 }
 0xae2   : > { %v1904_v25 = vmax.f32 %v1902_v18, 0.0  ;;  %v5165_v18 = vld [vmem:[%s5579_s1 + $0x10] sm:$0xff] }
 0xae3   : > { %4000 = vmatpush.msk.msra.mxu1 %vm4478_vm8, %v5688_v21 }
 0xae4   : > { %3959 = vmatmul.msk.f32.gmra.mxu1 %vm5764_vm3, %v1904_v25  ;;  %vm5771_vm3 = vmmov %vm5765_vm1 }
 0xae6   : > { %v5160_v52 = vpop.permute.xlu0 %2921 }
 0xae7   : > { %5783 = vst [vmem:[#allocation8_spill] sm:$0xff] %v5160_v52 }
 0xb59   : > { %v1928_v27 = vpop.f32.mrf.mxu1 }
 0xb5a   : > { %3962 = vmatmul.msk.f32.vlgmr.msra.gmra.mxu3 %vm5765_vm1, %v1928_v27  ;;  %3967 = vmatmul.msk.f32.vlgmr.msrb.gmra.mxu0 %vm5766_vm9, %v1928_v27  ;;  %vm5772_vm9 = vmmov %vm5765_vm1 }
 0xb5b   : > { %3973 = vmatmul.msk.f32.vlgmr.msrb.gmra.mxu1 %vm5767_vm13, %v1928_v27  ;;  %vm5773_vm13 = vcmask 261120   ;;  %v5178_v27 = vld [vmem:[%s5579_s1 + $0x18] sm:$0xff] }
 0xb5c   : > { %4007 = vmatpush.msk.msrb.mxu1 %vm5768_vm10, %v4595_v36  ;;  %vm5774_vm10 = vmmov %vm5773_vm13 }
 0xb5e   : > { %4008 = vmatpush.msk.msrb.mxu1 %vm5769_vm7, %v5688_v21  ;;  %vm5775_vm7 = vcmask 1046528  }
 0xb60   : > { %4009 = vmatpush.msk.msrb.mxu1 %vm5770_vm15, %v5688_v21 }
 0xb61   : > { %v1931_v32 = vpop.f32.mrf.mxu1 }
 0xb62   : > { %3963 = vmatmul.msk.f32.gmra.mxu3 %vm5771_vm3, %v1931_v32  ;;  %3968 = vmatmul.msk.f32.gmra.mxu0 %vm5765_vm1, %v1931_v32  ;;  %vm5776_vm3 = vmmov %vm5765_vm1 }
 0xb63   : > { %3974 = vmatmul.msk.f32.gmra.mxu1 %vm5772_vm9, %v1931_v32  ;;  %vm5777_vm9 = vcmp.eq.s32.totalorder %v4407_v3, %v4404_v2  ;;  %v5183_v32 = vld [vmem:[%s5579_s1 + $0x20] sm:$0xff] }
 0xb64   : > { %4010 = vmatpush.msk.msrb.mxu1 %vm4636_vm0, %v5688_v21 }
 0xb6a   : > { %3991 = vmatmul.msk.f32.vlgmr.msra.gmra.mxu0 %vm5773_vm13, %v3978_v9  ;;  %vm5778_vm13 = vcmp.eq.s32.totalorder %v4410_v4, %v4404_v2 }
 0xb6b   : > { %4001 = vmatmul.msk.f32.vlgmr.msra.gmra.mxu1 %vm5774_vm10, %v3978_v9  ;;  %vm5779_vm10 = vmmov %vm5765_vm1 }
 0xb6c   : > { %4024 = vmatpush.msk.msra.mxu1 %vm5775_vm7, %v4664_v58  ;;  %vm5780_vm7 = vnez %v5651_v7 }
 0xb6e   : > { %4025 = vmatpush.msk.msra.mxu1 %vm4524_vm14, %v5688_v21 }
 0xbd7   : > { %v2010_v46 = vpop.f32.mrf.mxu0 }
 0xbd8   : > { %v2058_v47 = vpop.f32.mrf.mxu1 }
 0xbdd   : > { %v1957_v26 = vpop.f32.mrf.mxu3 }
 0xbdf   : > { %v2013_v50 = vpop.f32.mrf.mxu0 }
 0xbe0   : > { %v2061_v30 = vpop.f32.mrf.mxu1 }
 0xbe1   : > { %2082 = vmatpush.msrb.mxu3 %v2061_v30 }
 0xbe3   : > { %2083 = vmatpush.msrb.mxu3 %v2058_v47 }
 0xbe4   : > { %3976 = vmatmul.msk.f32.vlgmr.msrb.gmra.mxu3 %vm5776_vm3, %v3975_v5  ;;  %vm5781_vm3 = vnez %v5653_v8 }
 0xbe5   : > { %v1960_v17 = vpop.f32.mrf.mxu3 }
 0xbe6   : > { %1987 = vmatpush.msrb.mxu2 %v1960_v17 }
 0xbe7   : > { %v2179_v24 = vpop.f32.mrf.mxu0 }
 0xbe8   : > { %1988 = vmatpush.msrb.mxu2 %v1957_v26  ;;  %v2235_v25 = vpop.f32.mrf.mxu1  ;;  %v5195_v26 = vld [vmem:[%s5579_s1 + $0x28] sm:$0xff] }
 0xbe9   : > { %3964 = vmatmul.msk.f32.vlgmr.msrb.gmra.mxu2 %vm5765_vm1, %v1963_v49  ;;  %vm5782_vm1 = vcmask 261120  }
 0xbea   : > { %2034 = vmatpush.msra.mxu2 %v2013_v50 }
 0xbec   : > { %2035 = vmatpush.msra.mxu2 %v2010_v46 }
 0xbee   : > { %3979 = vmatpush.msk.msrb.mxu2 %vm5777_vm9, %v5688_v21  ;;  %vm5784_vm9 = vcmask 1043456  }
 0xbf0   : > { %3980 = vmatpush.msk.msrb.mxu2 %vm5778_vm13, %v5688_v21  ;;  %vm5785_vm13 = vcmask 31744  }
 0xbf1   : > { %3970 = vmatmul.msk.f32.vlgmr.msra.gmra.mxu2 %vm5779_vm10, %v3969_v11  ;;  %vm5786_vm10 = vcmask 1046528   ;;  %v5204_v11 = vld [vmem:[%s5579_s1] sm:$0xff] }
 0xbf2   : > { %3981 = vmatpush.msk.msrb.mxu2 %vm5780_vm7, %v5688_v21  ;;  %vm5804_vm7 = vcmask 121856  }
 0xbf3   : > { %vm5805_vm15 = vmmov %vm5804_vm7 }
 0xbf4   : > { %3982 = vmatpush.msk.msrb.mxu2 %vm5781_vm3, %v5688_v21 }
 0xbf6   : > { %3994 = vmatpush.msk.msra.mxu2 %vm5784_vm9, %v2179_v24 }
 0xbf9   : > { %3983 = vmatmul.msk.f32.vlgmr.msrb.gmra.mxu2 %vm5782_vm1, %v3978_v9  ;;  %vm5787_vm1 = vmmov %vm5784_vm9  ;;  %v5186_v9 = vpop.permute.xlu0 %3358 }
 0xbfa   : > { %4019 = vmatpush.msk.msrb.mxu2 %vm5786_vm10, %v4659_v57  ;;  %4004 = vmatpush.msk.msrb.mxu0 %vm5787_vm1, %v2235_v25  ;;  %5788 = vst [vmem:[#allocation10_spill] sm:$0xff] %v5186_v9  ;;  %vm5789_vm9 = vmmov %vm5785_vm13  ;;  %vm5792_vm1 = vcmask 257024   ;;  %v5218_v25 = vld [vmem:[%s5579_s1 + $0x8] sm:$0xff] }
 0xbfb   : > { %vm5791_vm10 = vmmov %vm5789_vm9  ;;  %5797 = vst [vmem:[#allocation9_spill] sm:$0xff] %v5218_v25 }
 0xbfc   : > { %4020 = vmatpush.msk.msrb.mxu2 %vm5781_vm3, %v5688_v21  ;;  %vm5796_vm3 = vcmp.eq.s32.totalorder %v4410_v4, %v4588_v34 }
 0xc01   : > { %3995 = vmatmul.msk.f32.vlgmr.msra.gmra.mxu2 %vm5785_vm13, %v5165_v18  ;;  %vm5790_vm13 = vmmov %vm5789_vm9  ;;  %v1968_v46 = vpop.permute.xlu0 %1967 }
 0xc02   : > { %4005 = vmatmul.msk.f32.vlgmr.msrb.gmra.mxu0 %vm5790_vm13, %v5183_v32  ;;  %vm5794_vm13 = vmmov %vm5791_vm10 }
 0xc09   : > { %3996 = vmatmul.msk.f32.gmra.mxu2 %vm5789_vm9, %v5178_v27  ;;  %vm5793_vm9 = vcmask 1043456  }
 0xc0a   : > { %4006 = vmatmul.msk.f32.gmra.mxu0 %vm5791_vm10, %v5195_v26  ;;  %vm5795_vm10 = vcmask 1045504  }
 0xc67   : > { %v2085_v17 = vpop.f32.mrf.mxu3 }
 0xc6c   : > { %v1990_v47 = vpop.f32.mrf.mxu2 }
 0xc6d   : > { %v1991_v30 = vadd.f32 %v1990_v47, %v1968_v46  ;;  %v2123_v46 = vpop.permute.xlu1 %2122 }
 0xc74   : > { %v2037_v5 = vpop.f32.mrf.mxu2 }
 0xc75   : > { %v2040_v49 = vadd.f32 %v2037_v5, %v1991_v30 }
 0xc77   : > { %v2088_v50 = vadd.f32 %v2085_v17, %v2040_v49 }
 0xc79   : > { %3977 = vst.msk [vmem:[%s4978_s27 + $0x4] sm:$0xf] %vm5792_vm1, %v2088_v50  ;;  %vm5798_vm1 = vnez %v5667_v39 }
 0xc7c   : > { %v2113_v24 = vpop.f32.mrf.mxu2 }
 0xc7d   : > { %3984 = vmatpush.msk.msra.mxu3 %vm5793_vm9, %v2113_v24  ;;  %vm5799_vm9 = vmmov %vm5794_vm13 }
 0xc7e   : > { %3985 = vmatmul.msk.f32.vlgmr.msra.gmra.mxu3 %vm5794_vm13, %v5204_v11 }
 0xc7f   : > { %4013 = vmatpush.msk.msrb.mxu3 %vm5795_vm10, %v4598_v37  ;;  %v2266_v5 = vpop.f32.mrf.mxu0 }
 0xc81   : > { %4014 = vmatpush.msk.msrb.mxu3 %vm5796_vm3, %v5688_v21  ;;  %vm5800_vm3 = vcmask 244736  }
 0xc82   : > { %vm5801_vm13 = vmmov %vm5800_vm3 }
 0xc83   : > { %4015 = vmatpush.msk.msrb.mxu3 %vm5798_vm1, %v5688_v21  ;;  %vm5803_vm1 = vmmov %vm5800_vm3 }
 0xc84   : > { %v2210_v47 = vpop.f32.mrf.mxu2 }
 0xc85   : > { %4016 = vmatpush.msk.msrb.mxu3 %vm5725_vm11, %v5688_v21 }
 0xc86   : > { %3986 = vmatmul.msk.f32.gmra.mxu3 %vm5799_vm9, %v5218_v25  ;;  %vm5802_vm9 = vmmov %vm5800_vm3 }
 0xc87   : > { %v2269_v39 = vpop.f32.mrf.mxu0 }
 0xc8c   : > { %v2213_v28 = vpop.f32.mrf.mxu2 }
 0xd01   : > { %v2156_v30 = vpop.f32.mrf.mxu3 }
 0xd02   : > { %v2157_v17 = vadd.f32 %v2156_v30, %v2123_v46 }
 0xd04   : > { %v2216_v49 = vadd.f32 %v2210_v47, %v2157_v17 }
 0xd06   : > { %v2272_v50 = vadd.f32 %v2266_v5, %v2216_v49 }
 0xd08   : > { %v2274_v24 = vmax.f32 %v2272_v50, 0.0 }
 0xd09   : > { %v2159_v9 = vpop.f32.mrf.mxu3 }
 0xd0a   : > { %v2160_v52 = vadd.f32 %v2159_v9, %v4954_v43  ;;  %4011 = vmatmul.msk.f32.vlgmr.msrb.gmra.mxu1 %vm5800_vm3, %v2274_v24  ;;  %4017 = vmatmul.msk.f32.vlgmr.msrb.gmra.mxu3 %vm5801_vm13, %v2274_v24  ;;  %vm5806_vm3 = vmmov %vm5795_vm10 }
 0xd0b   : > { %4042 = vmatpush.msk.msrb.mxu1 %vm5795_vm10, %v4743_v53  ;;  %vm5807_vm13 = vmmov %vm5804_vm7 }
 0xd0c   : > { %v2217_v25 = vadd.f32 %v2213_v28, %v2160_v52  ;;  %vm5808_vm10 = vmmov %vm5804_vm7 }
 0xd0e   : > { %v2273_v34 = vadd.f32 %v2269_v39, %v2217_v25 }
 0xd10   : > { %v2275_v37 = vmax.f32 %v2273_v34, 0.0 }
 0xd12   : > { %4012 = vmatmul.msk.f32.gmra.mxu1 %vm5802_vm9, %v2275_v37  ;;  %4018 = vmatmul.msk.f32.gmra.mxu3 %vm5803_vm1, %v2275_v37  ;;  %vm5809_vm1 = vcmask 130048   ;;  %vm5812_vm9 = vcmask 1046528  }
 0xd87   : > { %v2299_v47 = vpop.f32.mrf.mxu1 }
 0xd8d   : > { %v2322_v46 = vpop.f32.mrf.mxu3 }
 0xd8e   : > { %v2328_v30 = vmax.f32 %v2299_v47, %v2322_v46 }
 0xd8f   : > { %v2302_v43 = vpop.f32.mrf.mxu1 }
 0xd90   : > { %4021 = vmatmul.msk.f32.vlgmr.msrb.gmra.mxu2 %vm5804_vm7, %v2328_v30  ;;  %4026 = vmatmul.msk.f32.vlgmr.msra.gmra.mxu1 %vm5805_vm15, %v2328_v30  ;;  %vm5810_vm15 = vcmask 1044480   ;;  %vm5811_vm7 = vmmov %vm5809_vm1 }
 0xd91   : > { %4052 = vmatpush.msk.msra.mxu1 %vm5806_vm3, %v4755_v55 }
 0xd95   : > { %v2325_v9 = vpop.f32.mrf.mxu3 }
 0xd96   : > { %v2329_v5 = vmax.f32 %v2302_v43, %v2325_v9 }
 0xd98   : > { %4022 = vmatmul.msk.f32.gmra.mxu2 %vm5807_vm13, %v2329_v5  ;;  %4027 = vmatmul.msk.f32.gmra.mxu1 %vm5808_vm10, %v2329_v5  ;;  %vm5813_vm13 = vmmov %vm5808_vm10 }
 0xe0d   : > { %v2406_v34 = vpop.f32.mrf.mxu1 }
 0xe13   : > { %v2353_v39 = vpop.f32.mrf.mxu2 }
 0xe15   : > { %v2409_v37 = vpop.f32.mrf.mxu1 }
 0xe16   : > { %2430 = vmatpush.msra.mxu3 %v2409_v37 }
 0xe18   : > { %2431 = vmatpush.msra.mxu3 %v2406_v34 }
 0xe19   : > { %4029 = vmatmul.msk.f32.vlgmr.msra.gmra.mxu3 %vm5809_vm1, %v4703_v23 }
 0xe1a   : > { %4036 = vmatpush.msk.msrb.mxu3 %vm5810_vm15, %v4719_v31 }
 0xe1b   : > { %v2356_v28 = vpop.f32.mrf.mxu2 }
 0xe1c   : > { %2383 = vmatpush.msra.mxu0 %v2356_v28  ;;  %4037 = vmatpush.msk.msrb.mxu3 %vm4636_vm0, %v5688_v21 }
 0xe1e   : > { %2384 = vmatpush.msra.mxu0 %v2353_v39 }
 0xe1f   : > { %4023 = vmatmul.msk.f32.vlgmr.msra.gmra.mxu0 %vm5811_vm7, %v4698_v22  ;;  %vm5814_vm7 = vcmask 105472  }
 0xe20   : > { %4030 = vmatpush.msk.msrb.mxu0 %vm5812_vm9, %v4679_v59  ;;  %vm5815_vm9 = vmmov %vm5814_vm7 }
 0xe22   : > { %4031 = vmatpush.msk.msrb.mxu0 %vm4478_vm8, %v5688_v21 }
 0xe24   : > { %4046 = vmatpush.msk.msra.mxu0 %vm5806_vm3, %v4746_v54  ;;  %vm5816_vm3 = vcmask 48128  }
 0xe27   : > { %4032 = vmatmul.msk.f32.vlgmr.msrb.gmra.mxu0 %vm5813_vm13, %v2328_v30  ;;  %vm5817_vm13 = vmmov %vm5816_vm3 }
 0xe2f   : > { %4033 = vmatmul.msk.f32.gmra.mxu0 %vm5808_vm10, %v2329_v5  ;;  %vm5818_vm10 = vmmov %vm5816_vm3 }
 0xe9c   : > { %v2386_v23 = vpop.f32.mrf.mxu0  ;;  %v2433_v17 = vpop.f32.mrf.mxu3 }
 0xe9d   : > { %v2387_v22 = vadd.f32 %v2386_v23, %v5158_v51 }
 0xe9f   : > { %v2436_v49 = vadd.f32 %v2433_v17, %v2387_v22  ;;  %v4076_v22 = vld [vmem:[%s5585_s7 + $0x8] sm:$0xf] }
 0xea4   : > { %v2454_v52 = vpop.f32.mrf.mxu0 }
 0xeac   : > { %v2457_v25 = vpop.f32.mrf.mxu0 }
 0xead   : > { %2478 = vmatpush.msra.mxu2 %v2457_v25 }
 0xeaf   : > { %2479 = vmatpush.msra.mxu2 %v2454_v52 }
 0xeb0   : > { %4035 = vmatmul.msk.f32.vlgmr.msra.gmra.mxu2 %vm5809_vm1, %v4712_v29  ;;  %vm5819_vm1 = vcmask 64512  }
 0xeb1   : > { %4039 = vmatpush.msk.msrb.mxu2 %vm5810_vm15, %v4724_v42  ;;  %vm5820_vm15 = vmmov %vm5819_vm1 }
 0xeb3   : > { %4040 = vmatpush.msk.msrb.mxu2 %vm5725_vm11, %v5688_v21 }
 0xf33   : > { %v2481_v50 = vpop.f32.mrf.mxu2 }
 0xf34   : > { %v2484_v24 = vadd.f32 %v2481_v50, %v2436_v49  ;;  %v4070_v49 = vld [vmem:[%s5585_s7 + $0x4] sm:$0xf] }
 0xf36   : > { %v2485_v47 = vmax.f32 %v2484_v24, 0.0 }
 0xf38   : > { %4038 = vmatmul.msk.f32.vlgmr.msrb.gmra.mxu3 %vm5814_vm7, %v2485_v47  ;;  %4041 = vmatmul.msk.f32.vlgmr.msrb.gmra.mxu2 %vm5815_vm9, %v2485_v47  ;;  %vm5821_vm7 = vnez %v5687_v48  ;;  %vm5822_vm9 = vmmov %vm5819_vm1 }
 0xfbb   : > { %v2506_v46 = vpop.f32.mrf.mxu3  ;;  %v2526_v29 = vpop.f32.mrf.mxu2 }
 0xfbc   : > { %v2529_v30 = vmax.f32 %v2506_v46, %v2526_v29 }
 0xfbe   : > { %4043 = vmatmul.msk.f32.vlgmr.msrb.gmra.mxu1 %vm5816_vm3, %v2529_v30  ;;  %4047 = vmatmul.msk.f32.vlgmr.msra.gmra.mxu0 %vm5817_vm13, %v2529_v30  ;;  %vm5823_vm3 = vmmov %vm5819_vm1 }
 0xfbf   : > { %4058 = vmatpush.msk.msrb.mxu1 %vm5746_vm5, %v5688_v21  ;;  %vm5824_vm13 = vmmov %vm5819_vm1 }
 0xfc6   : > { %4053 = vmatmul.msk.f32.vlgmr.msra.gmra.mxu1 %vm5818_vm10, %v2529_v30  ;;  %vm5825_vm10 = vnez %v5690_v6 }
 0xfc7   : > { %4072 = vmatpush.msk.msra.mxu1 %vm5748_vm2, %v5688_v21 }
 0xfc9   : > { %4073 = vmatpush.msk.msra.mxu1 %vm4864_vm4, %v5688_v21 }
0x103b   : > { %v2550_v51 = vpop.f32.mrf.mxu1  ;;  %v2613_v43 = vpop.f32.mrf.mxu0 }
0x103c   : > { %2588 = vmatpush.msra.mxu3 %v2550_v51  ;;  %2639 = vmatpush.msra.mxu2 %v2613_v43  ;;  %v5868_v51 = vld [vmem:[#allocation9_spill] sm:$0xff] }
0x103d   : > { %4044 = vmatmul.msk.f32.vlgmr.msra.gmra.mxu3 %vm5819_vm1, %v4771_v63  ;;  %4050 = vmatmul.msk.f32.vlgmr.msra.gmra.mxu2 %vm5820_vm15, %v4776_v0  ;;  %vm5826_vm1 = vcmp.eq.s32.totalorder %v4407_v3, %v4493_v16  ;;  %vm5827_vm15 = vcmp.eq.s32.totalorder %v4410_v4, %v4493_v16  ;;  %v2560_v63 = vpop.permute.xlu1 %2559 }
0x103e   : > { %4061 = vmatpush.msk.msrb.mxu3 %vm5751_vm6, %v5688_v21 }
0x1040   : > { %4062 = vmatpush.msk.msrb.mxu3 %vm5821_vm7, %v5688_v21 }
0x1043   : > { %v2666_v9 = vpop.f32.mrf.mxu1 }
0x1044   : > { %2692 = vmatpush.msrb.mxu0 %v2666_v9 }
0x1045   : > { %4045 = vmatmul.msk.f32.gmra.mxu3 %vm5822_vm9, %v4785_v12  ;;  %4051 = vmatmul.msk.f32.gmra.mxu2 %vm5823_vm3, %v4790_v15  ;;  %vm5828_vm9 = vmmov %vm5823_vm3  ;;  %vm5829_vm3 = vnez %v5659_v19 }
0x1046   : > { %4056 = vmatmul.msk.f32.vlgmr.msrb.gmra.mxu0 %vm5824_vm13, %v5754_v56  ;;  %vm5830_vm13 = vmmov %vm5828_vm9 }
0x1047   : > { %4066 = vmatpush.msk.msra.mxu0 %vm5757_vm12, %v5688_v21  ;;  %vm5840_vm12 = vnez %v5665_v38 }
0x1049   : > { %4067 = vmatpush.msk.msra.mxu0 %vm5825_vm10, %v5688_v21 }
0x104b   : > { %4088 = vmatpush.msk.msrb.mxu0 %vm5826_vm1, %v5688_v21  ;;  %vm5831_vm1 = vcmp.eq.s32.totalorder %v4407_v3, %v4453_v10 }
0x104d   : > { %4089 = vmatpush.msk.msrb.mxu0 %vm5827_vm15, %v5688_v21  ;;  %vm5832_vm15 = vcmp.eq.s32.totalorder %v4410_v4, %v4453_v10 }
0x104e   : > { %4057 = vmatmul.msk.f32.gmra.mxu0 %vm5828_vm9, %v5760_v61  ;;  %vm5833_vm9 = vnez %v5655_v13  ;;  %v4079_v13 = vld [vmem:[%s4432_s25 + $0xc] sm:$0xf] }
0x104f   : > { %4090 = vmatpush.msk.msrb.mxu0 %vm5829_vm3, %v5688_v21  ;;  %vm5834_vm3 = vmmov %vm5830_vm13 }
0x1051   : > { %4091 = vmatpush.msk.msrb.mxu0 %vm4524_vm14, %v5688_v21 }
0x10c0   : > { %v2590_v0 = vpop.f32.mrf.mxu3  ;;  %v2641_v12 = vpop.f32.mrf.mxu2 }
0x10c1   : > { %v2591_v15 = vadd.f32 %v2590_v0, %v2560_v63  ;;  %v5870_v63 = vld [vmem:[#allocation8_spill] sm:$0xff] }
0x10c3   : > { %v2647_v56 = vadd.f32 %v2641_v12, %v2591_v15  ;;  %v2694_v5 = vpop.f32.mrf.mxu0 }
0x10c5   : > { %v2700_v34 = vadd.f32 %v2694_v5, %v2647_v56 }
0x10c7   : > { %v2702_v16 = vmax.f32 %v2700_v34, 0.0 }
0x10c8   : > { %v2593_v39 = vpop.f32.mrf.mxu3  ;;  %v2644_v37 = vpop.f32.mrf.mxu2 }
0x10c9   : > { %v2594_v61 = vadd.f32 %v2593_v39, %v4956_v44  ;;  %4059 = vmatmul.msk.f32.vlgmr.msrb.gmra.mxu1 %vm5830_vm13, %v2702_v16  ;;  %vm5835_vm13 = vcmask 130048  }
0x10ca   : > { %4098 = vmatpush.msk.msrb.mxu1 %vm5831_vm1, %v5688_v21  ;;  %vm5836_vm1 = vmmov %vm5835_vm13 }
0x10cb   : > { %v2648_v19 = vadd.f32 %v2644_v37, %v2594_v61  ;;  %v2697_v28 = vpop.f32.mrf.mxu0  ;;  %vm5837_vm10 = vmmov %vm5836_vm1 }
0x10cc   : > { %4099 = vmatpush.msk.msrb.mxu1 %vm5832_vm15, %v5688_v21  ;;  %vm5838_vm15 = vcmask 1045504  }
0x10cd   : > { %v2701_v23 = vadd.f32 %v2697_v28, %v2648_v19 }
0x10ce   : > { %4100 = vmatpush.msk.msrb.mxu1 %vm5833_vm9, %v5688_v21  ;;  %vm5839_vm9 = vcmp.eq.s32.totalorder %v4410_v4, %v4585_v33 }
0x10cf   : > { %v2703_v44 = vmax.f32 %v2701_v23, 0.0 }
0x10d0   : > { %4101 = vmatpush.msk.msrb.mxu1 %vm4478_vm8, %v5688_v21 }
0x10d1   : > { %4060 = vmatmul.msk.f32.gmra.mxu1 %vm5834_vm3, %v2703_v44  ;;  %vm5841_vm3 = vmmov %vm5836_vm1 }
0x1146   : > { %v2727_v52 = vpop.f32.mrf.mxu1 }
0x1147   : > { %4063 = vmatmul.msk.f32.vlgmr.msrb.gmra.mxu3 %vm5835_vm13, %v2727_v52  ;;  %4068 = vmatmul.msk.f32.vlgmr.msra.gmra.mxu0 %vm5836_vm1, %v2727_v52  ;;  %vm5842_vm13 = vmmov %vm5836_vm1 }
0x1148   : > { %4074 = vmatmul.msk.f32.vlgmr.msra.gmra.mxu1 %vm5837_vm10, %v2727_v52  ;;  %vm5843_vm10 = vcmask 261120  }
0x1149   : > { %4108 = vmatpush.msk.msra.mxu1 %vm5838_vm15, %v4595_v36  ;;  %vm5844_vm15 = vmmov %vm5843_vm10 }
0x114b   : > { %4109 = vmatpush.msk.msra.mxu1 %vm5839_vm9, %v5688_v21  ;;  %vm5845_vm9 = vcmask 1046528  }
0x114d   : > { %4110 = vmatpush.msk.msra.mxu1 %vm5840_vm12, %v5688_v21  ;;  %vm5846_vm12 = vmmov %vm5836_vm1 }
0x114e   : > { %v2730_v10 = vpop.f32.mrf.mxu1 }
0x114f   : > { %4064 = vmatmul.msk.f32.gmra.mxu3 %vm5841_vm3, %v2730_v10  ;;  %4069 = vmatmul.msk.f32.gmra.mxu0 %vm5842_vm13, %v2730_v10  ;;  %vm5848_vm3 = vcmp.eq.s32.totalorder %v4407_v3, %v4404_v2  ;;  %vm5849_vm13 = vcmp.eq.s32.totalorder %v4410_v4, %v4404_v2  ;;  %v2927_v3 = vpop.permute.xlu1 %2926 }
0x1150   : > { %4075 = vmatmul.msk.f32.gmra.mxu1 %vm5836_vm1, %v2730_v10 }
0x1151   : > { %4111 = vmatpush.msk.msra.mxu1 %vm4636_vm0, %v5688_v21 }
0x1157   : > { %4092 = vmatmul.msk.f32.vlgmr.msrb.gmra.mxu0 %vm5843_vm10, %v4079_v13  ;;  %vm5850_vm10 = vnez %v5651_v7  ;;  %v5398_v7 = vpop.permute.xlu1 %3363 }
0x1158   : > { %4102 = vmatmul.msk.f32.vlgmr.msrb.gmra.mxu1 %vm5844_vm15, %v4079_v13  ;;  %vm5851_vm15 = vnez %v5653_v8 }
0x1159   : > { %4125 = vmatpush.msk.msrb.mxu1 %vm5845_vm9, %v4664_v58  ;;  %v2762_v58 = vld [vmem:[%s5585_s7] sm:$0xf]  ;;  %vm5852_vm9 = vcmask 261120  }
0x115b   : > { %4126 = vmatpush.msk.msrb.mxu1 %vm4524_vm14, %v5688_v21  ;;  %vm5847_vm14 = vmmov %vm5836_vm1 }
0x11c4   : > { %v2809_v38 = vpop.f32.mrf.mxu0 }
0x11c5   : > { %v2857_v33 = vpop.f32.mrf.mxu1 }
0x11ca   : > { %v2756_v36 = vpop.f32.mrf.mxu3 }
0x11cc   : > { %v2812_v20 = vpop.f32.mrf.mxu0 }
0x11cd   : > { %v2860_v25 = vpop.f32.mrf.mxu1 }
0x11ce   : > { %2881 = vmatpush.msra.mxu3 %v2860_v25 }
0x11d0   : > { %2882 = vmatpush.msra.mxu3 %v2857_v33 }
0x11d1   : > { %4077 = vmatmul.msk.f32.vlgmr.msra.gmra.mxu3 %vm5846_vm12, %v4076_v22  ;;  %vm5853_vm12 = vcmask 1043456   ;;  %v4135_v22 = vld [vmem:[%s5581_s3 + $0x10] sm:$0xff] }
0x11d2   : > { %v2759_v17 = vpop.f32.mrf.mxu3 }
0x11d3   : > { %2786 = vmatpush.msrb.mxu2 %v2759_v17 }
0x11d4   : > { %v2978_v50 = vpop.f32.mrf.mxu0 }
0x11d5   : > { %2787 = vmatpush.msrb.mxu2 %v2756_v36  ;;  %v3034_v2 = vpop.f32.mrf.mxu1  ;;  %v4129_v36 = vld [vmem:[%s5581_s3 + $0x8] sm:$0xff] }
0x11d6   : > { %4065 = vmatmul.msk.f32.vlgmr.msrb.gmra.mxu2 %vm5847_vm14, %v2762_v58  ;;  %vm5854_vm14 = vcmask 31744  }
0x11d7   : > { %2833 = vmatpush.msra.mxu2 %v2812_v20 }
0x11d9   : > { %2834 = vmatpush.msra.mxu2 %v2809_v38  ;;  %v3158_v38 = vld [vmem:[%s5581_s3] sm:$0xff] }
0x11db   : > { %4080 = vmatpush.msk.msrb.mxu2 %vm5848_vm3, %v5688_v21  ;;  %vm5855_vm3 = vcmask 1046528  }
0x11dd   : > { %4081 = vmatpush.msk.msrb.mxu2 %vm5849_vm13, %v5688_v21  ;;  %vm5856_vm13 = vmmov %vm5853_vm12 }
0x11de   : > { %4071 = vmatmul.msk.f32.vlgmr.msra.gmra.mxu2 %vm5836_vm1, %v4070_v49  ;;  %4105 = vmatpush.msk.msra.mxu0 %vm5856_vm13, %v3034_v2  ;;  %vm5857_vm1 = vmmov %vm5854_vm14 }
0x11df   : > { %4082 = vmatpush.msk.msrb.mxu2 %vm5850_vm10, %v5688_v21  ;;  %vm5858_vm10 = vmmov %vm5857_vm1 }
0x11e0   : > { %4106 = vmatmul.msk.f32.vlgmr.msra.gmra.mxu0 %vm5858_vm10, %v5183_v32  ;;  %v5864_v32 = vld [vmem:[#allocation5_spill] sm:$0xff] }
0x11e1   : > { %4083 = vmatpush.msk.msrb.mxu2 %vm5851_vm15, %v5688_v21  ;;  %vm5865_vm13 = vcmp.eq.s32.totalorder %v4410_v4, %v5864_v32 }
0x11e3   : > { %4095 = vmatpush.msk.msra.mxu2 %vm5853_vm12, %v2978_v50 }
0x11e6   : > { %4084 = vmatmul.msk.f32.vlgmr.msrb.gmra.mxu2 %vm5852_vm9, %v4079_v13  ;;  %vm5859_vm9 = vmmov %vm5857_vm1 }
0x11e7   : > { %4120 = vmatpush.msk.msrb.mxu2 %vm5855_vm3, %v4659_v57  ;;  %v2767_v57 = vpop.permute.xlu1 %2766  ;;  %vm5863_vm3 = vcmask 1045504   ;;  %vm5869_vm10 = vmmov %vm5859_vm9 }
0x11e8   : > { %4107 = vmatmul.msk.f32.gmra.mxu0 %vm5859_vm9, %v5195_v26  ;;  %v5866_v26 = vld [vmem:[#allocation7_spill] sm:$0xff]  ;;  %vm5871_vm9 = vcmask 244736  }
0x11e9   : > { %4121 = vmatpush.msk.msrb.mxu2 %vm5851_vm15, %v5688_v21  ;;  %vm5860_vm15 = vcmask 257024  }
0x11ee   : > { %4096 = vmatmul.msk.f32.vlgmr.msra.gmra.mxu2 %vm5854_vm14, %v5165_v18  ;;  %vm5861_vm14 = vmmov %vm5857_vm1 }
0x11f6   : > { %4097 = vmatmul.msk.f32.gmra.mxu2 %vm5857_vm1, %v5178_v27  ;;  %v5862_v27 = vld [vmem:[#allocation6_spill] sm:$0xff]  ;;  %vm5867_vm1 = vnez %v5866_v26 }
0x1254   : > { %v2884_v8 = vpop.f32.mrf.mxu3 }
0x1259   : > { %v2789_v18 = vpop.f32.mrf.mxu2 }
0x125a   : > { %v2790_v24 = vadd.f32 %v2789_v18, %v2767_v57 }
0x125d   : > { %v3065_v9 = vpop.f32.mrf.mxu0 }
0x1261   : > { %v2836_v47 = vpop.f32.mrf.mxu2 }
0x1262   : > { %v2839_v46 = vadd.f32 %v2836_v47, %v2790_v24  ;;  %v4155_v24 = vld [vmem:[%s5583_s5 + $0x20] sm:$0xff] }
0x1264   : > { %v2887_v29 = vadd.f32 %v2884_v8, %v2839_v46  ;;  %v5903_v8 = vld [vmem:[#allocation10_spill] sm:$0xff] }
0x1265   : > { %v3068_v16 = vpop.f32.mrf.mxu0 }
0x1266   : > { %4078 = vst.msk [vmem:[%s4978_s27 + $0x8] sm:$0xf] %vm5860_vm15, %v2887_v29  ;;  %vm5872_vm15 = vmmov %vm5871_vm9 }
0x1269   : > { %v2912_v30 = vpop.f32.mrf.mxu2 }
0x126a   : > { %4085 = vmatpush.msk.msrb.mxu3 %vm5853_vm12, %v2912_v30  ;;  %vm5873_vm12 = vmmov %vm5863_vm3 }
0x126b   : > { %4086 = vmatmul.msk.f32.vlgmr.msrb.gmra.mxu3 %vm5861_vm14, %v5204_v11  ;;  %vm5874_vm14 = vmmov %vm5871_vm9 }
0x126c   : > { %4114 = vmatpush.msk.msra.mxu3 %vm5863_vm3, %v5862_v27  ;;  %vm5875_vm3 = vmmov %vm5871_vm9 }
0x126e   : > { %4115 = vmatpush.msk.msra.mxu3 %vm5865_vm13, %v5688_v21  ;;  %vm5876_vm13 = vcmask 121856  }
0x1270   : > { %4116 = vmatpush.msk.msra.mxu3 %vm5867_vm1, %v5688_v21  ;;  %vm5877_vm1 = vmmov %vm5876_vm13 }
0x1271   : > { %v3009_v11 = vpop.f32.mrf.mxu2 }
0x1272   : > { %4117 = vmatpush.msk.msra.mxu3 %vm5725_vm11, %v5688_v21 }
0x1273   : > { %4087 = vmatmul.msk.f32.gmra.mxu3 %vm5869_vm10, %v5868_v51  ;;  %vm5878_vm10 = vmmov %vm5873_vm12 }
0x1279   : > { %v3012_v5 = vpop.f32.mrf.mxu2 }
0x12ee   : > { %v2955_v43 = vpop.f32.mrf.mxu3 }
0x12ef   : > { %v2956_v0 = vadd.f32 %v2955_v43, %v5870_v63 }
0x12f1   : > { %v3015_v12 = vadd.f32 %v3009_v11, %v2956_v0 }
0x12f3   : > { %v3071_v15 = vadd.f32 %v3065_v9, %v3015_v12 }
0x12f5   : > { %v3073_v4 = vmax.f32 %v3071_v15, 0.0 }
0x12f6   : > { %v2958_v56 = vpop.f32.mrf.mxu3 }
0x12f7   : > { %v2959_v34 = vadd.f32 %v2958_v56, %v2927_v3  ;;  %4112 = vmatmul.msk.f32.vlgmr.msra.gmra.mxu1 %vm5871_vm9, %v3073_v4  ;;  %4118 = vmatmul.msk.f32.vlgmr.msra.gmra.mxu3 %vm5872_vm15, %v3073_v4  ;;  %vm5879_vm9 = vmmov %vm5877_vm1  ;;  %v4177_v4 = vld [vmem:[%s5585_s7 + $0x8] sm:$0xf] }
0x12f8   : > { %4143 = vmatpush.msk.msra.mxu1 %vm5873_vm12, %v4743_v53  ;;  %vm5880_vm15 = vmmov %vm5877_vm1  ;;  %vm5881_vm12 = vcmask 130048  }
0x12f9   : > { %v3016_v39 = vadd.f32 %v3012_v5, %v2959_v34  ;;  %v3561_v5 = vld [vmem:[%s5585_s7] sm:$0xf] }
0x12fb   : > { %v3072_v37 = vadd.f32 %v3068_v16, %v3016_v39  ;;  %v4171_v16 = vld [vmem:[%s5585_s7 + $0x4] sm:$0xf] }
0x12fd   : > { %v3074_v61 = vmax.f32 %v3072_v37, 0.0  ;;  %v3566_v37 = vpop.permute.xlu2 %3565 }
0x12ff   : > { %4113 = vmatmul.msk.f32.gmra.mxu1 %vm5874_vm14, %v3074_v61  ;;  %4119 = vmatmul.msk.f32.gmra.mxu3 %vm5875_vm3, %v3074_v61  ;;  %vm5882_vm14 = vcmask 1044480   ;;  %vm5883_vm3 = vmmov %vm5881_vm12 }
0x1374   : > { %v3098_v19 = vpop.f32.mrf.mxu1 }
0x137a   : > { %v3121_v28 = vpop.f32.mrf.mxu3 }
0x137b   : > { %v3127_v23 = vmax.f32 %v3098_v19, %v3121_v28 }
0x137c   : > { %v3101_v44 = vpop.f32.mrf.mxu1 }
0x137d   : > { %4122 = vmatmul.msk.f32.vlgmr.msrb.gmra.mxu2 %vm5876_vm13, %v3127_v23  ;;  %4127 = vmatmul.msk.f32.vlgmr.msrb.gmra.mxu1 %vm5877_vm1, %v3127_v23  ;;  %vm5884_vm13 = vcmask 1046528   ;;  %vm5885_vm1 = vmmov %vm5878_vm10 }
0x137e   : > { %4153 = vmatpush.msk.msrb.mxu1 %vm5878_vm10, %v4755_v55  ;;  %vm5886_vm10 = vmmov %vm5879_vm9 }
0x1382   : > { %v3124_v52 = vpop.f32.mrf.mxu3 }
0x1383   : > { %v3128_v53 = vmax.f32 %v3101_v44, %v3124_v52 }
0x1385   : > { %4123 = vmatmul.msk.f32.gmra.mxu2 %vm5879_vm9, %v3128_v53  ;;  %4128 = vmatmul.msk.f32.gmra.mxu1 %vm5880_vm15, %v3128_v53  ;;  %vm5890_vm15 = vcmask 105472  }
0x13fa   : > { %v3205_v10 = vpop.f32.mrf.mxu1 }
0x1400   : > { %v3152_v13 = vpop.f32.mrf.mxu2 }
0x1402   : > { %v3208_v33 = vpop.f32.mrf.mxu1 }
0x1403   : > { %3229 = vmatpush.msrb.mxu3 %v3208_v33 }
0x1405   : > { %3230 = vmatpush.msrb.mxu3 %v3205_v10 }
0x1406   : > { %4130 = vmatmul.msk.f32.vlgmr.msrb.gmra.mxu3 %vm5881_vm12, %v4129_v36  ;;  %vm5891_vm12 = vmmov %vm5890_vm15 }
0x1407   : > { %4137 = vmatpush.msk.msra.mxu3 %vm5882_vm14, %v4719_v31 }
0x1408   : > { %v3155_v55 = vpop.f32.mrf.mxu2 }
0x1409   : > { %3182 = vmatpush.msrb.mxu0 %v3155_v55  ;;  %4138 = vmatpush.msk.msra.mxu3 %vm4636_vm0, %v5688_v21  ;;  %vm5887_vm0 = vmmov %vm5883_vm3 }
0x140b   : > { %3183 = vmatpush.msrb.mxu0 %v3152_v13 }
0x140c   : > { %4124 = vmatmul.msk.f32.vlgmr.msrb.gmra.mxu0 %vm5883_vm3, %v3158_v38 }
0x140d   : > { %4131 = vmatpush.msk.msra.mxu0 %vm5884_vm13, %v4679_v59 }
0x140f   : > { %4132 = vmatpush.msk.msra.mxu0 %vm4478_vm8, %v5688_v21  ;;  %vm5888_vm8 = vmmov %vm5882_vm14  ;;  %vm5892_vm14 = vcmask 48128  }
0x1410   : > { %vm5893_vm3 = vmmov %vm5892_vm14 }
0x1411   : > { %4147 = vmatpush.msk.msrb.mxu0 %vm5885_vm1, %v4746_v54  ;;  %vm5901_vm1 = vnez %v5690_v6 }
0x1414   : > { %4133 = vmatmul.msk.f32.vlgmr.msra.gmra.mxu0 %vm5886_vm10, %v3127_v23 }
0x141c   : > { %4134 = vmatmul.msk.f32.gmra.mxu0 %vm5879_vm9, %v3128_v53 }
0x1489   : > { %v3185_v31 = vpop.f32.mrf.mxu0  ;;  %v3232_v54 = vpop.f32.mrf.mxu3 }
0x148a   : > { %v3186_v59 = vadd.f32 %v3185_v31, %v5889_v14 }
0x148c   : > { %v3235_v17 = vadd.f32 %v3232_v54, %v3186_v59 }
0x1491   : > { %v3253_v40 = vpop.f32.mrf.mxu0 }
0x1499   : > { %v3256_v25 = vpop.f32.mrf.mxu0 }
0x149a   : > { %3277 = vmatpush.msra.mxu2 %v3256_v25 }
0x149c   : > { %3278 = vmatpush.msra.mxu2 %v3253_v40 }
0x149d   : > { %4136 = vmatmul.msk.f32.vlgmr.msra.gmra.mxu2 %vm5887_vm0, %v4135_v22 }
0x149e   : > { %4140 = vmatpush.msk.msrb.mxu2 %vm5888_vm8, %v4724_v42  ;;  %v4149_v42 = vld [vmem:[%s5583_s5 + $0x10] sm:$0xff]  ;;  %vm5906_vm8 = vcmask 130048  }
0x14a0   : > { %4141 = vmatpush.msk.msrb.mxu2 %vm5725_vm11, %v5688_v21  ;;  %vm5894_vm11 = vmmov %vm5893_vm3 }
0x1520   : > { %v3280_v58 = vpop.f32.mrf.mxu2 }
0x1521   : > { %v3283_v20 = vadd.f32 %v3280_v58, %v3235_v17 }
0x1523   : > { %v3284_v49 = vmax.f32 %v3283_v20, 0.0 }
0x1525   : > { %4139 = vmatmul.msk.f32.vlgmr.msra.gmra.mxu3 %vm5890_vm15, %v3284_v49  ;;  %4142 = vmatmul.msk.f32.vlgmr.msrb.gmra.mxu2 %vm5891_vm12, %v3284_v49  ;;  %vm5907_vm15 = vmmov %vm5906_vm8 }
0x1526   : > { %vm5908_vm12 = vmmov %vm5906_vm8 }
0x15a8   : > { %v3305_v3 = vpop.f32.mrf.mxu3  ;;  %v3325_v50 = vpop.f32.mrf.mxu2 }
0x15a9   : > { %v3328_v2 = vmax.f32 %v3305_v3, %v3325_v50 }
0x15ab   : > { %4144 = vmatmul.msk.f32.vlgmr.msra.gmra.mxu1 %vm5892_vm14, %v3328_v2  ;;  %4148 = vmatmul.msk.f32.vlgmr.msrb.gmra.mxu0 %vm5893_vm3, %v3328_v2  ;;  %vm5909_vm14 = vmmov %vm5906_vm8 }
0x15ac   : > { %4159 = vmatpush.msk.msra.mxu1 %vm5746_vm5, %v5688_v21  ;;  %vm5895_vm5 = vcmask 64512   ;;  %vm5910_vm3 = vmmov %vm5906_vm8 }
0x15ad   : > { %vm5896_vm13 = vmmov %vm5895_vm5 }
0x15b3   : > { %4154 = vmatmul.msk.f32.vlgmr.msrb.gmra.mxu1 %vm5894_vm11, %v3328_v2  ;;  %vm5911_vm11 = vmmov %vm5910_vm3 }
0x15b4   : > { %4173 = vmatpush.msk.msrb.mxu1 %vm5748_vm2, %v5688_v21 }
0x15b6   : > { %4174 = vmatpush.msk.msrb.mxu1 %vm4864_vm4, %v5688_v21  ;;  %vm5897_vm4 = vmmov %vm5895_vm5 }
0x15b7   : > { %vm5898_vm2 = vmmov %vm5897_vm4 }
0x15b8   : > { %vm5902_vm10 = vmmov %vm5898_vm2 }
0x15b9   : > { %vm5904_vm9 = vmmov %vm5898_vm2 }
0x15ba   : > { %vm5905_vm0 = vmmov %vm5898_vm2 }
0x1628   : > { %v3349_v45 = vpop.f32.mrf.mxu1  ;;  %v3412_v18 = vpop.f32.mrf.mxu0 }
0x1629   : > { %3387 = vmatpush.msrb.mxu3 %v3349_v45  ;;  %3438 = vmatpush.msra.mxu2 %v3412_v18 }
0x162a   : > { %4145 = vmatmul.msk.f32.vlgmr.msrb.gmra.mxu3 %vm5895_vm5, %v3352_v41  ;;  %4151 = vmatmul.msk.f32.vlgmr.msra.gmra.mxu2 %vm5896_vm13, %v4149_v42  ;;  %vm5912_vm5 = vmmov %vm5910_vm3 }
0x162b   : > { %4162 = vmatpush.msk.msra.mxu3 %vm5751_vm6, %v5688_v21  ;;  %vm5899_vm6 = vmmov %vm5898_vm2 }
0x162c   : > { %vm5913_vm13 = vmmov %vm5910_vm3 }
0x162d   : > { %4163 = vmatpush.msk.msra.mxu3 %vm5821_vm7, %v5688_v21  ;;  %vm5900_vm7 = vnez %v5756_v60 }
0x1630   : > { %v3465_v57 = vpop.f32.mrf.mxu1 }
0x1631   : > { %3491 = vmatpush.msra.mxu0 %v3465_v57 }
0x1632   : > { %4146 = vmatmul.msk.f32.gmra.mxu3 %vm5897_vm4, %v3353_v62  ;;  %4152 = vmatmul.msk.f32.gmra.mxu2 %vm5898_vm2, %v4150_v1  ;;  %vm5914_vm4 = vmmov %vm5910_vm3  ;;  %vm5915_vm2 = vcmask 257024  }
0x1633   : > { %4157 = vmatmul.msk.f32.vlgmr.msra.gmra.mxu0 %vm5899_vm6, %v4155_v24 }
0x1634   : > { %4167 = vmatpush.msk.msrb.mxu0 %vm5900_vm7, %v5688_v21 }
0x1636   : > { %4168 = vmatpush.msk.msrb.mxu0 %vm5901_vm1, %v5688_v21 }
0x163b   : > { %4158 = vmatmul.msk.f32.gmra.mxu0 %vm5902_vm10, %v4156_v35 }
0x16ad   : > { %v3389_v48 = vpop.f32.mrf.mxu3  ;;  %v3440_v47 = vpop.f32.mrf.mxu2 }
0x16ae   : > { %v3390_v46 = vadd.f32 %v3389_v48, %v5903_v8 }
0x16b0   : > { %v3446_v29 = vadd.f32 %v3440_v47, %v3390_v46  ;;  %v3493_v30 = vpop.f32.mrf.mxu0 }
0x16b2   : > { %v3499_v27 = vadd.f32 %v3493_v30, %v3446_v29 }
0x16b4   : > { %v3501_v32 = vmax.f32 %v3499_v27, 0.0 }
0x16b5   : > { %v3392_v60 = vpop.f32.mrf.mxu3  ;;  %v3443_v26 = vpop.f32.mrf.mxu2 }
0x16b6   : > { %v3393_v51 = vadd.f32 %v3392_v60, %v5398_v7  ;;  %4160 = vmatmul.msk.f32.vlgmr.msra.gmra.mxu1 %vm5904_vm9, %v3501_v32 }
0x16b8   : > { %v3447_v21 = vadd.f32 %v3443_v26, %v3393_v51  ;;  %v3496_v6 = vpop.f32.mrf.mxu0 }
0x16ba   : > { %v3500_v11 = vadd.f32 %v3496_v6, %v3447_v21 }
0x16bc   : > { %v3502_v43 = vmax.f32 %v3500_v11, 0.0 }
0x16be   : > { %4161 = vmatmul.msk.f32.gmra.mxu1 %vm5905_vm0, %v3502_v43 }
0x1733   : > { %v3526_v9 = vpop.f32.mrf.mxu1 }
0x1734   : > { %4164 = vmatmul.msk.f32.vlgmr.msra.gmra.mxu3 %vm5906_vm8, %v3526_v9  ;;  %4169 = vmatmul.msk.f32.vlgmr.msrb.gmra.mxu0 %vm5907_vm15, %v3526_v9 }
0x1735   : > { %4175 = vmatmul.msk.f32.vlgmr.msrb.gmra.mxu1 %vm5908_vm12, %v3526_v9 }
0x173b   : > { %v3529_v63 = vpop.f32.mrf.mxu1 }
0x173c   : > { %4165 = vmatmul.msk.f32.gmra.mxu3 %vm5909_vm14, %v3529_v63  ;;  %4170 = vmatmul.msk.f32.gmra.mxu0 %vm5910_vm3, %v3529_v63 }
0x173d   : > { %4176 = vmatmul.msk.f32.gmra.mxu1 %vm5911_vm11, %v3529_v63 }
0x17b1   : > { %v3608_v12 = vpop.f32.mrf.mxu0 }
0x17b2   : > { %v3656_v7 = vpop.f32.mrf.mxu1 }
0x17b7   : > { %v3555_v0 = vpop.f32.mrf.mxu3 }
0x17b9   : > { %v3611_v34 = vpop.f32.mrf.mxu0 }
0x17ba   : > { %v3659_v15 = vpop.f32.mrf.mxu1 }
0x17bb   : > { %3680 = vmatpush.msrb.mxu3 %v3659_v15 }
0x17bd   : > { %3681 = vmatpush.msrb.mxu3 %v3656_v7 }
0x17be   : > { %4178 = vmatmul.msk.f32.vlgmr.msrb.gmra.mxu3 %vm5912_vm5, %v4177_v4 }
0x17bf   : > { %v3558_v56 = vpop.f32.mrf.mxu3 }
0x17c0   : > { %3585 = vmatpush.msrb.mxu2 %v3558_v56 }
0x17c2   : > { %3586 = vmatpush.msrb.mxu2 %v3555_v0 }
0x17c3   : > { %4166 = vmatmul.msk.f32.vlgmr.msrb.gmra.mxu2 %vm5913_vm13, %v3561_v5 }
0x17c4   : > { %3632 = vmatpush.msra.mxu2 %v3611_v34 }
0x17c6   : > { %3633 = vmatpush.msra.mxu2 %v3608_v12 }
0x17cb   : > { %4172 = vmatmul.msk.f32.vlgmr.msra.gmra.mxu2 %vm5914_vm4, %v4171_v16 }
0x1841   : > { %v3683_v28 = vpop.f32.mrf.mxu3 }
0x1846   : > { %v3588_v39 = vpop.f32.mrf.mxu2 }
0x1847   : > { %v3589_v61 = vadd.f32 %v3588_v39, %v3566_v37 }
0x184e   : > { %v3635_v19 = vpop.f32.mrf.mxu2 }
0x184f   : > { %v3638_v23 = vadd.f32 %v3635_v19, %v3589_v61 }
0x1851   : > { %v3686_v44 = vadd.f32 %v3683_v28, %v3638_v23 }
0x1853   : > { %4179 = vst.msk [vmem:[%s4978_s27 + $0xc] sm:$0xf] %vm5915_vm2, %v3686_v44 }
0x1854   : > { %4261 = shalt.err (!%p4258_p3)
}
0x1855   : > { %s4301_s24 = smov 64   ;;  %s4302_s27 = smov 4  }
0x1856   : > { %4187 = dma.vmem_to_hbm [thread:$0]  (%p4391_p5), %s3703_s16, 256, %s3705_s17, %s3690_s21, %s4301_s24, %s4301_s24, %s4302_s27  }
0x1857 PF: > { %p4193_p4 = scmp.ge.s32.totalorder %s4296_s12, 2  ;;  %s3719_s14 = sand.u32 1, %s4284_s30  }
0x1858   : > { %s3720_s23 = scalar_lea.sflag [#allocation3], %s3719_s14 }
0x1859   : > { %p4190_p7 = pnand %p4193_p4, %p4395_p6 }
0x185b   : > { %p4191_p8 = pneg %p4190_p7 }
0x185d   : > { %4279 = dma.done.wait (%p4191_p8), %s3720_s23, 256  }
0x185e   : > { %4281 = vsyncadd (%p4191_p8), %s3720_s23, 4294967040  ;;  %p19_p9 = scmp.ge.s32.totalorder %s4378_s15, 4   ;;  %s5916_s30 = smov %s4288_s10 }
0x185f   : > { %s5917_s10 = smov %s4292_s11  ;;  %s5918_s11 = smov %s4389_s18 }
0x1860   : > { %s5919_s12 = smov %s4378_s15  ;;  %21 = sbr.rel (!%p19_p9) target bundleno = 3 (0x3), region = 105 }
0x1865   :  { %3726 = vsyncpa [#allocation3], 1 }
0x1866   :  { %3728 = vsyncpa [#allocation3 + $0x1], 1 }

</bundles_post_ra>
